<compile_context>
chip_gen: v7x
topology: tpu7x:2x2x1
jax: 0.10.0
libtpu: 0.0.40
codegen_flags: <defaults>
</compile_context>

<pallas_src>
import functools
import math
import random

import numpy as np
import jax
import jax.numpy as jnp
from jax.experimental import pallas as pl
from jax.experimental.pallas import tpu as pltpu

# Set to jnp.bfloat16 on v6e/v7x for 2-4x MXU throughput (re-verify the 1e-3 check first).
MXU_DTYPE = jnp.float32


def round_up(x, m):
    return ((x + m - 1) // m) * m


# ----------------------------------------------------------------------------
# Fused per-channel kernel: all GAT layers + final Linear+Tanh
# ----------------------------------------------------------------------------
def han_channel_kernel(*refs, nlayer, nheads, fout, alpha, mxu_dtype):
    """refs = (x,
               [w_cat, a_src_cat, a_dst_cat, bias, rowsel] * nlayer,
               wl_t, bl, out)

    x:         (Nn0, Fin_pad)       padded neighbour-set features (f32)
    w_cat:     (Fin_pad, H*Fout)    per-layer head-concatenated W
    a_src_cat: (H*Fout, H)          block-diag columns a[:Fout] per head
    a_dst_cat: (H, H*Fout)          block-diag rows    a[Fout:] per head
    bias:      (Nt, Nn)  bf16       0 on edges, -9e15 elsewhere (additive mask)
    rowsel:    (Nt, Nn)  bf16       one-hot target -> neighbour-frame index
    wl_t:      (D, D)               linear_block weight, pre-transposed to (in, out)
    bl:        (1, D)
    out:       (Nt_last, D)         tanh(concat_heads(...) @ Wl^T + b), lane-dense
    """
    x_ref = refs[0]
    wl_ref = refs[1 + 5 * nlayer]
    bl_ref = refs[2 + 5 * nlayer]
    out_ref = refs[3 + 5 * nlayer]

    x = x_ref[...]                                              # (Nn0, Fin_pad) f32
    for li in range(nlayer):                                    # static unroll over layers
        base = 1 + 5 * li
        w_cat = refs[base][...]
        a_src_cat = refs[base + 1][...]
        a_dst_cat = refs[base + 2][...]
        bias = refs[base + 3][...].astype(jnp.float32)          # (Nt, Nn)
        rowsel = refs[base + 4][...].astype(jnp.float32)        # (Nt, Nn), exact 0/1
        H = nheads[li]

        # single lane-dense projection for all heads           (Nn, H*Fout)
        h_all = jnp.dot(x.astype(mxu_dtype), w_cat.astype(mxu_dtype),
                        preferred_element_type=jnp.float32)

        # per-node attention scores for all heads in two small matmuls
        s_src = jnp.dot(h_all, a_src_cat,
                        preferred_element_type=jnp.float32)     # (Nn, H)
        s_dst_t = jax.lax.dot_general(a_dst_cat, h_all,
                                      (((1,), (1,)), ((), ())),
                                      preferred_element_type=jnp.float32)  # (H, Nn)
        s_row = jnp.dot(rowsel, s_src,
                        preferred_element_type=jnp.float32)     # (Nt, H)

        head_outs = []
        for hd in range(H):                                     # static unroll over heads
            z = s_row[:, hd:hd + 1] + s_dst_t[hd:hd + 1, :]     # (Nt, Nn)
            z = jnp.maximum(z, alpha * z)                       # LeakyReLU (alpha < 1)
            logits = z + bias                                   # -9e15 off-edge (== scatter)

            # stable row softmax; divide only on the (Nt,1) denominator
            m = jnp.max(logits, axis=1, keepdims=True)
            p = jnp.exp(logits - m)
            inv = 1.0 / jnp.sum(p, axis=1, keepdims=True)
            att = p * inv

            h_head = h_all[:, hd * fout:(hd + 1) * fout]        # (Nn, Fout) lane slice
            hp = jnp.dot(att.astype(mxu_dtype), h_head.astype(mxu_dtype),
                         preferred_element_type=jnp.float32)    # (Nt, Fout)
            # ELU (exp-1 form; difference vs expm1 is << 1e-3)
            head_outs.append(jnp.where(hp > 0, hp,
                                       jnp.exp(jnp.minimum(hp, 0.0)) - 1.0))

        x = jnp.concatenate(head_outs, axis=1)                  # (Nt, H*Fout) lane-dense

    # fused linear_block: tanh(x @ Wl^T + b); Wl pre-transposed -> plain (1,0) contraction
    y = jnp.dot(x.astype(mxu_dtype), wl_ref[...].astype(mxu_dtype),
                preferred_element_type=jnp.float32) + bl_ref[...]
    out_ref[...] = jnp.tanh(y)                                  # single lane-dense store


def run_channel(prep, chp, nlayer, nheads, nhid, alpha, ns):
    """One pallas_call per channel covering every layer + the linear block."""
    d = nhid * nheads[-1]
    args = [prep["x_pad"]]
    for li in range(nlayer):
        args += [chp["w_cat"][li], chp["a_src_cat"][li], chp["a_dst_cat"][li],
                 prep["layers"][li]["bias"], prep["layers"][li]["rowsel"]]
    args += [chp["wl_t"], chp["bl"]]

    kernel = functools.partial(
        han_channel_kernel, nlayer=nlayer, nheads=tuple(nheads),
        fout=nhid, alpha=float(alpha), mxu_dtype=MXU_DTYPE)

    pt0 = prep["layers"][-1]["pt"]                              # padded final target count
    out_pad = pl.pallas_call(
        kernel,
        out_shape=jax.ShapeDtypeStruct((pt0, d), jnp.float32),
        in_specs=[pl.BlockSpec(memory_space=pltpu.MemorySpace.VMEM)] * len(args),
        out_specs=pl.BlockSpec(memory_space=pltpu.MemorySpace.VMEM),
        compiler_params=pltpu.CompilerParams(vmem_limit_bytes=32 * 1024 * 1024),
    )(*args)
    return out_pad[:ns]


def han_forward(preps, params, nlayer, nheads, nhid, alpha, ns):
    outs = [run_channel(preps[c], params[c], nlayer, nheads, nhid, alpha, ns)
            for c in range(len(preps))]
    return jnp.stack(outs, axis=0)                              # == torch.stack(homo_out)


# ----------------------------------------------------------------------------
# Host-side graph preprocessing (HomoAttModel.sample / .transform) — numpy/python
# ----------------------------------------------------------------------------
def sample_subgraph(adj, samples, nlayer, neigh_por):
    sample_list, adj_list = [samples], []
    for _ in range(nlayer):
        new_samples, new_adjs = set(sample_list[-1]), []
        for s in sample_list[-1]:
            neighbor_size = adj[1][s]
            nneighbor = int(neigh_por * neighbor_size) + 1
            start = adj[1][:s].sum()
            if neighbor_size <= nneighbor:
                curr_new_samples = adj[0][start:start + neighbor_size]
            else:
                curr_new_samples = random.sample(
                    adj[0][start:start + neighbor_size].tolist(), nneighbor)
            new_samples = new_samples.union(set(curr_new_samples))
            curr_new_adjs = np.stack(
                ([s] * len(curr_new_samples), curr_new_samples), axis=-1).tolist()
            curr_new_adjs.append([s, s])
            new_adjs.append(curr_new_adjs)
        sample_list.append(np.array(list(new_samples)))
        adj_list.append(np.array([pair for chunk in new_adjs for pair in chunk]).T)
    return sample_list, adj_list


def transform_indices(sample_list, adj_list):
    trans_adj_list, target_index_outs = [], []
    base_index_dict = {k: v for v, k in enumerate(sample_list[0])}
    for i, adjs in enumerate(adj_list):
        target_index_outs.append([base_index_dict[k] for k in adjs[0]])
        base_index_dict = {k: v for v, k in enumerate(sample_list[i + 1])}
        neighbor_index_out = [base_index_dict[k] for k in adjs[0]]
        neighbor_index_in = [base_index_dict[k] for k in adjs[1]]
        trans_adj_list.append([neighbor_index_out, neighbor_index_in])
    return target_index_outs, trans_adj_list


def prepare_channel(feats_np, adj, samples, nlayer, neigh_por):
    """Builds (once, device-staged) padded x, additive bias and row-selection matrices."""
    sample_list, adj_list = sample_subgraph(adj, samples, nlayer, neigh_por)
    target_index_outs, trans_adj_list = transform_indices(sample_list, adj_list)

    nfeat = feats_np.shape[1]
    fin_pad = round_up(nfeat, 128)
    sizes = [len(s) for s in sample_list]
    # level 0 is only ever a target set (sublane multiple of 8); deeper levels are also
    # neighbour sets (lane dim of bias/rowsel) -> pad to multiples of 128.
    padded = [round_up(sizes[0], 8)] + [round_up(s, 128) for s in sizes[1:]]

    x_pad = np.zeros((padded[-1], fin_pad), np.float32)
    x_pad[:sizes[-1], :nfeat] = feats_np[sample_list[-1]]

    layers = []
    for li in range(nlayer):
        k = nlayer - 1 - li                      # forward consumes the lists back-to-front
        t_len, n_len = sizes[k], sizes[k + 1]
        pt, pn = padded[k], padded[k + 1]
        t_out = np.asarray(target_index_outs[k], dtype=np.int64)
        adj0 = np.asarray(trans_adj_list[k][0], dtype=np.int64)
        adj1 = np.asarray(trans_adj_list[k][1], dtype=np.int64)

        bias = np.full((pt, pn), -9e15, np.float32)   # additive mask (0 on edges)
        bias[t_out, adj1] = 0.0
        rowsel = np.zeros((pt, pn), np.float32)       # one-hot row selector (exact in bf16)
        rowsel[t_out, adj0] = 1.0

        layers.append(dict(
            bias=jnp.asarray(bias, dtype=jnp.bfloat16),
            rowsel=jnp.asarray(rowsel, dtype=jnp.bfloat16),
            pt=pt, pn=pn, t_len=t_len, n_len=n_len,
            t_out=t_out, adj0=adj0, adj1=adj1))

    return dict(sample_list=sample_list, layers=layers,
                x_pad=jnp.asarray(x_pad))


# ----------------------------------------------------------------------------
# Parameters (packed for the kernel + per-head numpy copies for the reference)
# ----------------------------------------------------------------------------
def xavier_uniform(key, shape, gain=1.414):
    bound = gain * math.sqrt(6.0 / (shape[0] + shape[-1]))
    return jax.random.uniform(key, shape, minval=-bound, maxval=bound, dtype=jnp.float32)


def init_params(key, nchannel, nlayer, nheads, nfeat, nhid):
    fin_pad0 = round_up(nfeat, 128)
    params = []
    for _c in range(nchannel):
        ch = {"W_np": [], "a_np": [], "w_cat": [], "a_src_cat": [], "a_dst_cat": []}
        for li in range(nlayer):
            in_dim = nfeat if li == 0 else nhid * nheads[li - 1]
            in_pad = fin_pad0 if li == 0 else in_dim
            H = nheads[li]
            w_np_l, a_np_l = [], []
            w_cat = np.zeros((in_pad, H * nhid), np.float32)
            a_src_cat = np.zeros((H * nhid, H), np.float32)
            a_dst_cat = np.zeros((H, H * nhid), np.float32)
            for h in range(H):
                key, k1, k2 = jax.random.split(key, 3)
                w = np.asarray(xavier_uniform(k1, (in_dim, nhid)))
                a = np.asarray(xavier_uniform(k2, (2 * nhid, 1)))
                w_np_l.append(w)
                a_np_l.append(a)
                w_cat[:in_dim, h * nhid:(h + 1) * nhid] = w
                a_src_cat[h * nhid:(h + 1) * nhid, h] = a[:nhid, 0]
                a_dst_cat[h, h * nhid:(h + 1) * nhid] = a[nhid:, 0]
            ch["W_np"].append(w_np_l)
            ch["a_np"].append(a_np_l)
            ch["w_cat"].append(jnp.asarray(w_cat))
            ch["a_src_cat"].append(jnp.asarray(a_src_cat))
            ch["a_dst_cat"].append(jnp.asarray(a_dst_cat))
        d = nhid * nheads[-1]
        key, k1, k2 = jax.random.split(key, 3)
        bound = 1.0 / math.sqrt(d)
        wl = np.asarray(jax.random.uniform(k1, (d, d), minval=-bound, maxval=bound,
                                           dtype=jnp.float32))
        bl = np.asarray(jax.random.uniform(k2, (d,), minval=-bound, maxval=bound,
                                           dtype=jnp.float32))
        ch["Wl_np"], ch["bl_np"] = wl, bl
        ch["wl_t"] = jnp.asarray(wl.T)            # pre-transposed: kernel does x @ Wl^T
        ch["bl"] = jnp.asarray(bl[None, :])
        params.append(ch)
    return params


# ----------------------------------------------------------------------------
# Pure numpy reference (mirrors the PyTorch ops exactly, unpadded)
# ----------------------------------------------------------------------------
def ref_homo_layer(x, w, a, adj0, adj1, t_len, n_len, t_out, alpha):
    h = x @ w
    compare = np.concatenate([h[adj0], h[adj1]], axis=1)
    e = (compare @ a)[:, 0]
    e = np.where(e >= 0, e, alpha * e)
    att = np.full((t_len, n_len), -9e15, dtype=np.float32)
    att[t_out, adj1] = e
    att = att - att.max(axis=1, keepdims=True)
    att = np.exp(att)
    att = att / att.sum(axis=1, keepdims=True)
    hp = att @ h
    return np.where(hp > 0, hp, np.expm1(np.minimum(hp, 0.0))).astype(np.float32)


def ref_channel(feats_np, prep, chp, alpha, nheads):
    x = feats_np[prep["sample_list"][-1]].astype(np.float32)
    for li, layer in enumerate(prep["layers"]):
        heads = [ref_homo_layer(x, chp["W_np"][li][hd], chp["a_np"][li][hd],
                                layer["adj0"], layer["adj1"],
                                layer["t_len"], layer["n_len"], layer["t_out"], alpha)
                 for hd in range(nheads[li])]
        x = np.concatenate(heads, axis=1)
    return np.tanh(x @ chp["Wl_np"].T + chp["bl_np"])


# ----------------------------------------------------------------------------
def build_adj(nnode, rng):
    degrees = rng.integers(2, 6, size=nnode).astype(np.int64)
    flat = [np.sort(rng.choice(np.delete(np.arange(nnode), v), size=int(degrees[v]),
                               replace=False))
            for v in range(nnode)]
    return np.concatenate(flat).astype(np.int64), degrees


if __name__ == "__main__":
    # Small, deterministic configuration consistent with the module.
    nchannel, nnode, nfeat, nhid = 2, 40, 64, 32
    nlayer, nheads, neigh_por, alpha = 2, [4, 4], 0.5, 0.2

    random.seed(0)
    np_rng = np.random.default_rng(0)
    adjs = [build_adj(nnode, np_rng) for _ in range(nchannel)]
    samples = np.array([0, 3, 7, 12, 18, 22, 30, 37], dtype=np.int64)

    key = jax.random.PRNGKey(0)
    key, kf = jax.random.split(key)
    feats = jax.random.normal(kf, (nnode, nfeat), dtype=jnp.float32)
    feats_np = np.asarray(feats)

    params = init_params(key, nchannel, nlayer, nheads, nfeat, nhid)
    preps = [prepare_channel(feats_np, adjs[c], samples, nlayer, neigh_por)
             for c in range(nchannel)]

    out = han_forward(preps, params, nlayer, nheads, nhid, alpha, len(samples))
    out = jax.block_until_ready(out)

    ref = np.stack([ref_channel(feats_np, preps[c], params[c], alpha, nheads)
                    for c in range(nchannel)], axis=0)

    assert out.shape == (nchannel, len(samples), nhid * nheads[-1])
    assert np.allclose(np.asarray(out), ref, atol=1e-3, rtol=1e-3), "mismatch vs reference"
    print("KERNEL_OK")
</pallas_src>

<mosaic_0001>
module attributes {stable_mosaic.version = 11 : i64} {
  func.func @han_channel_kernel(%arg0: memref<128x128xf32, #tpu.memory_space<vmem>>, %arg1: memref<128x128xf32, #tpu.memory_space<vmem>>, %arg2: memref<128x4xf32, #tpu.memory_space<vmem>>, %arg3: memref<4x128xf32, #tpu.memory_space<vmem>>, %arg4: memref<128x128xbf16, #tpu.memory_space<vmem>>, %arg5: memref<128x128xbf16, #tpu.memory_space<vmem>>, %arg6: memref<128x128xf32, #tpu.memory_space<vmem>>, %arg7: memref<128x4xf32, #tpu.memory_space<vmem>>, %arg8: memref<4x128xf32, #tpu.memory_space<vmem>>, %arg9: memref<8x128xbf16, #tpu.memory_space<vmem>>, %arg10: memref<8x128xbf16, #tpu.memory_space<vmem>>, %arg11: memref<128x128xf32, #tpu.memory_space<vmem>>, %arg12: memref<1x128xf32, #tpu.memory_space<vmem>>, %arg13: memref<8x128xf32, #tpu.memory_space<vmem>>) attributes {dimension_semantics = [], scalar_prefetch = 0 : i64, scratch_operands = 0 : i64, tpu.core_type = #tpu.core_type<tc>} {
    %c0 = arith.constant 0 : index
    %c0_0 = arith.constant 0 : index
    %0 = vector.load %arg0[%c0, %c0_0] : memref<128x128xf32, #tpu.memory_space<vmem>>, vector<128x128xf32>
    %c0_1 = arith.constant 0 : index
    %c0_2 = arith.constant 0 : index
    %1 = vector.load %arg1[%c0_1, %c0_2] : memref<128x128xf32, #tpu.memory_space<vmem>>, vector<128x128xf32>
    %c0_3 = arith.constant 0 : index
    %c0_4 = arith.constant 0 : index
    %2 = vector.load %arg2[%c0_3, %c0_4] : memref<128x4xf32, #tpu.memory_space<vmem>>, vector<128x4xf32>
    %c0_5 = arith.constant 0 : index
    %c0_6 = arith.constant 0 : index
    %3 = vector.load %arg3[%c0_5, %c0_6] : memref<4x128xf32, #tpu.memory_space<vmem>>, vector<4x128xf32>
    %c0_7 = arith.constant 0 : index
    %c0_8 = arith.constant 0 : index
    %4 = vector.load %arg4[%c0_7, %c0_8] : memref<128x128xbf16, #tpu.memory_space<vmem>>, vector<128x128xbf16>
    %5 = arith.extf %4 : vector<128x128xbf16> to vector<128x128xf32>
    %c0_9 = arith.constant 0 : index
    %c0_10 = arith.constant 0 : index
    %6 = vector.load %arg5[%c0_9, %c0_10] : memref<128x128xbf16, #tpu.memory_space<vmem>>, vector<128x128xbf16>
    %7 = arith.extf %6 : vector<128x128xbf16> to vector<128x128xf32>
    %cst = arith.constant dense<0.000000e+00> : vector<128x128xf32>
    %8 = tpu.matmul %0, %1, %cst {dimension_numbers = #tpu.dot_dimension_numbers<[1], [0], [0], [1], [0, 0, 1, 1], [], []>} : vector<128x128xf32>, vector<128x128xf32>, vector<128x128xf32> -> vector<128x128xf32>
    %cst_11 = arith.constant dense<0.000000e+00> : vector<128x4xf32>
    %9 = tpu.matmul %8, %2, %cst_11 {dimension_numbers = #tpu.dot_dimension_numbers<[1], [0], [0], [1], [0, 0, 1, 1], [], []>} : vector<128x128xf32>, vector<128x4xf32>, vector<128x4xf32> -> vector<128x4xf32>
    %cst_12 = arith.constant dense<0.000000e+00> : vector<4x128xf32>
    %10 = tpu.matmul %3, %8, %cst_12 {dimension_numbers = #tpu.dot_dimension_numbers<[1], [1], [0], [0], [0, 0, 1, 0], [], []>} : vector<4x128xf32>, vector<128x128xf32>, vector<4x128xf32> -> vector<4x128xf32>
    %cst_13 = arith.constant dense<0.000000e+00> : vector<128x4xf32>
    %11 = tpu.matmul %7, %9, %cst_13 {dimension_numbers = #tpu.dot_dimension_numbers<[1], [0], [0], [1], [0, 0, 1, 1], [], []>} : vector<128x128xf32>, vector<128x4xf32>, vector<128x4xf32> -> vector<128x4xf32>
    %12 = vector.extract_strided_slice %11 {offsets = [0, 0], sizes = [128, 1], strides = [1, 1]} : vector<128x4xf32> to vector<128x1xf32>
    %13 = vector.extract_strided_slice %10 {offsets = [0, 0], sizes = [1, 128], strides = [1, 1]} : vector<4x128xf32> to vector<1x128xf32>
    %14 = vector.broadcast %12 : vector<128x1xf32> to vector<128x128xf32>
    %15 = vector.broadcast %13 : vector<1x128xf32> to vector<128x128xf32>
    %16 = arith.addf %14, %15 : vector<128x128xf32>
    %cst_14 = arith.constant 2.000000e-01 : f32
    %17 = vector.broadcast %cst_14 : f32 to vector<128x128xf32>
    %18 = arith.mulf %17, %16 : vector<128x128xf32>
    %19 = arith.maximumf %16, %18 : vector<128x128xf32>
    %20 = arith.addf %19, %5 : vector<128x128xf32>
    %cst_15 = arith.constant dense<0xFF800000> : vector<128xf32>
    %21 = vector.multi_reduction <maximumf>, %20, %cst_15 [1] : vector<128x128xf32> to vector<128xf32>
    %22 = vector.shape_cast %21 : vector<128xf32> to vector<128x1xf32>
    %23 = vector.broadcast %22 : vector<128x1xf32> to vector<128x128xf32>
    %24 = arith.subf %20, %23 : vector<128x128xf32>
    %25 = math.exp %24 : vector<128x128xf32>
    %cst_16 = arith.constant dense<0.000000e+00> : vector<128xf32>
    %26 = vector.multi_reduction <add>, %25, %cst_16 [1] : vector<128x128xf32> to vector<128xf32>
    %27 = vector.shape_cast %26 : vector<128xf32> to vector<128x1xf32>
    %cst_17 = arith.constant 1.000000e+00 : f32
    %28 = vector.broadcast %cst_17 : f32 to vector<128x1xf32>
    %29 = arith.divf %28, %27 : vector<128x1xf32>
    %30 = vector.broadcast %29 : vector<128x1xf32> to vector<128x128xf32>
    %31 = arith.mulf %25, %30 : vector<128x128xf32>
    %32 = vector.extract_strided_slice %8 {offsets = [0, 0], sizes = [128, 32], strides = [1, 1]} : vector<128x128xf32> to vector<128x32xf32>
    %cst_18 = arith.constant dense<0.000000e+00> : vector<128x32xf32>
    %33 = tpu.matmul %31, %32, %cst_18 {dimension_numbers = #tpu.dot_dimension_numbers<[1], [0], [0], [1], [0, 0, 1, 1], [], []>} : vector<128x128xf32>, vector<128x32xf32>, vector<128x32xf32> -> vector<128x32xf32>
    %cst_19 = arith.constant 0.000000e+00 : f32
    %34 = vector.broadcast %cst_19 : f32 to vector<128x32xf32>
    %35 = arith.cmpf ogt, %33, %34 : vector<128x32xf32>
    %cst_20 = arith.constant 0.000000e+00 : f32
    %36 = vector.broadcast %cst_20 : f32 to vector<128x32xf32>
    %37 = arith.minimumf %33, %36 : vector<128x32xf32>
    %38 = math.exp %37 : vector<128x32xf32>
    %cst_21 = arith.constant 1.000000e+00 : f32
    %39 = vector.broadcast %cst_21 : f32 to vector<128x32xf32>
    %40 = arith.subf %38, %39 : vector<128x32xf32>
    %41 = arith.select %35, %33, %40 : vector<128x32xi1>, vector<128x32xf32>
    %42 = vector.extract_strided_slice %11 {offsets = [0, 1], sizes = [128, 1], strides = [1, 1]} : vector<128x4xf32> to vector<128x1xf32>
    %43 = vector.extract_strided_slice %10 {offsets = [1, 0], sizes = [1, 128], strides = [1, 1]} : vector<4x128xf32> to vector<1x128xf32>
    %44 = vector.broadcast %42 : vector<128x1xf32> to vector<128x128xf32>
    %45 = vector.broadcast %43 : vector<1x128xf32> to vector<128x128xf32>
    %46 = arith.addf %44, %45 : vector<128x128xf32>
    %cst_22 = arith.constant 2.000000e-01 : f32
    %47 = vector.broadcast %cst_22 : f32 to vector<128x128xf32>
    %48 = arith.mulf %47, %46 : vector<128x128xf32>
    %49 = arith.maximumf %46, %48 : vector<128x128xf32>
    %50 = arith.addf %49, %5 : vector<128x128xf32>
    %cst_23 = arith.constant dense<0xFF800000> : vector<128xf32>
    %51 = vector.multi_reduction <maximumf>, %50, %cst_23 [1] : vector<128x128xf32> to vector<128xf32>
    %52 = vector.shape_cast %51 : vector<128xf32> to vector<128x1xf32>
    %53 = vector.broadcast %52 : vector<128x1xf32> to vector<128x128xf32>
    %54 = arith.subf %50, %53 : vector<128x128xf32>
    %55 = math.exp %54 : vector<128x128xf32>
    %cst_24 = arith.constant dense<0.000000e+00> : vector<128xf32>
    %56 = vector.multi_reduction <add>, %55, %cst_24 [1] : vector<128x128xf32> to vector<128xf32>
    %57 = vector.shape_cast %56 : vector<128xf32> to vector<128x1xf32>
    %cst_25 = arith.constant 1.000000e+00 : f32
    %58 = vector.broadcast %cst_25 : f32 to vector<128x1xf32>
    %59 = arith.divf %58, %57 : vector<128x1xf32>
    %60 = vector.broadcast %59 : vector<128x1xf32> to vector<128x128xf32>
    %61 = arith.mulf %55, %60 : vector<128x128xf32>
    %62 = vector.extract_strided_slice %8 {offsets = [0, 32], sizes = [128, 32], strides = [1, 1]} : vector<128x128xf32> to vector<128x32xf32>
    %cst_26 = arith.constant dense<0.000000e+00> : vector<128x32xf32>
    %63 = tpu.matmul %61, %62, %cst_26 {dimension_numbers = #tpu.dot_dimension_numbers<[1], [0], [0], [1], [0, 0, 1, 1], [], []>} : vector<128x128xf32>, vector<128x32xf32>, vector<128x32xf32> -> vector<128x32xf32>
    %cst_27 = arith.constant 0.000000e+00 : f32
    %64 = vector.broadcast %cst_27 : f32 to vector<128x32xf32>
    %65 = arith.cmpf ogt, %63, %64 : vector<128x32xf32>
    %cst_28 = arith.constant 0.000000e+00 : f32
    %66 = vector.broadcast %cst_28 : f32 to vector<128x32xf32>
    %67 = arith.minimumf %63, %66 : vector<128x32xf32>
    %68 = math.exp %67 : vector<128x32xf32>
    %cst_29 = arith.constant 1.000000e+00 : f32
    %69 = vector.broadcast %cst_29 : f32 to vector<128x32xf32>
    %70 = arith.subf %68, %69 : vector<128x32xf32>
    %71 = arith.select %65, %63, %70 : vector<128x32xi1>, vector<128x32xf32>
    %72 = vector.extract_strided_slice %11 {offsets = [0, 2], sizes = [128, 1], strides = [1, 1]} : vector<128x4xf32> to vector<128x1xf32>
    %73 = vector.extract_strided_slice %10 {offsets = [2, 0], sizes = [1, 128], strides = [1, 1]} : vector<4x128xf32> to vector<1x128xf32>
    %74 = vector.broadcast %72 : vector<128x1xf32> to vector<128x128xf32>
    %75 = vector.broadcast %73 : vector<1x128xf32> to vector<128x128xf32>
    %76 = arith.addf %74, %75 : vector<128x128xf32>
    %cst_30 = arith.constant 2.000000e-01 : f32
    %77 = vector.broadcast %cst_30 : f32 to vector<128x128xf32>
    %78 = arith.mulf %77, %76 : vector<128x128xf32>
    %79 = arith.maximumf %76, %78 : vector<128x128xf32>
    %80 = arith.addf %79, %5 : vector<128x128xf32>
    %cst_31 = arith.constant dense<0xFF800000> : vector<128xf32>
    %81 = vector.multi_reduction <maximumf>, %80, %cst_31 [1] : vector<128x128xf32> to vector<128xf32>
    %82 = vector.shape_cast %81 : vector<128xf32> to vector<128x1xf32>
    %83 = vector.broadcast %82 : vector<128x1xf32> to vector<128x128xf32>
    %84 = arith.subf %80, %83 : vector<128x128xf32>
    %85 = math.exp %84 : vector<128x128xf32>
    %cst_32 = arith.constant dense<0.000000e+00> : vector<128xf32>
    %86 = vector.multi_reduction <add>, %85, %cst_32 [1] : vector<128x128xf32> to vector<128xf32>
    %87 = vector.shape_cast %86 : vector<128xf32> to vector<128x1xf32>
    %cst_33 = arith.constant 1.000000e+00 : f32
    %88 = vector.broadcast %cst_33 : f32 to vector<128x1xf32>
    %89 = arith.divf %88, %87 : vector<128x1xf32>
    %90 = vector.broadcast %89 : vector<128x1xf32> to vector<128x128xf32>
    %91 = arith.mulf %85, %90 : vector<128x128xf32>
    %92 = vector.extract_strided_slice %8 {offsets = [0, 64], sizes = [128, 32], strides = [1, 1]} : vector<128x128xf32> to vector<128x32xf32>
    %cst_34 = arith.constant dense<0.000000e+00> : vector<128x32xf32>
    %93 = tpu.matmul %91, %92, %cst_34 {dimension_numbers = #tpu.dot_dimension_numbers<[1], [0], [0], [1], [0, 0, 1, 1], [], []>} : vector<128x128xf32>, vector<128x32xf32>, vector<128x32xf32> -> vector<128x32xf32>
    %cst_35 = arith.constant 0.000000e+00 : f32
    %94 = vector.broadcast %cst_35 : f32 to vector<128x32xf32>
    %95 = arith.cmpf ogt, %93, %94 : vector<128x32xf32>
    %cst_36 = arith.constant 0.000000e+00 : f32
    %96 = vector.broadcast %cst_36 : f32 to vector<128x32xf32>
    %97 = arith.minimumf %93, %96 : vector<128x32xf32>
    %98 = math.exp %97 : vector<128x32xf32>
    %cst_37 = arith.constant 1.000000e+00 : f32
    %99 = vector.broadcast %cst_37 : f32 to vector<128x32xf32>
    %100 = arith.subf %98, %99 : vector<128x32xf32>
    %101 = arith.select %95, %93, %100 : vector<128x32xi1>, vector<128x32xf32>
    %102 = vector.extract_strided_slice %11 {offsets = [0, 3], sizes = [128, 1], strides = [1, 1]} : vector<128x4xf32> to vector<128x1xf32>
    %103 = vector.extract_strided_slice %10 {offsets = [3, 0], sizes = [1, 128], strides = [1, 1]} : vector<4x128xf32> to vector<1x128xf32>
    %104 = vector.broadcast %102 : vector<128x1xf32> to vector<128x128xf32>
    %105 = vector.broadcast %103 : vector<1x128xf32> to vector<128x128xf32>
    %106 = arith.addf %104, %105 : vector<128x128xf32>
    %cst_38 = arith.constant 2.000000e-01 : f32
    %107 = vector.broadcast %cst_38 : f32 to vector<128x128xf32>
    %108 = arith.mulf %107, %106 : vector<128x128xf32>
    %109 = arith.maximumf %106, %108 : vector<128x128xf32>
    %110 = arith.addf %109, %5 : vector<128x128xf32>
    %cst_39 = arith.constant dense<0xFF800000> : vector<128xf32>
    %111 = vector.multi_reduction <maximumf>, %110, %cst_39 [1] : vector<128x128xf32> to vector<128xf32>
    %112 = vector.shape_cast %111 : vector<128xf32> to vector<128x1xf32>
    %113 = vector.broadcast %112 : vector<128x1xf32> to vector<128x128xf32>
    %114 = arith.subf %110, %113 : vector<128x128xf32>
    %115 = math.exp %114 : vector<128x128xf32>
    %cst_40 = arith.constant dense<0.000000e+00> : vector<128xf32>
    %116 = vector.multi_reduction <add>, %115, %cst_40 [1] : vector<128x128xf32> to vector<128xf32>
    %117 = vector.shape_cast %116 : vector<128xf32> to vector<128x1xf32>
    %cst_41 = arith.constant 1.000000e+00 : f32
    %118 = vector.broadcast %cst_41 : f32 to vector<128x1xf32>
    %119 = arith.divf %118, %117 : vector<128x1xf32>
    %120 = vector.broadcast %119 : vector<128x1xf32> to vector<128x128xf32>
    %121 = arith.mulf %115, %120 : vector<128x128xf32>
    %122 = vector.extract_strided_slice %8 {offsets = [0, 96], sizes = [128, 32], strides = [1, 1]} : vector<128x128xf32> to vector<128x32xf32>
    %cst_42 = arith.constant dense<0.000000e+00> : vector<128x32xf32>
    %123 = tpu.matmul %121, %122, %cst_42 {dimension_numbers = #tpu.dot_dimension_numbers<[1], [0], [0], [1], [0, 0, 1, 1], [], []>} : vector<128x128xf32>, vector<128x32xf32>, vector<128x32xf32> -> vector<128x32xf32>
    %cst_43 = arith.constant 0.000000e+00 : f32
    %124 = vector.broadcast %cst_43 : f32 to vector<128x32xf32>
    %125 = arith.cmpf ogt, %123, %124 : vector<128x32xf32>
    %cst_44 = arith.constant 0.000000e+00 : f32
    %126 = vector.broadcast %cst_44 : f32 to vector<128x32xf32>
    %127 = arith.minimumf %123, %126 : vector<128x32xf32>
    %128 = math.exp %127 : vector<128x32xf32>
    %cst_45 = arith.constant 1.000000e+00 : f32
    %129 = vector.broadcast %cst_45 : f32 to vector<128x32xf32>
    %130 = arith.subf %128, %129 : vector<128x32xf32>
    %131 = arith.select %125, %123, %130 : vector<128x32xi1>, vector<128x32xf32>
    %132 = tpu.concatenate %41, %71, %101, %131 in 1 : vector<128x32xf32>, vector<128x32xf32>, vector<128x32xf32>, vector<128x32xf32> -> vector<128x128xf32>
    %c0_46 = arith.constant 0 : index
    %c0_47 = arith.constant 0 : index
    %133 = vector.load %arg6[%c0_46, %c0_47] : memref<128x128xf32, #tpu.memory_space<vmem>>, vector<128x128xf32>
    %c0_48 = arith.constant 0 : index
    %c0_49 = arith.constant 0 : index
    %134 = vector.load %arg7[%c0_48, %c0_49] : memref<128x4xf32, #tpu.memory_space<vmem>>, vector<128x4xf32>
    %c0_50 = arith.constant 0 : index
    %c0_51 = arith.constant 0 : index
    %135 = vector.load %arg8[%c0_50, %c0_51] : memref<4x128xf32, #tpu.memory_space<vmem>>, vector<4x128xf32>
    %c0_52 = arith.constant 0 : index
    %c0_53 = arith.constant 0 : index
    %136 = vector.load %arg9[%c0_52, %c0_53] : memref<8x128xbf16, #tpu.memory_space<vmem>>, vector<8x128xbf16>
    %137 = arith.extf %136 : vector<8x128xbf16> to vector<8x128xf32>
    %c0_54 = arith.constant 0 : index
    %c0_55 = arith.constant 0 : index
    %138 = vector.load %arg10[%c0_54, %c0_55] : memref<8x128xbf16, #tpu.memory_space<vmem>>, vector<8x128xbf16>
    %139 = arith.extf %138 : vector<8x128xbf16> to vector<8x128xf32>
    %cst_56 = arith.constant dense<0.000000e+00> : vector<128x128xf32>
    %140 = tpu.matmul %132, %133, %cst_56 {dimension_numbers = #tpu.dot_dimension_numbers<[1], [0], [0], [1], [0, 0, 1, 1], [], []>} : vector<128x128xf32>, vector<128x128xf32>, vector<128x128xf32> -> vector<128x128xf32>
    %cst_57 = arith.constant dense<0.000000e+00> : vector<128x4xf32>
    %141 = tpu.matmul %140, %134, %cst_57 {dimension_numbers = #tpu.dot_dimension_numbers<[1], [0], [0], [1], [0, 0, 1, 1], [], []>} : vector<128x128xf32>, vector<128x4xf32>, vector<128x4xf32> -> vector<128x4xf32>
    %cst_58 = arith.constant dense<0.000000e+00> : vector<4x128xf32>
    %142 = tpu.matmul %135, %140, %cst_58 {dimension_numbers = #tpu.dot_dimension_numbers<[1], [1], [0], [0], [0, 0, 1, 0], [], []>} : vector<4x128xf32>, vector<128x128xf32>, vector<4x128xf32> -> vector<4x128xf32>
    %cst_59 = arith.constant dense<0.000000e+00> : vector<8x4xf32>
    %143 = tpu.matmul %139, %141, %cst_59 {dimension_numbers = #tpu.dot_dimension_numbers<[1], [0], [0], [1], [0, 0, 1, 1], [], []>} : vector<8x128xf32>, vector<128x4xf32>, vector<8x4xf32> -> vector<8x4xf32>
    %144 = vector.extract_strided_slice %143 {offsets = [0, 0], sizes = [8, 1], strides = [1, 1]} : vector<8x4xf32> to vector<8x1xf32>
    %145 = vector.extract_strided_slice %142 {offsets = [0, 0], sizes = [1, 128], strides = [1, 1]} : vector<4x128xf32> to vector<1x128xf32>
    %146 = vector.broadcast %144 : vector<8x1xf32> to vector<8x128xf32>
    %147 = vector.broadcast %145 : vector<1x128xf32> to vector<8x128xf32>
    %148 = arith.addf %146, %147 : vector<8x128xf32>
    %cst_60 = arith.constant 2.000000e-01 : f32
    %149 = vector.broadcast %cst_60 : f32 to vector<8x128xf32>
    %150 = arith.mulf %149, %148 : vector<8x128xf32>
    %151 = arith.maximumf %148, %150 : vector<8x128xf32>
    %152 = arith.addf %151, %137 : vector<8x128xf32>
    %cst_61 = arith.constant dense<0xFF800000> : vector<8xf32>
    %153 = vector.multi_reduction <maximumf>, %152, %cst_61 [1] : vector<8x128xf32> to vector<8xf32>
    %154 = vector.shape_cast %153 : vector<8xf32> to vector<8x1xf32>
    %155 = vector.broadcast %154 : vector<8x1xf32> to vector<8x128xf32>
    %156 = arith.subf %152, %155 : vector<8x128xf32>
    %157 = math.exp %156 : vector<8x128xf32>
    %cst_62 = arith.constant dense<0.000000e+00> : vector<8xf32>
    %158 = vector.multi_reduction <add>, %157, %cst_62 [1] : vector<8x128xf32> to vector<8xf32>
    %159 = vector.shape_cast %158 : vector<8xf32> to vector<8x1xf32>
    %cst_63 = arith.constant 1.000000e+00 : f32
    %160 = vector.broadcast %cst_63 : f32 to vector<8x1xf32>
    %161 = arith.divf %160, %159 : vector<8x1xf32>
    %162 = vector.broadcast %161 : vector<8x1xf32> to vector<8x128xf32>
    %163 = arith.mulf %157, %162 : vector<8x128xf32>
    %164 = vector.extract_strided_slice %140 {offsets = [0, 0], sizes = [128, 32], strides = [1, 1]} : vector<128x128xf32> to vector<128x32xf32>
    %cst_64 = arith.constant dense<0.000000e+00> : vector<8x32xf32>
    %165 = tpu.matmul %163, %164, %cst_64 {dimension_numbers = #tpu.dot_dimension_numbers<[1], [0], [0], [1], [0, 0, 1, 1], [], []>} : vector<8x128xf32>, vector<128x32xf32>, vector<8x32xf32> -> vector<8x32xf32>
    %cst_65 = arith.constant 0.000000e+00 : f32
    %166 = vector.broadcast %cst_65 : f32 to vector<8x32xf32>
    %167 = arith.cmpf ogt, %165, %166 : vector<8x32xf32>
    %cst_66 = arith.constant 0.000000e+00 : f32
    %168 = vector.broadcast %cst_66 : f32 to vector<8x32xf32>
    %169 = arith.minimumf %165, %168 : vector<8x32xf32>
    %170 = math.exp %169 : vector<8x32xf32>
    %cst_67 = arith.constant 1.000000e+00 : f32
    %171 = vector.broadcast %cst_67 : f32 to vector<8x32xf32>
    %172 = arith.subf %170, %171 : vector<8x32xf32>
    %173 = arith.select %167, %165, %172 : vector<8x32xi1>, vector<8x32xf32>
    %174 = vector.extract_strided_slice %143 {offsets = [0, 1], sizes = [8, 1], strides = [1, 1]} : vector<8x4xf32> to vector<8x1xf32>
    %175 = vector.extract_strided_slice %142 {offsets = [1, 0], sizes = [1, 128], strides = [1, 1]} : vector<4x128xf32> to vector<1x128xf32>
    %176 = vector.broadcast %174 : vector<8x1xf32> to vector<8x128xf32>
    %177 = vector.broadcast %175 : vector<1x128xf32> to vector<8x128xf32>
    %178 = arith.addf %176, %177 : vector<8x128xf32>
    %cst_68 = arith.constant 2.000000e-01 : f32
    %179 = vector.broadcast %cst_68 : f32 to vector<8x128xf32>
    %180 = arith.mulf %179, %178 : vector<8x128xf32>
    %181 = arith.maximumf %178, %180 : vector<8x128xf32>
    %182 = arith.addf %181, %137 : vector<8x128xf32>
    %cst_69 = arith.constant dense<0xFF800000> : vector<8xf32>
    %183 = vector.multi_reduction <maximumf>, %182, %cst_69 [1] : vector<8x128xf32> to vector<8xf32>
    %184 = vector.shape_cast %183 : vector<8xf32> to vector<8x1xf32>
    %185 = vector.broadcast %184 : vector<8x1xf32> to vector<8x128xf32>
    %186 = arith.subf %182, %185 : vector<8x128xf32>
    %187 = math.exp %186 : vector<8x128xf32>
    %cst_70 = arith.constant dense<0.000000e+00> : vector<8xf32>
    %188 = vector.multi_reduction <add>, %187, %cst_70 [1] : vector<8x128xf32> to vector<8xf32>
    %189 = vector.shape_cast %188 : vector<8xf32> to vector<8x1xf32>
    %cst_71 = arith.constant 1.000000e+00 : f32
    %190 = vector.broadcast %cst_71 : f32 to vector<8x1xf32>
    %191 = arith.divf %190, %189 : vector<8x1xf32>
    %192 = vector.broadcast %191 : vector<8x1xf32> to vector<8x128xf32>
    %193 = arith.mulf %187, %192 : vector<8x128xf32>
    %194 = vector.extract_strided_slice %140 {offsets = [0, 32], sizes = [128, 32], strides = [1, 1]} : vector<128x128xf32> to vector<128x32xf32>
    %cst_72 = arith.constant dense<0.000000e+00> : vector<8x32xf32>
    %195 = tpu.matmul %193, %194, %cst_72 {dimension_numbers = #tpu.dot_dimension_numbers<[1], [0], [0], [1], [0, 0, 1, 1], [], []>} : vector<8x128xf32>, vector<128x32xf32>, vector<8x32xf32> -> vector<8x32xf32>
    %cst_73 = arith.constant 0.000000e+00 : f32
    %196 = vector.broadcast %cst_73 : f32 to vector<8x32xf32>
    %197 = arith.cmpf ogt, %195, %196 : vector<8x32xf32>
    %cst_74 = arith.constant 0.000000e+00 : f32
    %198 = vector.broadcast %cst_74 : f32 to vector<8x32xf32>
    %199 = arith.minimumf %195, %198 : vector<8x32xf32>
    %200 = math.exp %199 : vector<8x32xf32>
    %cst_75 = arith.constant 1.000000e+00 : f32
    %201 = vector.broadcast %cst_75 : f32 to vector<8x32xf32>
    %202 = arith.subf %200, %201 : vector<8x32xf32>
    %203 = arith.select %197, %195, %202 : vector<8x32xi1>, vector<8x32xf32>
    %204 = vector.extract_strided_slice %143 {offsets = [0, 2], sizes = [8, 1], strides = [1, 1]} : vector<8x4xf32> to vector<8x1xf32>
    %205 = vector.extract_strided_slice %142 {offsets = [2, 0], sizes = [1, 128], strides = [1, 1]} : vector<4x128xf32> to vector<1x128xf32>
    %206 = vector.broadcast %204 : vector<8x1xf32> to vector<8x128xf32>
    %207 = vector.broadcast %205 : vector<1x128xf32> to vector<8x128xf32>
    %208 = arith.addf %206, %207 : vector<8x128xf32>
    %cst_76 = arith.constant 2.000000e-01 : f32
    %209 = vector.broadcast %cst_76 : f32 to vector<8x128xf32>
    %210 = arith.mulf %209, %208 : vector<8x128xf32>
    %211 = arith.maximumf %208, %210 : vector<8x128xf32>
    %212 = arith.addf %211, %137 : vector<8x128xf32>
    %cst_77 = arith.constant dense<0xFF800000> : vector<8xf32>
    %213 = vector.multi_reduction <maximumf>, %212, %cst_77 [1] : vector<8x128xf32> to vector<8xf32>
    %214 = vector.shape_cast %213 : vector<8xf32> to vector<8x1xf32>
    %215 = vector.broadcast %214 : vector<8x1xf32> to vector<8x128xf32>
    %216 = arith.subf %212, %215 : vector<8x128xf32>
    %217 = math.exp %216 : vector<8x128xf32>
    %cst_78 = arith.constant dense<0.000000e+00> : vector<8xf32>
    %218 = vector.multi_reduction <add>, %217, %cst_78 [1] : vector<8x128xf32> to vector<8xf32>
    %219 = vector.shape_cast %218 : vector<8xf32> to vector<8x1xf32>
    %cst_79 = arith.constant 1.000000e+00 : f32
    %220 = vector.broadcast %cst_79 : f32 to vector<8x1xf32>
    %221 = arith.divf %220, %219 : vector<8x1xf32>
    %222 = vector.broadcast %221 : vector<8x1xf32> to vector<8x128xf32>
    %223 = arith.mulf %217, %222 : vector<8x128xf32>
    %224 = vector.extract_strided_slice %140 {offsets = [0, 64], sizes = [128, 32], strides = [1, 1]} : vector<128x128xf32> to vector<128x32xf32>
    %cst_80 = arith.constant dense<0.000000e+00> : vector<8x32xf32>
    %225 = tpu.matmul %223, %224, %cst_80 {dimension_numbers = #tpu.dot_dimension_numbers<[1], [0], [0], [1], [0, 0, 1, 1], [], []>} : vector<8x128xf32>, vector<128x32xf32>, vector<8x32xf32> -> vector<8x32xf32>
    %cst_81 = arith.constant 0.000000e+00 : f32
    %226 = vector.broadcast %cst_81 : f32 to vector<8x32xf32>
    %227 = arith.cmpf ogt, %225, %226 : vector<8x32xf32>
    %cst_82 = arith.constant 0.000000e+00 : f32
    %228 = vector.broadcast %cst_82 : f32 to vector<8x32xf32>
    %229 = arith.minimumf %225, %228 : vector<8x32xf32>
    %230 = math.exp %229 : vector<8x32xf32>
    %cst_83 = arith.constant 1.000000e+00 : f32
    %231 = vector.broadcast %cst_83 : f32 to vector<8x32xf32>
    %232 = arith.subf %230, %231 : vector<8x32xf32>
    %233 = arith.select %227, %225, %232 : vector<8x32xi1>, vector<8x32xf32>
    %234 = vector.extract_strided_slice %143 {offsets = [0, 3], sizes = [8, 1], strides = [1, 1]} : vector<8x4xf32> to vector<8x1xf32>
    %235 = vector.extract_strided_slice %142 {offsets = [3, 0], sizes = [1, 128], strides = [1, 1]} : vector<4x128xf32> to vector<1x128xf32>
    %236 = vector.broadcast %234 : vector<8x1xf32> to vector<8x128xf32>
    %237 = vector.broadcast %235 : vector<1x128xf32> to vector<8x128xf32>
    %238 = arith.addf %236, %237 : vector<8x128xf32>
    %cst_84 = arith.constant 2.000000e-01 : f32
    %239 = vector.broadcast %cst_84 : f32 to vector<8x128xf32>
    %240 = arith.mulf %239, %238 : vector<8x128xf32>
    %241 = arith.maximumf %238, %240 : vector<8x128xf32>
    %242 = arith.addf %241, %137 : vector<8x128xf32>
    %cst_85 = arith.constant dense<0xFF800000> : vector<8xf32>
    %243 = vector.multi_reduction <maximumf>, %242, %cst_85 [1] : vector<8x128xf32> to vector<8xf32>
    %244 = vector.shape_cast %243 : vector<8xf32> to vector<8x1xf32>
    %245 = vector.broadcast %244 : vector<8x1xf32> to vector<8x128xf32>
    %246 = arith.subf %242, %245 : vector<8x128xf32>
    %247 = math.exp %246 : vector<8x128xf32>
    %cst_86 = arith.constant dense<0.000000e+00> : vector<8xf32>
    %248 = vector.multi_reduction <add>, %247, %cst_86 [1] : vector<8x128xf32> to vector<8xf32>
    %249 = vector.shape_cast %248 : vector<8xf32> to vector<8x1xf32>
    %cst_87 = arith.constant 1.000000e+00 : f32
    %250 = vector.broadcast %cst_87 : f32 to vector<8x1xf32>
    %251 = arith.divf %250, %249 : vector<8x1xf32>
    %252 = vector.broadcast %251 : vector<8x1xf32> to vector<8x128xf32>
    %253 = arith.mulf %247, %252 : vector<8x128xf32>
    %254 = vector.extract_strided_slice %140 {offsets = [0, 96], sizes = [128, 32], strides = [1, 1]} : vector<128x128xf32> to vector<128x32xf32>
    %cst_88 = arith.constant dense<0.000000e+00> : vector<8x32xf32>
    %255 = tpu.matmul %253, %254, %cst_88 {dimension_numbers = #tpu.dot_dimension_numbers<[1], [0], [0], [1], [0, 0, 1, 1], [], []>} : vector<8x128xf32>, vector<128x32xf32>, vector<8x32xf32> -> vector<8x32xf32>
    %cst_89 = arith.constant 0.000000e+00 : f32
    %256 = vector.broadcast %cst_89 : f32 to vector<8x32xf32>
    %257 = arith.cmpf ogt, %255, %256 : vector<8x32xf32>
    %cst_90 = arith.constant 0.000000e+00 : f32
    %258 = vector.broadcast %cst_90 : f32 to vector<8x32xf32>
    %259 = arith.minimumf %255, %258 : vector<8x32xf32>
    %260 = math.exp %259 : vector<8x32xf32>
    %cst_91 = arith.constant 1.000000e+00 : f32
    %261 = vector.broadcast %cst_91 : f32 to vector<8x32xf32>
    %262 = arith.subf %260, %261 : vector<8x32xf32>
    %263 = arith.select %257, %255, %262 : vector<8x32xi1>, vector<8x32xf32>
    %264 = tpu.concatenate %173, %203, %233, %263 in 1 : vector<8x32xf32>, vector<8x32xf32>, vector<8x32xf32>, vector<8x32xf32> -> vector<8x128xf32>
    %c0_92 = arith.constant 0 : index
    %c0_93 = arith.constant 0 : index
    %265 = vector.load %arg11[%c0_92, %c0_93] : memref<128x128xf32, #tpu.memory_space<vmem>>, vector<128x128xf32>
    %cst_94 = arith.constant dense<0.000000e+00> : vector<8x128xf32>
    %266 = tpu.matmul %264, %265, %cst_94 {dimension_numbers = #tpu.dot_dimension_numbers<[1], [0], [0], [1], [0, 0, 1, 1], [], []>} : vector<8x128xf32>, vector<128x128xf32>, vector<8x128xf32> -> vector<8x128xf32>
    %c0_95 = arith.constant 0 : index
    %c0_96 = arith.constant 0 : index
    %267 = vector.load %arg12[%c0_95, %c0_96] : memref<1x128xf32, #tpu.memory_space<vmem>>, vector<1x128xf32>
    %268 = vector.broadcast %267 : vector<1x128xf32> to vector<8x128xf32>
    %269 = arith.addf %266, %268 : vector<8x128xf32>
    %270 = math.tanh %269 : vector<8x128xf32>
    %c0_97 = arith.constant 0 : index
    %c0_98 = arith.constant 0 : index
    %271 = vector.load %arg13[%c0_97, %c0_98] : memref<8x128xf32, #tpu.memory_space<vmem>>, vector<8x128xf32>
    tpu.vector_store %arg13[%c0_97, %c0_98], %270 {strides = array<i32>} : memref<8x128xf32, #tpu.memory_space<vmem>>, vector<8x128xf32>,
    return
  }
}

</mosaic_0001>

<bundles_post_ra>
// kernel: tpu_custom_call.1
= control target key start
LH: loop header
LB: loop body
LE: loop exit
PB: predicated region body
PF: predicated region fallthrough
CT: control target
= control target key end

     0   :  { %18 = vsyncpa [#allocation3], 0  ;;  %s9352_s0 = inlined_call_operand.vmem [shape: f32[128,128], index: 0, kind: input, shape index: {}]   ;;  %s9353_s1 = inlined_call_operand.vmem [shape: f32[128,128], index: 1, kind: input, shape index: {}]   ;;  %s9354_s2 = inlined_call_operand.vmem [shape: f32[128,4], index: 2, kind: input, shape index: {}]   ;;  %s9355_s3 = inlined_call_operand.vmem [shape: f32[4,128], index: 3, kind: input, shape index: {}]   ;;  %s9356_s4 = inlined_call_operand.hbm [shape: bf16[128,128], index: 4, kind: input, shape index: {}]   ;;  %s9357_s5 = inlined_call_operand.hbm [shape: bf16[128,128], index: 5, kind: input, shape index: {}]   ;;  %s9358_s6 = inlined_call_operand.hbm [shape: f32[128,128], index: 6, kind: input, shape index: {}]   ;;  %s9359_s7 = inlined_call_operand.vmem [shape: f32[128,4], index: 7, kind: input, shape index: {}]   ;;  %s9360_s8 = inlined_call_operand.vmem [shape: f32[4,128], index: 8, kind: input, shape index: {}]   ;;  %s9361_s9 = inlined_call_operand.vmem [shape: bf16[8,128], index: 9, kind: input, shape index: {}]   ;;  %s9362_s10 = inlined_call_operand.vmem [shape: bf16[8,128], index: 10, kind: input, shape index: {}]   ;;  %s9363_s11 = inlined_call_operand.hbm [shape: f32[128,128], index: 11, kind: input, shape index: {}]   ;;  %s9364_s12 = inlined_call_operand.vmem [shape: f32[1,128], index: 12, kind: input, shape index: {}]   ;;  %s9365_s13 = inlined_call_operand.hbm [shape: f32[8,128], index: 13, kind: output, shape index: {}]  }
   0x1   :  { %19 = vsyncpa [#allocation6], 0 }
   0x2   :  { %20 = vsyncpa [#allocation9], 0 }
   0x3   :  { %21 = vsyncpa [#allocation4], 0  ;;  %s7225_s25 = smov [#allocation5]   ;;  %s7226_s27 = smov [#allocation2]  }
   0x4   :  { %s47_s26 = sshll.u32 %s7225_s25, 4  ;;  %s35_s28 = sshll.u32 %s7226_s27, 4  ;;  %s48_s26 = int_to_ptr.vmem [resolvable:$true] %s47_s26  ;;  %s7313_s28 = int_to_ptr.vmem [resolvable:$true] %s35_s28 }
   0x5   :  { %s7107_s14 = scalar_lea.hbm %s9357_s5, 1024 }
   0x6   :  { %p7108_p0 = scmp.ne.s32.totalorder %s9357_s5, %s7107_s14  ;;  %p7111_p1 = scmp.lt.u32.totalorder %s7107_s14, %s9357_s5 }
   0x8   :  { %p7113_p2 = pnand %p7111_p1, %p7108_p0 }
   0xa   :  { %7116 = shalt.err (!%p7113_p2)
}
   0xb   :  { %s7117_s19 = scalar_lea.vmem %s48_s26, 1024  ;;  %p7122_p4 = scmp.lt.s32.totalorder %s48_s26, %s48_s26 }
   0xc   :  { %p7118_p3 = scmp.ne.s32.totalorder %s48_s26, %s7117_s19  ;;  %p7123_p5 = scmp.lt.s32.totalorder %s7117_s19, %s7117_s19 }
   0xe   :  { %p7124_p6 = por %p7123_p5, %p7122_p4 }
  0x10   :  { %p7125_p7 = pnand %p7124_p6, %p7118_p3 }
  0x12   :  { %7128 = shalt.err (!%p7125_p7)
}
  0x13   :  { %s7227_s20 = smov 64   ;;  %s7228_s21 = smov 4  }
  0x14   :  { %53 = dma.hbm_to_vmem [thread:$0]  %s9357_s5, 1024, %s48_s26, [#allocation6], %s7227_s20, %s7227_s20, %s7228_s21  }
  0x15   :  { %s7129_s27 = scalar_lea.hbm %s9356_s4, 1024 }
  0x16   :  { %p7130_p8 = scmp.ne.s32.totalorder %s9356_s4, %s7129_s27  ;;  %p7133_p9 = scmp.lt.u32.totalorder %s7129_s27, %s9356_s4 }
  0x18   :  { %p7135_p10 = pnand %p7133_p9, %p7130_p8 }
  0x1a   :  { %7138 = shalt.err (!%p7135_p10)
}
  0x1b   :  { %s7139_s16 = scalar_lea.vmem %s7313_s28, 1024  ;;  %p7144_p12 = scmp.lt.s32.totalorder %s7313_s28, %s7313_s28 }
  0x1c   :  { %p7140_p11 = scmp.ne.s32.totalorder %s7313_s28, %s7139_s16  ;;  %p7145_p13 = scmp.lt.s32.totalorder %s7139_s16, %s7139_s16 }
  0x1e   :  { %p7146_p0 = por %p7145_p13, %p7144_p12 }
  0x20   :  { %p7147_p1 = pnand %p7146_p0, %p7140_p11 }
  0x22   :  { %7150 = shalt.err (!%p7147_p1)
}
  0x23   :  { %41 = dma.hbm_to_vmem [thread:$0]  %s9356_s4, 1024, %s7313_s28, [#allocation3], %s7227_s20, %s7227_s20, %s7228_s21  }
  0x24   :  { %s7229_s17 = smov [#allocation7]   ;;  %s7151_s23 = scalar_lea.hbm %s9358_s6, 2048 }
  0x25   :  { %s59_s18 = sshll.u32 %s7229_s17, 4  ;;  %p7152_p2 = scmp.ne.s32.totalorder %s9358_s6, %s7151_s23  ;;  %s60_s18 = int_to_ptr.vmem [resolvable:$true] %s59_s18 }
  0x26   :  { %p7155_p3 = scmp.lt.u32.totalorder %s7151_s23, %s9358_s6 }
  0x28   :  { %p7157_p4 = pnand %p7155_p3, %p7152_p2 }
  0x2a   :  { %7160 = shalt.err (!%p7157_p4)
}
  0x2b   :  { %s7161_s30 = scalar_lea.vmem %s60_s18, 2048  ;;  %p7166_p6 = scmp.lt.s32.totalorder %s60_s18, %s60_s18 }
  0x2c   :  { %p7162_p5 = scmp.ne.s32.totalorder %s60_s18, %s7161_s30  ;;  %p7167_p7 = scmp.lt.s32.totalorder %s7161_s30, %s7161_s30 }
  0x2e   :  { %p7168_p8 = por %p7167_p7, %p7166_p6 }
  0x30   :  { %p7169_p9 = pnand %p7168_p8, %p7162_p5 }
  0x32   :  { %7172 = shalt.err (!%p7169_p9)
}
  0x33   :  { %s7230_s4 = smov 128   ;;  %s7231_s28 = smov 8  }
  0x34   :  { %65 = dma.hbm_to_vmem [thread:$0]  %s9358_s6, 2048, %s60_s18, [#allocation6], %s7230_s4, %s7230_s4, %s7231_s28  }
  0x35   :  { %s7232_s15 = smov [#allocation8]   ;;  %s7173_s17 = scalar_lea.hbm %s9363_s11, 2048 }
  0x36   :  { %s79_s16 = sshll.u32 %s7232_s15, 4  ;;  %p7174_p10 = scmp.ne.s32.totalorder %s9363_s11, %s7173_s17  ;;  %s80_s16 = int_to_ptr.vmem [resolvable:$true] %s79_s16 }
  0x37   :  { %p7177_p11 = scmp.lt.u32.totalorder %s7173_s17, %s9363_s11 }
  0x39   :  { %p7179_p12 = pnand %p7177_p11, %p7174_p10 }
  0x3b   :  { %7182 = shalt.err (!%p7179_p12)
}
  0x3c   :  { %s7183_s25 = scalar_lea.vmem %s80_s16, 2048  ;;  %p7188_p0 = scmp.lt.s32.totalorder %s80_s16, %s80_s16 }
  0x3d   :  { %p7184_p13 = scmp.ne.s32.totalorder %s80_s16, %s7183_s25  ;;  %p7189_p1 = scmp.lt.s32.totalorder %s7183_s25, %s7183_s25 }
  0x3f   :  { %p7190_p2 = por %p7189_p1, %p7188_p0 }
  0x41   :  { %p7191_p3 = pnand %p7190_p2, %p7184_p13 }
  0x43   :  { %7194 = shalt.err (!%p7191_p3)
}
  0x44   :  { %85 = dma.hbm_to_vmem [thread:$0]  %s9363_s11, 2048, %s80_s16, [#allocation9], %s7230_s4, %s7230_s4, %s7231_s28  }
  0x45   :  { %7217 = dma.done.wait [#allocation3], 1024  }
  0x46   :  { %7218 = vsyncadd [#allocation3], 4294966272 }
  0x47   :  { %7219 = dma.done.wait [#allocation6], 3072  }
  0x48   :  { %7220 = vsyncadd [#allocation6], 4294964224 }
  0x49   :  { %7221 = dma.done.wait [#allocation9], 2048  }
  0x4a   :  { %7222 = vsyncadd [#allocation9], 4294965248  ;;  %v116_v0 = vld [vmem:[%s9353_s1] sm:$0xff]  ;;  %v117_v1 = vld [vmem:[%s9353_s1 + $0x8] sm:$0xff]  ;;  %vm7234_vm0 = vmmov 0   ;;  %s7236_s19 = smov 96  }
  0x4b   :  { %v118_v2 = vld [vmem:[%s9353_s1 + $0x10] sm:$0xff]  ;;  %v5771_v3 = vpack.c.bf16 %v117_v1, %v116_v0  ;;  %v119_v4 = vld [vmem:[%s9353_s1 + $0x18] sm:$0xff]  ;;  %v120_v6 = vld [vmem:[%s9353_s1 + $0x20] sm:$0xff]  ;;  %v9375_v0 = vmov 0.0|0.0   ;;  %v9373_v1 = vmov 0.0  }
  0x4c   :  { %v5775_v5 = vpack.c.bf16 %v119_v4, %v118_v2  ;;  %v121_v7 = vld [vmem:[%s9353_s1 + $0x28] sm:$0xff]  ;;  %v100_v9 = vld [vmem:[%s9352_s0] sm:$0xff]  ;;  %v122_v10 = vld [vmem:[%s9353_s1 + $0x30] sm:$0xff] }
  0x4d   :  { %5772 = vmatprep.subr.bf16.mxu0 %v5771_v3  ;;  %v5779_v8 = vpack.c.bf16 %v121_v7, %v120_v6  ;;  %v123_v11 = vld [vmem:[%s9353_s1 + $0x38] sm:$0xff]  ;;  %5019 = vmatprep.mubr.f32.mxu0 %v100_v9  ;;  %v124_v13 = vld [vmem:[%s9353_s1 + $0x40] sm:$0xff]  ;;  %v125_v14 = vld [vmem:[%s9353_s1 + $0x48] sm:$0xff] }
  0x4e   :  { %5774 = vmatpush3.bf16.msra.mxu0 %v5771_v3  ;;  %v5783_v12 = vpack.c.bf16 %v123_v11, %v122_v10  ;;  %v132_v15 = vld [vmem:[%s9354_s2] sm:$0xff]  ;;  %v133_v16 = vld [vmem:[%s9354_s2 + $0x8] sm:$0xff]  ;;  %v134_v17 = vld [vmem:[%s9354_s2 + $0x10] sm:$0xff]  ;;  %v5787_v21 = vpack.c.bf16 %v125_v14, %v124_v13 }
  0x4f   :  { %5776 = vmatprep.subr.bf16.mxu0 %v5775_v5  ;;  %v135_v18 = vld [vmem:[%s9354_s2 + $0x18] sm:$0xff]  ;;  %v5803_v19 = vpack.c.bf16 %v133_v16, %v132_v15  ;;  %v136_v22 = vld [vmem:[%s9354_s2 + $0x20] sm:$0xff]  ;;  %v137_v23 = vld [vmem:[%s9354_s2 + $0x28] sm:$0xff] }
  0x50   :  { %v5807_v20 = vpack.c.bf16 %v135_v18, %v134_v17  ;;  %v126_v24 = vld [vmem:[%s9353_s1 + $0x50] sm:$0xff]  ;;  %v127_v25 = vld [vmem:[%s9353_s1 + $0x58] sm:$0xff]  ;;  %v5811_v26 = vpack.c.bf16 %v137_v23, %v136_v22  ;;  %v128_v30 = vld [vmem:[%s9353_s1 + $0x60] sm:$0xff] }
  0x51   :  { %5804 = vmatprep.subr.bf16.mxu1 %v5803_v19  ;;  %v5791_v27 = vpack.c.bf16 %v127_v25, %v126_v24  ;;  %v138_v28 = vld [vmem:[%s9354_s2 + $0x30] sm:$0xff]  ;;  %v139_v29 = vld [vmem:[%s9354_s2 + $0x38] sm:$0xff]  ;;  %v129_v31 = vld [vmem:[%s9353_s1 + $0x68] sm:$0xff] }
  0x52   :  { %5778 = vmatpush3.bf16.msra.mxu0 %v5775_v5  ;;  %5806 = vmatpush3.bf16.msra.mxu1 %v5803_v19  ;;  %v5815_v32 = vpack.c.bf16 %v139_v29, %v138_v28  ;;  %v5795_v33 = vpack.c.bf16 %v129_v31, %v128_v30  ;;  %v140_v34 = vld [vmem:[%s9354_s2 + $0x40] sm:$0xff]  ;;  %v141_v35 = vld [vmem:[%s9354_s2 + $0x48] sm:$0xff]  ;;  %v130_v36 = vld [vmem:[%s9353_s1 + $0x70] sm:$0xff] }
  0x53   :  { %5780 = vmatprep.subr.bf16.mxu0 %v5779_v8  ;;  %5808 = vmatprep.subr.bf16.mxu1 %v5807_v20  ;;  %v131_v37 = vld [vmem:[%s9353_s1 + $0x78] sm:$0xff]  ;;  %v5819_v38 = vpack.c.bf16 %v141_v35, %v140_v34  ;;  %v142_v40 = vld [vmem:[%s9354_s2 + $0x50] sm:$0xff]  ;;  %v144_v43 = vld [vmem:[%s9354_s2 + $0x60] sm:$0xff] }
  0x54   :  { %v5799_v39 = vpack.c.bf16 %v131_v37, %v130_v36  ;;  %v143_v41 = vld [vmem:[%s9354_s2 + $0x58] sm:$0xff]  ;;  %v145_v44 = vld [vmem:[%s9354_s2 + $0x68] sm:$0xff]  ;;  %v102_v47 = vld [vmem:[%s9352_s0 + $0x10] sm:$0xff] }
  0x55   :  { %v5823_v42 = vpack.c.bf16 %v143_v41, %v142_v40  ;;  %v101_v45 = vld [vmem:[%s9352_s0 + $0x8] sm:$0xff]  ;;  %v5827_v46 = vpack.c.bf16 %v145_v44, %v144_v43  ;;  %v146_v48 = vld [vmem:[%s9354_s2 + $0x70] sm:$0xff]  ;;  %v147_v49 = vld [vmem:[%s9354_s2 + $0x78] sm:$0xff] }
  0x56   :  { %5782 = vmatpush3.bf16.msra.mxu0 %v5779_v8  ;;  %5810 = vmatpush3.bf16.msra.mxu1 %v5807_v20  ;;  %v103_v50 = vld [vmem:[%s9352_s0 + $0x18] sm:$0xff]  ;;  %v5831_v51 = vpack.c.bf16 %v147_v49, %v146_v48  ;;  %v104_v52 = vld [vmem:[%s9352_s0 + $0x20] sm:$0xff]  ;;  %v105_v53 = vld [vmem:[%s9352_s0 + $0x28] sm:$0xff] }
  0x57   :  { %5784 = vmatprep.subr.bf16.mxu0 %v5783_v12  ;;  %5812 = vmatprep.subr.bf16.mxu1 %v5811_v26  ;;  %v106_v54 = vld [vmem:[%s9352_s0 + $0x30] sm:$0xff]  ;;  %v107_v55 = vld [vmem:[%s9352_s0 + $0x38] sm:$0xff]  ;;  %v108_v56 = vld [vmem:[%s9352_s0 + $0x40] sm:$0xff] }
  0x58   :  { %v109_v57 = vld [vmem:[%s9352_s0 + $0x48] sm:$0xff]  ;;  %v110_v58 = vld [vmem:[%s9352_s0 + $0x50] sm:$0xff]  ;;  %v111_v59 = vld [vmem:[%s9352_s0 + $0x58] sm:$0xff] }
  0x59   :  { %v112_v60 = vld [vmem:[%s9352_s0 + $0x60] sm:$0xff]  ;;  %v113_v61 = vld [vmem:[%s9352_s0 + $0x68] sm:$0xff]  ;;  %v114_v62 = vld [vmem:[%s9352_s0 + $0x70] sm:$0xff] }
  0x5a   :  { %5786 = vmatpush3.bf16.msra.mxu0 %v5783_v12  ;;  %5814 = vmatpush3.bf16.msra.mxu1 %v5811_v26  ;;  %v115_v63 = vld [vmem:[%s9352_s0 + $0x78] sm:$0xff]  ;;  %s7237_s0 = smov 32   ;;  %v148_v34 = vld [vmem:[%s9355_s3] sm:$0xf] }
  0x5b   :  { %5788 = vmatprep.subr.bf16.mxu0 %v5787_v21  ;;  %5816 = vmatprep.subr.bf16.mxu1 %v5815_v32 }
  0x5e   :  { %5790 = vmatpush3.bf16.msra.mxu0 %v5787_v21  ;;  %5818 = vmatpush3.bf16.msra.mxu1 %v5815_v32 }
  0x5f   :  { %5792 = vmatprep.subr.bf16.mxu0 %v5791_v27  ;;  %5820 = vmatprep.subr.bf16.mxu1 %v5819_v38 }
  0x62   :  { %5794 = vmatpush3.bf16.msra.mxu0 %v5791_v27  ;;  %5822 = vmatpush3.bf16.msra.mxu1 %v5819_v38 }
  0x63   :  { %5796 = vmatprep.subr.bf16.mxu0 %v5795_v33  ;;  %5824 = vmatprep.subr.bf16.mxu1 %v5823_v42 }
  0x66   :  { %5798 = vmatpush3.bf16.msra.mxu0 %v5795_v33  ;;  %5826 = vmatpush3.bf16.msra.mxu1 %v5823_v42 }
  0x67   :  { %5800 = vmatprep.subr.bf16.mxu0 %v5799_v39  ;;  %5828 = vmatprep.subr.bf16.mxu1 %v5827_v46 }
  0x6a   :  { %5802 = vmatpush3.bf16.msra.mxu0 %v5799_v39  ;;  %5830 = vmatpush3.bf16.msra.mxu1 %v5827_v46  ;;  %v7580_v39 = vld [vmem:[#allocation5] sm:$0xff]  }
  0x6b   :  { %5832 = vmatprep.subr.bf16.mxu1 %v5831_v51  ;;  %5835 = vmatprep.subr.bf16.mxu0 %v9375_v0  ;;  %v4519_v40 = vunpack.c.l.bf16 %v7580_v39 }
  0x6d   :  { %5020 = vmatmul.mubr.f32.vlgmr.msra.gmra.mrb[0].mxu0 %v101_v45 }
  0x6e   :  { %5022 = vmatprep.mubr.f32.mxu0 %v102_v47  ;;  %5834 = vmatpush3.bf16.msra.mxu1 %v5831_v51 }
  0x71   :  { %5023 = vmatmul.mubr.f32.gmra.mrb[2].mxu0 %v103_v50 }
  0x72   :  { %5025 = vmatprep.mubr.f32.mxu0 %v104_v52 }
  0x75   :  { %5026 = vmatmul.mubr.f32.gmra.mrb[4].mxu0 %v105_v53 }
  0x76   :  { %5028 = vmatprep.mubr.f32.mxu0 %v106_v54 }
  0x79   :  { %5029 = vmatmul.mubr.f32.gmra.mrb[6].mxu0 %v107_v55 }
  0x7a   :  { %5031 = vmatprep.mubr.f32.mxu0 %v108_v56 }
  0x7d   :  { %5032 = vmatmul.mubr.f32.gmra.mrb[8].mxu0 %v109_v57 }
  0x7e   :  { %5034 = vmatprep.mubr.f32.mxu0 %v110_v58 }
  0x81   :  { %5035 = vmatmul.mubr.f32.gmra.mrb[10].mxu0 %v111_v59 }
  0x82   :  { %5037 = vmatprep.mubr.f32.mxu0 %v112_v60 }
  0x85   :  { %5038 = vmatmul.mubr.f32.gmra.mrb[12].mxu0 %v113_v61 }
  0x86   :  { %5040 = vmatprep.mubr.f32.mxu0 %v114_v62 }
  0x89   :  { %5041 = vmatmul.mubr.f32.gmra.mrb[14].mxu0 %v115_v63 }
  0x8a   :  { %5131 = vmatprep.mubr.msk.f32.mxu0 %vm7234_vm0, %v9373_v1 }
 0x140   :  { %v5021_v2 = vpop.f32.mrb[0].mxu0 }
 0x141   :  { %v279_v3 = vpop.f32.mrb[1].mxu0 }
 0x142   :  { %5075 = vmatprep.mubr.f32.mxu1 %v279_v3  ;;  %v6274_v4 = vpack.i.bf16 %v5021_v2, %v279_v3  ;;  %v7519_v5 = vpack.c.bf16 %v5021_v2, %v279_v3 }
 0x143   :  { %5076 = vmatmul.mubr.f32.vlgmr.msra.gmra.mrb[0].mxu1 %v5021_v2 }
 0x144   :  { %6275 = vrot.lane.b32.xlu1 %v6274_v4, %s7227_s20  ;;  %6270 = vrot.lane.b32.xlu0 %v6274_v4, %s7236_s19  ;;  %v5024_v6 = vpop.f32.mrb[2].mxu0 }
 0x145   :  { %5837 = vmatpush3.bf16.xpose.msra.mxu0 %v7519_v5  ;;  %v289_v7 = vpop.f32.mrb[3].mxu0 }
 0x146   :  { %5078 = vmatprep.mubr.f32.mxu1 %v289_v7  ;;  %v6289_v8 = vpack.i.bf16 %v5024_v6, %v289_v7  ;;  %5838 = vmatprep.subr.bf16.mxu0 %v9375_v0  ;;  %v7525_v9 = vpack.c.bf16 %v5024_v6, %v289_v7 }
 0x147   :  { %5079 = vmatmul.mubr.f32.gmra.mrb[2].mxu1 %v5024_v6 }
 0x148   :  { %6280 = vrot.lane.b32.xlu1 %v6274_v4, %s7237_s0  ;;  %6290 = vrot.lane.b32.xlu0 %v6289_v8, %s7227_s20  ;;  %v5027_v10 = vpop.f32.mrb[4].mxu0 }
 0x149   :  { %v299_v11 = vpop.f32.mrb[5].mxu0 }
 0x14a   :  { %5081 = vmatprep.mubr.f32.mxu1 %v299_v11  ;;  %v6304_v12 = vpack.i.bf16 %v5027_v10, %v299_v11  ;;  %v7529_v13 = vpack.c.bf16 %v5027_v10, %v299_v11 }
 0x14b   :  { %5082 = vmatmul.mubr.f32.gmra.mrb[4].mxu1 %v5027_v10 }
 0x14c   :  { %6295 = vrot.lane.b32.xlu0 %v6289_v8, %s7237_s0  ;;  %6285 = vrot.lane.b32.xlu1 %v6289_v8, %s7236_s19  ;;  %v5030_v14 = vpop.f32.mrb[6].mxu0 }
 0x14d   :  { %5840 = vmatpush3.bf16.xpose.msra.mxu0 %v7525_v9  ;;  %v309_v15 = vpop.f32.mrb[7].mxu0 }
 0x14e   :  { %5084 = vmatprep.mubr.f32.mxu1 %v309_v15  ;;  %5841 = vmatprep.subr.bf16.mxu0 %v9375_v0  ;;  %v6314_v16 = vpack.i.bf16 %v5030_v14, %v309_v15  ;;  %v7535_v17 = vpack.c.bf16 %v5030_v14, %v309_v15 }
 0x14f   :  { %5085 = vmatmul.mubr.f32.gmra.mrb[6].mxu1 %v5030_v14 }
 0x150   :  { %6305 = vrot.lane.b32.xlu1 %v6304_v12, %s7227_s20  ;;  %6300 = vrot.lane.b32.xlu0 %v6304_v12, %s7236_s19  ;;  %v5033_v18 = vpop.f32.mrb[8].mxu0 }
 0x151   :  { %v319_v19 = vpop.f32.mrb[9].mxu0 }
 0x152   :  { %5087 = vmatprep.mubr.f32.mxu1 %v319_v19  ;;  %v6329_v20 = vpack.i.bf16 %v5033_v18, %v319_v19  ;;  %v7539_v21 = vpack.c.bf16 %v5033_v18, %v319_v19  ;;  %v7239_v19 = vmov 0  }
 0x153   :  { %5088 = vmatmul.mubr.f32.gmra.mrb[8].mxu1 %v5033_v18  ;;  %v7238_v18 = vmov 1   ;;  %6379 = vset.pattern.permute.xlu0 %v7239_v19 }
 0x154   :  { %6310 = vrot.lane.b32.xlu0 %v6304_v12, %s7237_s0  ;;  %6315 = vrot.lane.b32.xlu1 %v6314_v16, %s7236_s19  ;;  %v5036_v22 = vpop.f32.mrb[10].mxu0 }
 0x155   :  { %5843 = vmatpush3.bf16.xpose.msra.mxu0 %v7529_v13  ;;  %v329_v23 = vpop.f32.mrb[11].mxu0  ;;  %6380 = vset.pattern.permute.xlu1 %v7238_v18 }
 0x156   :  { %5090 = vmatprep.mubr.f32.mxu1 %v329_v23  ;;  %5844 = vmatprep.subr.bf16.mxu0 %v9375_v0  ;;  %v6344_v24 = vpack.i.bf16 %v5036_v22, %v329_v23  ;;  %v7545_v25 = vpack.c.bf16 %v5036_v22, %v329_v23 }
 0x157   :  { %5091 = vmatmul.mubr.f32.gmra.mrb[10].mxu1 %v5036_v22 }
 0x158   :  { %6320 = vrot.lane.b32.xlu1 %v6314_v16, %s7227_s20  ;;  %6330 = vrot.lane.b32.xlu0 %v6329_v20, %s7236_s19  ;;  %v5039_v26 = vpop.f32.mrb[12].mxu0 }
 0x159   :  { %v339_v27 = vpop.f32.mrb[13].mxu0 }
 0x15a   :  { %5093 = vmatprep.mubr.f32.mxu1 %v339_v27  ;;  %v6359_v28 = vpack.i.bf16 %v5039_v26, %v339_v27  ;;  %v7549_v29 = vpack.c.bf16 %v5039_v26, %v339_v27 }
 0x15b   :  { %5094 = vmatmul.mubr.f32.gmra.mrb[12].mxu1 %v5039_v26 }
 0x15c   :  { %6325 = vrot.lane.b32.xlu1 %v6314_v16, %s7237_s0  ;;  %6335 = vrot.lane.b32.xlu0 %v6329_v20, %s7227_s20  ;;  %v5042_v30 = vpop.f32.mrb[14].mxu0 }
 0x15d   :  { %5846 = vmatpush3.bf16.xpose.msra.mxu0 %v7535_v17  ;;  %v349_v31 = vpop.f32.mrb[15].mxu0 }
 0x15e   :  { %5096 = vmatprep.mubr.f32.mxu1 %v349_v31  ;;  %5847 = vmatprep.subr.bf16.mxu0 %v9375_v0  ;;  %v7555_v32 = vpack.i.bf16 %v5042_v30, %v349_v31  ;;  %v7557_v33 = vpack.c.bf16 %v5042_v30, %v349_v31 }
 0x15f   :  { %5097 = vmatmul.mubr.f32.gmra.mrb[14].mxu1 %v5042_v30 }
 0x160   :  { %9440 = vst [vmem:[#allocation15_spill] sm:$0xff] %v7555_v32  ;;  %6340 = vrot.lane.b32.xlu1 %v6329_v20, %s7237_s0  ;;  %6345 = vrot.lane.b32.xlu0 %v6344_v24, %s7236_s19 }
 0x161   :  { %5166 = vmatprep.mubr.f32.mxu1 %v4519_v40 }
 0x164   :  { %6350 = vrot.lane.b32.xlu0 %v6344_v24, %s7227_s20  ;;  %6360 = vrot.lane.b32.xlu1 %v6359_v28, %s7236_s19 }
 0x165   :  { %5849 = vmatpush3.bf16.xpose.msra.mxu0 %v7539_v21 }
 0x166   :  { %5850 = vmatprep.subr.bf16.mxu0 %v9375_v0 }
 0x168   :  { %6355 = vrot.lane.b32.xlu0 %v6344_v24, %s7237_s0  ;;  %6365 = vrot.lane.b32.xlu1 %v6359_v28, %s7227_s20 }
 0x16c   :  { %6370 = vrot.lane.b32.xlu0 %v6359_v28, %s7237_s0 }
 0x16d   :  { %5852 = vmatpush3.bf16.xpose.msra.mxu0 %v7545_v25 }
 0x16e   :  { %5853 = vmatprep.subr.bf16.mxu0 %v9375_v0 }
 0x170   :  { %6375 = vrot.lane.b32.xlu0 %v7555_v32, %s7236_s19 }
 0x175   :  { %5855 = vmatpush3.bf16.xpose.msra.mxu0 %v7549_v29 }
 0x176   :  { %5856 = vmatprep.subr.bf16.mxu0 %v9375_v0 }
 0x17d   :  { %5858 = vmatpush3.bf16.xpose.msra.mxu0 %v7557_v33 }
 0x184   :  { %5132 = vmatmul.mubr.f32.vlgmr.msra.gmra.mrb[16].mxu0 %v148_v34 }
 0x1b6   :  { %v7578_v35 = vpop.permute.xlu1 %6275  ;;  %v6271_v36 = vpop.permute.xlu0 %6270 }
 0x1b7   :  { %v6273_v37 = vunpack.i.h.bf16 %v6271_v36  ;;  %v6272_v38 = vunpack.i.l.bf16 %v6271_v36 }
 0x1b9   :  { %v5923_v41 = vpack.c.bf16 %v6273_v37, %v6272_v38 }
 0x1ba   :  { %v7583_v42 = vpop.permute.xlu1 %6280  ;;  %v7585_v43 = vpop.permute.xlu0 %6290 }
 0x1bb   :  { %9441 = vst [vmem:[#allocation16_spill] sm:$0xff] %v7585_v43  ;;  %5924 = vmatprep.subr.bf16.mxu0 %v5923_v41  ;;  %v6283_v24 = vunpack.i.h.bf16 %v7583_v42  ;;  %v6282_v26 = vunpack.i.l.bf16 %v7583_v42 }
 0x1bc   :  { %5926 = vmatpush3.bf16.msra.mxu0 %v5923_v41 }
 0x1bd   :  { %v7611_v31 = vpack.c.bf16 %v6283_v24, %v6282_v26  ;;  %v4559_v24 = vld [vmem:[#allocation5 + $0x20] sm:$0xff]  }
 0x1be   :  { %v7587_v44 = vpop.permute.xlu0 %6295  ;;  %v6286_v45 = vpop.permute.xlu1 %6285 }
 0x1bf   :  { %9442 = vst [vmem:[#allocation17_spill] sm:$0xff] %v7587_v44  ;;  %v6288_v46 = vunpack.i.h.bf16 %v6286_v45  ;;  %v6287_v47 = vunpack.i.l.bf16 %v6286_v45  ;;  %9452 = vst [vmem:[#allocation27_spill] sm:$0xff] %v7611_v31 }
 0x1c1   :  { %v5927_v48 = vpack.c.bf16 %v6288_v46, %v6287_v47 }
 0x1c2   :  { %v7589_v49 = vpop.permute.xlu1 %6305  ;;  %v6301_v50 = vpop.permute.xlu0 %6300 }
 0x1c3   :  { %9443 = vst [vmem:[#allocation18_spill] sm:$0xff] %v7589_v49  ;;  %v6303_v51 = vunpack.i.h.bf16 %v6301_v50  ;;  %v6302_v52 = vunpack.i.l.bf16 %v6301_v50  ;;  %5928 = vmatprep.subr.bf16.mxu0 %v5927_v48 }
 0x1c4   :  { %5930 = vmatpush3.bf16.msra.mxu0 %v5927_v48 }
 0x1c5   :  { %v5931_v53 = vpack.c.bf16 %v6303_v51, %v6302_v52 }
 0x1c6   :  { %v7591_v54 = vpop.permute.xlu0 %6310  ;;  %v6316_v55 = vpop.permute.xlu1 %6315 }
 0x1c7   :  { %9444 = vst [vmem:[#allocation19_spill] sm:$0xff] %v7591_v54  ;;  %v6318_v56 = vunpack.i.h.bf16 %v6316_v55  ;;  %v6317_v57 = vunpack.i.l.bf16 %v6316_v55  ;;  %5932 = vmatprep.subr.bf16.mxu0 %v5931_v53 }
 0x1c8   :  { %5934 = vmatpush3.bf16.msra.mxu0 %v5931_v53 }
 0x1c9   :  { %v5935_v58 = vpack.c.bf16 %v6318_v56, %v6317_v57 }
 0x1ca   :  { %v7593_v59 = vpop.permute.xlu1 %6320  ;;  %v6331_v60 = vpop.permute.xlu0 %6330 }
 0x1cb   :  { %9445 = vst [vmem:[#allocation20_spill] sm:$0xff] %v7593_v59  ;;  %v6333_v61 = vunpack.i.h.bf16 %v6331_v60  ;;  %v6332_v62 = vunpack.i.l.bf16 %v6331_v60  ;;  %5936 = vmatprep.subr.bf16.mxu0 %v5935_v58 }
 0x1cc   :  { %5938 = vmatpush3.bf16.msra.mxu0 %v5935_v58 }
 0x1cd   :  { %v5939_v63 = vpack.c.bf16 %v6333_v61, %v6332_v62 }
 0x1ce   :  { %v7595_v2 = vpop.permute.xlu1 %6325  ;;  %v7597_v3 = vpop.permute.xlu0 %6335 }
 0x1cf   :  { %9446 = vst [vmem:[#allocation21_spill] sm:$0xff] %v7595_v2  ;;  %9447 = vst [vmem:[#allocation22_spill] sm:$0xff] %v7597_v3  ;;  %5940 = vmatprep.subr.bf16.mxu0 %v5939_v63 }
 0x1d0   :  { %5942 = vmatpush3.bf16.msra.mxu0 %v5939_v63 }
 0x1d2   :  { %v7599_v4 = vpop.permute.xlu1 %6340  ;;  %v6346_v6 = vpop.permute.xlu0 %6345 }
 0x1d3   :  { %9448 = vst [vmem:[#allocation23_spill] sm:$0xff] %v7599_v4  ;;  %v6348_v7 = vunpack.i.h.bf16 %v6346_v6  ;;  %v6347_v8 = vunpack.i.l.bf16 %v6346_v6 }
 0x1d5   :  { %v5943_v10 = vpack.c.bf16 %v6348_v7, %v6347_v8  ;;  %v4556_v7 = vld [vmem:[#allocation5 + $0x8] sm:$0xff]   ;;  %v4520_v8 = vunpack.c.h.bf16 %v7580_v39 }
 0x1d6   :  { %v7601_v11 = vpop.permute.xlu0 %6350  ;;  %v6361_v12 = vpop.permute.xlu1 %6360 }
 0x1d7   :  { %9449 = vst [vmem:[#allocation24_spill] sm:$0xff] %v7601_v11  ;;  %v6363_v14 = vunpack.i.h.bf16 %v6361_v12  ;;  %v6362_v15 = vunpack.i.l.bf16 %v6361_v12  ;;  %5944 = vmatprep.subr.bf16.mxu0 %v5943_v10  ;;  %v4557_v12 = vld [vmem:[#allocation5 + $0x10] sm:$0xff]  }
 0x1d8   :  { %5946 = vmatpush3.bf16.msra.mxu0 %v5943_v10  ;;  %v4523_v10 = vunpack.c.l.bf16 %v4556_v7 }
 0x1d9   :  { %v5947_v16 = vpack.c.bf16 %v6363_v14, %v6362_v15  ;;  %v4524_v14 = vunpack.c.h.bf16 %v4556_v7  ;;  %v4527_v15 = vunpack.c.l.bf16 %v4557_v12 }
 0x1da   :  { %v7605_v20 = vpop.permute.xlu0 %6355 }
 0x1db   :  { %9450 = vst [vmem:[#allocation25_spill] sm:$0xff] %v7605_v20  ;;  %5948 = vmatprep.subr.bf16.mxu0 %v5947_v16 }
 0x1dc   :  { %5950 = vmatpush3.bf16.msra.mxu0 %v5947_v16  ;;  %v4558_v16 = vld [vmem:[#allocation5 + $0x18] sm:$0xff]  }
 0x1dd   :  { %v4531_v39 = vunpack.c.l.bf16 %v4558_v16  ;;  %v4532_v26 = vunpack.c.h.bf16 %v4558_v16 }
 0x1de   :  { %v7607_v22 = vpop.permute.xlu0 %6370 }
 0x1df   :  { %9451 = vst [vmem:[#allocation26_spill] sm:$0xff] %v7607_v22 }
 0x1e2   :  { %v6376_v23 = vpop.permute.xlu0 %6375 }
 0x1e3   :  { %v6378_v27 = vunpack.i.h.bf16 %v6376_v23  ;;  %v6377_v28 = vunpack.i.l.bf16 %v6376_v23  ;;  %v4528_v23 = vunpack.c.h.bf16 %v4557_v12 }
 0x1e5   :  { %v5951_v30 = vpack.c.bf16 %v6378_v27, %v6377_v28  ;;  %v4560_v27 = vld [vmem:[#allocation5 + $0x28] sm:$0xff]   ;;  %v4536_v28 = vunpack.c.h.bf16 %v4559_v24 }
 0x1e7   :  { %5952 = vmatprep.subr.bf16.mxu0 %v5951_v30 }
 0x1e8   :  { %5954 = vmatpush3.bf16.msra.mxu0 %v5951_v30  ;;  %v4561_v30 = vld [vmem:[#allocation5 + $0x30] sm:$0xff]  }
 0x1e9   :  { %5988 = vmatprep.subr.bf16.mxu0 %v7611_v31 }
 0x216   :  { %v5077_v34 = vpop.f32.mrb[0].mxu1 }
 0x217   :  { %v424_v36 = vpop.f32.mrb[1].mxu1 }
 0x218   :  { %v5859_v37 = vpack.c.bf16 %v5077_v34, %v424_v36  ;;  %v4540_v34 = vunpack.c.h.bf16 %v4560_v27  ;;  %v4562_v36 = vld [vmem:[#allocation5 + $0x38] sm:$0xff]  }
 0x21a   :  { %v5080_v38 = vpop.f32.mrb[2].mxu1  ;;  %5860 = vmatprep.subr.bf16.mxu1 %v5859_v37 }
 0x21b   :  { %v434_v40 = vpop.f32.mrb[3].mxu1  ;;  %5862 = vmatpush3.bf16.msra.mxu1 %v5859_v37  ;;  %v4544_v37 = vunpack.c.h.bf16 %v4561_v30 }
 0x21c   :  { %v5863_v41 = vpack.c.bf16 %v5080_v38, %v434_v40  ;;  %v6278_v38 = vunpack.i.h.bf16 %v7578_v35  ;;  %v6277_v40 = vunpack.i.l.bf16 %v7578_v35 }
 0x21e   :  { %v5083_v45 = vpop.f32.mrb[4].mxu1  ;;  %5864 = vmatprep.subr.bf16.mxu1 %v5863_v41 }
 0x21f   :  { %v444_v42 = vpop.f32.mrb[5].mxu1  ;;  %5866 = vmatpush3.bf16.msra.mxu1 %v5863_v41  ;;  %v4548_v41 = vunpack.c.h.bf16 %v4562_v36 }
 0x220   :  { %v5867_v46 = vpack.c.bf16 %v5083_v45, %v444_v42 }
 0x222   :  { %v5086_v47 = vpop.f32.mrb[6].mxu1  ;;  %5868 = vmatprep.subr.bf16.mxu1 %v5867_v46 }
 0x223   :  { %v454_v48 = vpop.f32.mrb[7].mxu1  ;;  %5870 = vmatpush3.bf16.msra.mxu1 %v5867_v46 }
 0x224   :  { %v5871_v50 = vpack.c.bf16 %v5086_v47, %v454_v48  ;;  %v9370_v47 = vmov 3  }
 0x226   :  { %v5089_v51 = vpop.f32.mrb[8].mxu1  ;;  %5872 = vmatprep.subr.bf16.mxu1 %v5871_v50 }
 0x227   :  { %v464_v52 = vpop.f32.mrb[9].mxu1  ;;  %5874 = vmatpush3.bf16.msra.mxu1 %v5871_v50 }
 0x228   :  { %v5875_v53 = vpack.c.bf16 %v5089_v51, %v464_v52 }
 0x22a   :  { %v5092_v55 = vpop.f32.mrb[10].mxu1  ;;  %5876 = vmatprep.subr.bf16.mxu1 %v5875_v53 }
 0x22b   :  { %v474_v56 = vpop.f32.mrb[11].mxu1  ;;  %5878 = vmatpush3.bf16.msra.mxu1 %v5875_v53 }
 0x22c   :  { %v5879_v57 = vpack.c.bf16 %v5092_v55, %v474_v56 }
 0x22e   :  { %v5095_v58 = vpop.f32.mrb[12].mxu1  ;;  %5880 = vmatprep.subr.bf16.mxu1 %v5879_v57 }
 0x22f   :  { %v484_v60 = vpop.f32.mrb[13].mxu1  ;;  %5882 = vmatpush3.bf16.msra.mxu1 %v5879_v57 }
 0x230   :  { %v5883_v61 = vpack.c.bf16 %v5095_v58, %v484_v60 }
 0x232   :  { %v5098_v62 = vpop.f32.mrb[14].mxu1  ;;  %5884 = vmatprep.subr.bf16.mxu1 %v5883_v61 }
 0x233   :  { %v494_v63 = vpop.f32.mrb[15].mxu1  ;;  %5886 = vmatpush3.bf16.msra.mxu1 %v5883_v61 }
 0x234   :  { %v5887_v6 = vpack.c.bf16 %v5098_v62, %v494_v63  ;;  %v798_v63 = vlaneseq }
 0x236   :  { %5888 = vmatprep.subr.bf16.mxu1 %v5887_v6  ;;  %v7723_v7 = vshrl.u32 %v798_v63, 7 }
 0x237   :  { %5890 = vmatpush3.bf16.msra.mxu1 %v5887_v6  ;;  %v7719_v6 = vpop.permute.xlu1 %6365 }
 0x238   :  { %5892 = vmatprep.subr.bf16.mxu1 %v7519_v5  ;;  %9454 = vst [vmem:[#allocation29_spill] sm:$0xff] %v7719_v6  ;;  %9455 = vst [vmem:[#allocation30_spill] sm:$0xff] %v7723_v7  ;;  %v9368_v12 = vsub.s32 0, %v7723_v7 }
 0x23a   :  { %5167 = vmatmul.mubr.f32.vlgmr.msra.gmra.mrb[16].mxu1 %v4520_v8 }
 0x23b   :  { %5894 = vmatpush3.bf16.msra.mxu1 %v7519_v5  ;;  %5169 = vmatprep.mubr.f32.mxu1 %v4523_v10  ;;  %v4535_v5 = vunpack.c.l.bf16 %v4559_v24 }
 0x23c   :  { %5896 = vmatprep.subr.bf16.mxu1 %v7525_v9 }
 0x23e   :  { %5170 = vmatmul.mubr.f32.gmra.mrb[18].mxu1 %v4524_v14 }
 0x23f   :  { %5898 = vmatpush3.bf16.msra.mxu1 %v7525_v9  ;;  %5172 = vmatprep.mubr.f32.mxu1 %v4527_v15  ;;  %v4539_v9 = vunpack.c.l.bf16 %v4560_v27 }
 0x240   :  { %5900 = vmatprep.subr.bf16.mxu1 %v7529_v13 }
 0x242   :  { %5173 = vmatmul.mubr.f32.gmra.mrb[20].mxu1 %v4528_v23  ;;  %v9369_v23 = vsub.s32 1, %v7723_v7 }
 0x243   :  { %5902 = vmatpush3.bf16.msra.mxu1 %v7529_v13  ;;  %5175 = vmatprep.mubr.f32.mxu1 %v4531_v39  ;;  %v4543_v13 = vunpack.c.l.bf16 %v4561_v30  ;;  %v4486_v30 = vld [vmem:[#allocation2] sm:$0xff]  }
 0x244   :  { %5904 = vmatprep.subr.bf16.mxu1 %v7535_v17 }
 0x246   :  { %5176 = vmatmul.mubr.f32.gmra.mrb[22].mxu1 %v4532_v26 }
 0x247   :  { %5906 = vmatpush3.bf16.msra.mxu1 %v7535_v17  ;;  %5178 = vmatprep.mubr.f32.mxu1 %v4535_v5  ;;  %v4547_v17 = vunpack.c.l.bf16 %v4562_v36  ;;  %v9367_v5 = vsub.s32 2, %v7723_v7 }
 0x248   :  { %5908 = vmatprep.subr.bf16.mxu1 %v7539_v21 }
 0x24a   :  { %5179 = vmatmul.mubr.f32.gmra.mrb[24].mxu1 %v4536_v28 }
 0x24b   :  { %5910 = vmatpush3.bf16.msra.mxu1 %v7539_v21  ;;  %5181 = vmatprep.mubr.f32.mxu1 %v4539_v9  ;;  %v7632_v21 = vpack.c.bf16 %v6278_v38, %v6277_v40  ;;  %v7763_v40 = vunpack.c.h.bf16 %v4486_v30 }
 0x24c   :  { %5912 = vmatprep.subr.bf16.mxu1 %v7545_v25 }
 0x24d   :  { %9453 = vst [vmem:[#allocation28_spill] sm:$0xff] %v7632_v21 }
 0x24e   :  { %5182 = vmatmul.mubr.f32.gmra.mrb[26].mxu1 %v4540_v34 }
 0x24f   :  { %5914 = vmatpush3.bf16.msra.mxu1 %v7545_v25  ;;  %5184 = vmatprep.mubr.f32.mxu1 %v4543_v13  ;;  %v9366_v13 = vsub.s32 3, %v7723_v7 }
 0x250   :  { %5916 = vmatprep.subr.bf16.mxu1 %v7549_v29 }
 0x252   :  { %5185 = vmatmul.mubr.f32.gmra.mrb[28].mxu1 %v4544_v37 }
 0x253   :  { %5918 = vmatpush3.bf16.msra.mxu1 %v7549_v29  ;;  %5187 = vmatprep.mubr.f32.mxu1 %v4547_v17  ;;  %v9372_v29 = vmov 2  }
 0x254   :  { %5920 = vmatprep.subr.bf16.mxu1 %v7557_v33 }
 0x256   :  { %5188 = vmatmul.mubr.f32.gmra.mrb[30].mxu1 %v4548_v41 }
 0x257   :  { %5922 = vmatpush3.bf16.msra.mxu1 %v7557_v33  ;;  %v7636_v25 = vpop.f32.mrb[16].mxu0 }
 0x258   :  { %5956 = vmatprep.subr.bf16.mxu1 %v7632_v21  ;;  %v5133_v45 = vpop.f32.mrb[17].mxu0  ;;  %v7734_v14 = vrot.slane %v7636_v25, %v9368_v12  ;;  %v7747_v26 = vrot.slane %v7636_v25, %v9369_v23  ;;  %v7758_v34 = vrot.slane %v7636_v25, %v9367_v5 }
 0x259   :  { %v7769_v45 = vrot.slane %v7636_v25, %v9366_v13 }
 0x30d   :  { %v5168_v42 = vpop.f32.mrb[16].mxu1 }
 0x30e   :  { %1272 = vperm.xlu1 %6380, %v5168_v42   ;;  %725 = vperm.xlu0 %6379, %v5168_v42   ;;  %v639_v35 = vpop.f32.mrb[17].mxu1 }
 0x311   :  { %v5171_v46 = vpop.f32.mrb[18].mxu1 }
 0x312   :  { %6382 = vset.pattern.permute.xlu1 %v9370_v47  ;;  %6381 = vset.pattern.permute.xlu0 %v9372_v29  ;;  %v649_v48 = vpop.f32.mrb[19].mxu1 }
 0x313   :  { %2450 = vperm.xlu1 %6382, %v5168_v42   ;;  %1869 = vperm.xlu0 %6381, %v5168_v42  }
 0x315   :  { %v5174_v33 = vpop.f32.mrb[20].mxu1 }
 0x316   :  { %v659_v50 = vpop.f32.mrb[21].mxu1 }
 0x317   :  { %6384 = vset.pattern.permute.xlu1 %v7238_v18  ;;  %6383 = vset.pattern.permute.xlu0 %v7239_v19 }
 0x318   :  { %1268 = vperm.xlu1 %6384, %v639_v35   ;;  %720 = vperm.xlu0 %6383, %v639_v35  }
 0x319   :  { %v7642_v51 = vpop.f32.mrb[22].mxu1 }
 0x31a   :  { %v669_v52 = vpop.f32.mrb[23].mxu1 }
 0x31c   :  { %6385 = vset.pattern.permute.xlu1 %v9372_v29  ;;  %730 = vperm.xlu0 %6383, %v649_v48  }
 0x31d   :  { %1865 = vperm.xlu1 %6385, %v639_v35   ;;  %v7645_v53 = vpop.f32.mrb[24].mxu1 }
 0x31e   :  { %v7647_v55 = vpop.f32.mrb[25].mxu1 }
 0x320   :  { %6391 = vset.pattern.permute.xlu0 %v7238_v18 }
 0x321   :  { %6386 = vset.pattern.permute.xlu1 %v9370_v47  ;;  %1276 = vperm.xlu0 %6391, %v649_v48   ;;  %v7651_v56 = vpop.f32.mrb[26].mxu1 }
 0x322   :  { %2446 = vperm.xlu1 %6386, %v639_v35   ;;  %v689_v57 = vpop.f32.mrb[27].mxu1  ;;  %v7771_v35 = vunpack.c.l.bf16 %v4486_v30 }
 0x325   :  { %6392 = vset.pattern.permute.xlu0 %v9372_v29  ;;  %v7654_v58 = vpop.f32.mrb[28].mxu1 }
 0x326   :  { %6387 = vset.pattern.permute.xlu1 %v7239_v19  ;;  %1873 = vperm.xlu0 %6392, %v649_v48   ;;  %v7657_v60 = vpop.f32.mrb[29].mxu1 }
 0x327   :  { %735 = vperm.xlu1 %6387, %v5171_v46  }
 0x329   :  { %v7659_v61 = vpop.f32.mrb[30].mxu1 }
 0x32a   :  { %6393 = vset.pattern.permute.xlu0 %v9370_v47  ;;  %v7662_v62 = vpop.f32.mrb[31].mxu1 }
 0x32b   :  { %6388 = vset.pattern.permute.xlu1 %v7238_v18  ;;  %2454 = vperm.xlu0 %6393, %v649_v48  }
 0x32c   :  { %1280 = vperm.xlu1 %6388, %v5171_v46  }
 0x32f   :  { %6394 = vset.pattern.permute.xlu0 %v7239_v19 }
 0x330   :  { %6389 = vset.pattern.permute.xlu1 %v9372_v29  ;;  %745 = vperm.xlu0 %6394, %v5174_v33  }
 0x331   :  { %1877 = vperm.xlu1 %6389, %v5171_v46  }
 0x334   :  { %6396 = vset.pattern.permute.xlu0 %v9372_v29 }
 0x335   :  { %6390 = vset.pattern.permute.xlu1 %v9370_v47  ;;  %1885 = vperm.xlu0 %6396, %v5174_v33  }
 0x336   :  { %2458 = vperm.xlu1 %6390, %v5171_v46  }
 0x339   :  { %6406 = vset.pattern.permute.xlu0 %v7239_v19 }
 0x33a   :  { %6395 = vset.pattern.permute.xlu1 %v7238_v18  ;;  %750 = vperm.xlu0 %6406, %v669_v52  }
 0x33b   :  { %1288 = vperm.xlu1 %6395, %v5174_v33  }
 0x33e   :  { %6407 = vset.pattern.permute.xlu0 %v7238_v18 }
 0x33f   :  { %6397 = vset.pattern.permute.xlu1 %v9370_v47  ;;  %1292 = vperm.xlu0 %6407, %v669_v52  }
 0x340   :  { %2466 = vperm.xlu1 %6397, %v5174_v33  }
 0x343   :  { %6408 = vset.pattern.permute.xlu0 %v9372_v29 }
 0x344   :  { %6398 = vset.pattern.permute.xlu1 %v7239_v19  ;;  %1889 = vperm.xlu0 %6408, %v669_v52  }
 0x345   :  { %740 = vperm.xlu1 %6398, %v659_v50  }
 0x348   :  { %6409 = vset.pattern.permute.xlu0 %v9370_v47 }
 0x349   :  { %6399 = vset.pattern.permute.xlu1 %v7238_v18  ;;  %2470 = vperm.xlu0 %6409, %v669_v52  }
 0x34a   :  { %1284 = vperm.xlu1 %6399, %v659_v50  }
 0x34d   :  { %6410 = vset.pattern.permute.xlu0 %v7239_v19 }
 0x34e   :  { %6400 = vset.pattern.permute.xlu1 %v9372_v29  ;;  %765 = vperm.xlu0 %6410, %v7645_v53  }
 0x34f   :  { %1881 = vperm.xlu1 %6400, %v659_v50  }
 0x352   :  { %6412 = vset.pattern.permute.xlu0 %v9372_v29 }
 0x353   :  { %6401 = vset.pattern.permute.xlu1 %v9370_v47  ;;  %1901 = vperm.xlu0 %6412, %v7645_v53  }
 0x354   :  { %2462 = vperm.xlu1 %6401, %v659_v50  }
 0x357   :  { %6422 = vset.pattern.permute.xlu0 %v7239_v19 }
 0x358   :  { %6402 = vset.pattern.permute.xlu1 %v7239_v19  ;;  %770 = vperm.xlu0 %6422, %v689_v57  }
 0x359   :  { %755 = vperm.xlu1 %6402, %v7642_v51  }
 0x35c   :  { %6423 = vset.pattern.permute.xlu0 %v7238_v18 }
 0x35d   :  { %6403 = vset.pattern.permute.xlu1 %v7238_v18  ;;  %1308 = vperm.xlu0 %6423, %v689_v57  }
 0x35e   :  { %1296 = vperm.xlu1 %6403, %v7642_v51  }
 0x361   :  { %6424 = vset.pattern.permute.xlu0 %v9372_v29 }
 0x362   :  { %6404 = vset.pattern.permute.xlu1 %v9372_v29  ;;  %1905 = vperm.xlu0 %6424, %v689_v57  }
 0x363   :  { %1893 = vperm.xlu1 %6404, %v7642_v51  }
 0x366   :  { %6425 = vset.pattern.permute.xlu0 %v9370_v47 }
 0x367   :  { %6405 = vset.pattern.permute.xlu1 %v9370_v47  ;;  %2486 = vperm.xlu0 %6425, %v689_v57  }
 0x368   :  { %2474 = vperm.xlu1 %6405, %v7642_v51  }
 0x36b   :  { %6426 = vset.pattern.permute.xlu0 %v7239_v19 }
 0x36c   :  { %6411 = vset.pattern.permute.xlu1 %v7238_v18  ;;  %785 = vperm.xlu0 %6426, %v7654_v58  }
 0x36d   :  { %1304 = vperm.xlu1 %6411, %v7645_v53  }
 0x370   :  { %6428 = vset.pattern.permute.xlu0 %v9372_v29 }
 0x371   :  { %6413 = vset.pattern.permute.xlu1 %v9370_v47  ;;  %1917 = vperm.xlu0 %6428, %v7654_v58  }
 0x372   :  { %2482 = vperm.xlu1 %6413, %v7645_v53  }
 0x375   :  { %6438 = vset.pattern.permute.xlu0 %v7239_v19 }
 0x376   :  { %6414 = vset.pattern.permute.xlu1 %v7239_v19  ;;  %790 = vperm.xlu0 %6438, %v7662_v62  }
 0x377   :  { %760 = vperm.xlu1 %6414, %v7647_v55  }
 0x37a   :  { %6439 = vset.pattern.permute.xlu0 %v7238_v18 }
 0x37b   :  { %6415 = vset.pattern.permute.xlu1 %v7238_v18  ;;  %1324 = vperm.xlu0 %6439, %v7662_v62  }
 0x37c   :  { %1300 = vperm.xlu1 %6415, %v7647_v55  }
 0x37f   :  { %6440 = vset.pattern.permute.xlu0 %v9372_v29 }
 0x380   :  { %6416 = vset.pattern.permute.xlu1 %v9372_v29  ;;  %1921 = vperm.xlu0 %6440, %v7662_v62  }
 0x381   :  { %1897 = vperm.xlu1 %6416, %v7647_v55  }
 0x384   :  { %6441 = vset.pattern.permute.xlu0 %v9370_v47 }
 0x385   :  { %6417 = vset.pattern.permute.xlu1 %v9370_v47  ;;  %2502 = vperm.xlu0 %6441, %v7662_v62  }
 0x386   :  { %2478 = vperm.xlu1 %6417, %v7647_v55  }
 0x389   :  { %6573 = vset.pattern.permute.xlu0 %v7238_v18 }
 0x38a   :  { %6418 = vset.pattern.permute.xlu1 %v7239_v19 }
 0x38b   :  { %775 = vperm.xlu1 %6418, %v7651_v56  }
 0x38d   :  { %v7726_v8 = vpop.permute.xlu1 %1272  ;;  %v726_v10 = vpop.permute.xlu0 %725 }
 0x38e   :  { %v803_v39 = vadd.f32 %v7734_v14, %v726_v10 }
 0x38f   :  { %6419 = vset.pattern.permute.xlu1 %v7238_v18 }
 0x390   :  { %1312 = vperm.xlu1 %6419, %v7651_v56   ;;  %v819_v28 = vmul.f32 0.2, %v803_v39 }
 0x392   :  { %v7736_v15 = vpop.permute.xlu1 %2450  ;;  %v7738_v16 = vpop.permute.xlu0 %1869  ;;  %v835_v41 = vmax.f32 %v803_v39, %v819_v28  ;;  %v7793_v39 = vld [vmem:[#allocation2 + $0x8] sm:$0xff]  }
 0x393   :  { %v4491_v28 = vunpack.c.l.bf16 %v7793_v39 }
 0x394   :  { %6420 = vset.pattern.permute.xlu1 %v9372_v29  ;;  %v7775_v33 = vadd.f32 %v7763_v40, %v835_v41 }
 0x395   :  { %1909 = vperm.xlu1 %6420, %v7651_v56  }
 0x397   :  { %v1269_v24 = vpop.permute.xlu1 %1268  ;;  %v7750_v27 = vpop.permute.xlu0 %720 }
 0x398   :  { %v1335_v9 = vadd.f32 %v7747_v26, %v1269_v24 }
 0x399   :  { %6421 = vset.pattern.permute.xlu1 %v9370_v47 }
 0x39a   :  { %2490 = vperm.xlu1 %6421, %v7651_v56   ;;  %v1351_v17 = vmul.f32 0.2, %v1335_v9 }
 0x39b   :  { %v731_v37 = vpop.permute.xlu0 %730 }
 0x39c   :  { %v1866_v36 = vpop.permute.xlu1 %1865  ;;  %v1367_v50 = vmax.f32 %v1335_v9, %v1351_v17  ;;  %v804_v25 = vadd.f32 %v7734_v14, %v731_v37 }
 0x39d   :  { %v1932_v38 = vadd.f32 %v7758_v34, %v1866_v36 }
 0x39e   :  { %6427 = vset.pattern.permute.xlu1 %v7238_v18  ;;  %v7784_v55 = vadd.f32 %v7771_v35, %v1367_v50  ;;  %v820_v62 = vmul.f32 0.2, %v804_v25 }
 0x39f   :  { %1320 = vperm.xlu1 %6427, %v7654_v58   ;;  %v1948_v46 = vmul.f32 0.2, %v1932_v38 }
 0x3a0   :  { %v1277_v51 = vpop.permute.xlu0 %1276  ;;  %v836_v37 = vmax.f32 %v804_v25, %v820_v62 }
 0x3a1   :  { %v2447_v42 = vpop.permute.xlu1 %2446  ;;  %v1964_v56 = vmax.f32 %v1932_v38, %v1948_v46 }
 0x3a2   :  { %v2513_v48 = vadd.f32 %v7769_v45, %v2447_v42  ;;  %v7810_v46 = vadd.f32 %v4491_v28, %v836_v37  ;;  %v7839_v37 = vld [vmem:[#allocation2 + $0x10] sm:$0xff]  }
 0x3a3   :  { %6429 = vset.pattern.permute.xlu1 %v9370_v47  ;;  %v7791_v63 = vadd.f32 %v7771_v35, %v1964_v56 }
 0x3a4   :  { %2498 = vperm.xlu1 %6429, %v7654_v58   ;;  %868 = vmax.xlane.f32.xlu0 %v7775_v33  ;;  %v2529_v52 = vmul.f32 0.2, %v2513_v48  ;;  %v1337_v58 = vadd.f32 %v7747_v26, %v1277_v51 }
 0x3a5   :  { %v1874_v57 = vpop.permute.xlu0 %1873 }
 0x3a6   :  { %v7781_v53 = vpop.permute.xlu1 %735  ;;  %v2545_v10 = vmax.f32 %v2513_v48, %v2529_v52  ;;  %v1353_v9 = vmul.f32 0.2, %v1337_v58  ;;  %v1934_v30 = vadd.f32 %v7758_v34, %v1874_v57 }
 0x3a8   :  { %6430 = vset.pattern.permute.xlu1 %v7239_v19  ;;  %1399 = vmax.xlane.f32.xlu0 %v7784_v55  ;;  %v7803_v36 = vadd.f32 %v7771_v35, %v2545_v10  ;;  %v1950_v41 = vmul.f32 0.2, %v1934_v30  ;;  %v1369_v48 = vmax.f32 %v1337_v58, %v1353_v9 }
 0x3a9   :  { %780 = vperm.xlu1 %6430, %v7657_v60  }
 0x3aa   :  { %v2455_v17 = vpop.permute.xlu0 %2454  ;;  %v7816_v25 = vadd.f32 %v4491_v28, %v1369_v48  ;;  %v1966_v52 = vmax.f32 %v1934_v30, %v1950_v41  ;;  %v4495_v41 = vunpack.c.l.bf16 %v7839_v37 }
 0x3ab   :  { %v7795_v24 = vpop.permute.xlu1 %1280  ;;  %v2515_v42 = vadd.f32 %v7769_v45, %v2455_v17 }
 0x3ac   :  { %1996 = vmax.xlane.f32.xlu0 %v7791_v63  ;;  %v7823_v57 = vadd.f32 %v4491_v28, %v1966_v52 }
 0x3ad   :  { %6431 = vset.pattern.permute.xlu1 %v7238_v18  ;;  %v2531_v51 = vmul.f32 0.2, %v2515_v42 }
 0x3ae   :  { %1316 = vperm.xlu1 %6431, %v7657_v60  }
 0x3af   :  { %v2547_v62 = vmax.f32 %v2515_v42, %v2531_v51 }
 0x3b0   :  { %v7805_v38 = vpop.permute.xlu1 %1877  ;;  %2577 = vmax.xlane.f32.xlu0 %v7803_v36 }
 0x3b1   :  { %v7828_v58 = vadd.f32 %v4491_v28, %v2547_v62 }
 0x3b2   :  { %6432 = vset.pattern.permute.xlu1 %v9372_v29 }
 0x3b3   :  { %1913 = vperm.xlu1 %6432, %v7657_v60  }
 0x3b4   :  { %870 = vmax.xlane.f32.xlu0 %v7810_v46 }
 0x3b5   :  { %v7814_v50 = vpop.permute.xlu1 %2458 }
 0x3b6   :  { %v2516_v31 = vadd.f32 %v7769_v45, %v7814_v50 }
 0x3b7   :  { %6433 = vset.pattern.permute.xlu1 %v9370_v47 }
 0x3b8   :  { %2494 = vperm.xlu1 %6433, %v7657_v60   ;;  %1403 = vmax.xlane.f32.xlu0 %v7816_v25  ;;  %v7833_v60 = vpop.permute.xlu0 %745 }
 0x3ba   :  { %v7821_v56 = vpop.permute.xlu1 %1288 }
 0x3bc   :  { %6434 = vset.pattern.permute.xlu1 %v7239_v19  ;;  %2000 = vmax.xlane.f32.xlu0 %v7823_v57  ;;  %v7841_v17 = vpop.permute.xlu0 %1885 }
 0x3bd   :  { %795 = vperm.xlu1 %6434, %v7659_v61  }
 0x3bf   :  { %v7830_v10 = vpop.permute.xlu1 %2466 }
 0x3c0   :  { %2581 = vmax.xlane.f32.xlu0 %v7828_v58  ;;  %v751_v51 = vpop.permute.xlu0 %750 }
 0x3c1   :  { %6435 = vset.pattern.permute.xlu1 %v7238_v18  ;;  %v808_v12 = vadd.f32 %v7734_v14, %v751_v51 }
 0x3c2   :  { %1328 = vperm.xlu1 %6435, %v7659_v61  }
 0x3c4   :  { %v741_v9 = vpop.permute.xlu1 %740 }
 0x3c5   :  { %v806_v30 = vadd.f32 %v7734_v14, %v741_v9 }
 0x3c6   :  { %6436 = vset.pattern.permute.xlu1 %v9372_v29 }
 0x3c7   :  { %v822_v28 = vmul.f32 0.2, %v806_v30  ;;  %1925 = vperm.xlu1 %6436, %v7659_v61  }
 0x3c9   :  { %v1285_v42 = vpop.permute.xlu1 %1284  ;;  %v838_v48 = vmax.f32 %v806_v30, %v822_v28  ;;  %v1293_v30 = vpop.permute.xlu0 %1292 }
 0x3ca   :  { %v1339_v18 = vadd.f32 %v7747_v26, %v1285_v42 }
 0x3cb   :  { %6437 = vset.pattern.permute.xlu1 %v9370_v47  ;;  %v7847_v52 = vadd.f32 %v4495_v41, %v838_v48  ;;  %v824_v47 = vmul.f32 0.2, %v808_v12 }
 0x3cc   :  { %v1355_v62 = vmul.f32 0.2, %v1339_v18  ;;  %2506 = vperm.xlu1 %6437, %v7659_v61  }
 0x3cd   :  { %874 = vmax.xlane.f32.xlu0 %v7847_v52 }
 0x3ce   :  { %v1882_v9 = vpop.permute.xlu1 %1881  ;;  %v1371_v13 = vmax.f32 %v1339_v18, %v1355_v62  ;;  %v7860_v18 = vld [vmem:[#allocation2 + $0x18] sm:$0xff]   ;;  %v1341_v62 = vadd.f32 %v7747_v26, %v1293_v30 }
 0x3cf   :  { %v1936_v5 = vadd.f32 %v7758_v34, %v1882_v9  ;;  %v4499_v0 = vunpack.c.l.bf16 %v7860_v18 }
 0x3d0   :  { %v7853_v23 = vadd.f32 %v4495_v41, %v1371_v13  ;;  %6572 = vset.pattern.permute.xlu1 %v7239_v19  ;;  %v1890_v13 = vpop.permute.xlu0 %1889  ;;  %v840_v19 = vmax.f32 %v808_v12, %v824_v47  ;;  %v1336_v12 = vadd.f32 %v7747_v26, %v7726_v8 }
 0x3d1   :  { %v1952_v28 = vmul.f32 0.2, %v1936_v5 }
 0x3d2   :  { %1407 = vmax.xlane.f32.xlu0 %v7853_v23 }
 0x3d3   :  { %v2463_v42 = vpop.permute.xlu1 %2462  ;;  %v1968_v48 = vmax.f32 %v1936_v5, %v1952_v28  ;;  %v1357_v5 = vmul.f32 0.2, %v1341_v62  ;;  %v1938_v28 = vadd.f32 %v7758_v34, %v1890_v13  ;;  %v1352_v13 = vmul.f32 0.2, %v1336_v12 }
 0x3d4   :  { %v2517_v61 = vadd.f32 %v7769_v45, %v2463_v42  ;;  %v2471_v30 = vpop.permute.xlu0 %2470 }
 0x3d5   :  { %v7858_v29 = vadd.f32 %v4495_v41, %v1968_v48  ;;  %v7871_v48 = vadd.f32 %v4499_v0, %v840_v19  ;;  %v1373_v6 = vmax.f32 %v1341_v62, %v1357_v5  ;;  %v1954_v22 = vmul.f32 0.2, %v1938_v28 }
 0x3d6   :  { %v2533_v51 = vmul.f32 0.2, %v2517_v61  ;;  %v2519_v47 = vadd.f32 %v7769_v45, %v2471_v30  ;;  %v1933_v62 = vadd.f32 %v7758_v34, %v7738_v16  ;;  %v1368_v8 = vmax.f32 %v1336_v12, %v1352_v13 }
 0x3d7   :  { %2004 = vmax.xlane.f32.xlu0 %v7858_v29  ;;  %9456 = vst [vmem:[#allocation31_spill] sm:$0xff] %v7871_v48 }
 0x3d8   :  { %v7864_v9 = vpop.permute.xlu1 %755  ;;  %v2549_v1 = vmax.f32 %v2517_v61, %v2533_v51  ;;  %v1970_v61 = vmax.f32 %v1938_v28, %v1954_v22  ;;  %v2535_v51 = vmul.f32 0.2, %v2519_v47  ;;  %v2514_v22 = vadd.f32 %v7769_v45, %v7736_v15 }
 0x3d9   :  { %v1949_v28 = vmul.f32 0.2, %v1933_v62 }
 0x3da   :  { %v7868_v42 = vadd.f32 %v4495_v41, %v2549_v1  ;;  %v7881_v41 = vadd.f32 %v4499_v0, %v1373_v6  ;;  %v2551_v19 = vmax.f32 %v2519_v47, %v2535_v51  ;;  %v7886_v5 = vadd.f32 %v4499_v0, %v1970_v61  ;;  %v7903_v51 = vpop.permute.xlu0 %765 }
 0x3db   :  { %v2530_v20 = vmul.f32 0.2, %v2514_v22  ;;  %v1965_v16 = vmax.f32 %v1933_v62, %v1949_v28  ;;  %v802_v47 = vadd.f32 %v7734_v14, %v7750_v27  ;;  %v7901_v61 = vadd.f32 %v7763_v40, %v1368_v8 }
 0x3dc   :  { %2585 = vmax.xlane.f32.xlu0 %v7868_v42  ;;  %9457 = vst [vmem:[#allocation32_spill] sm:$0xff] %v7881_v41  ;;  %9458 = vst [vmem:[#allocation33_spill] sm:$0xff] %v7886_v5  ;;  %v7893_v6 = vadd.f32 %v4499_v0, %v2551_v19  ;;  %v805_v0 = vadd.f32 %v7734_v14, %v7781_v53  ;;  %v1338_v28 = vadd.f32 %v7747_v26, %v7795_v24 }
 0x3dd   :  { %v7873_v7 = vpop.permute.xlu1 %1296  ;;  %v2546_v12 = vmax.f32 %v2514_v22, %v2530_v20  ;;  %v818_v13 = vmul.f32 0.2, %v802_v47  ;;  %v7911_v19 = vadd.f32 %v7763_v40, %v1965_v16  ;;  %v7923_v20 = vld [vmem:[#allocation2 + $0x20] sm:$0xff]   ;;  %v4492_v16 = vunpack.c.h.bf16 %v7793_v39 }
 0x3de   :  { %9459 = vst [vmem:[#allocation34_spill] sm:$0xff] %v7893_v6  ;;  %v821_v27 = vmul.f32 0.2, %v805_v0  ;;  %v7914_v62 = vpop.permute.xlu0 %1901  ;;  %v4503_v21 = vunpack.c.l.bf16 %v7923_v20  ;;  %v1935_v24 = vadd.f32 %v7758_v34, %v7805_v38 }
 0x3df   :  { %v834_v8 = vmax.f32 %v802_v47, %v818_v13  ;;  %v7919_v4 = vadd.f32 %v7763_v40, %v2546_v12  ;;  %v1354_v47 = vmul.f32 0.2, %v1338_v28 }
 0x3e0   :  { %878 = vmax.xlane.f32.xlu0 %v7871_v48  ;;  %v837_v22 = vmax.f32 %v805_v0, %v821_v27  ;;  %v1951_v49 = vmul.f32 0.2, %v1935_v24 }
 0x3e1   :  { %v7930_v13 = vadd.f32 %v7771_v35, %v834_v8  ;;  %v1370_v27 = vmax.f32 %v1338_v28, %v1354_v47 }
 0x3e2   :  { %v7879_v1 = vpop.permute.xlu1 %1893  ;;  %v771_v40 = vpop.permute.xlu0 %770  ;;  %v7936_v39 = vadd.f32 %v4492_v16, %v837_v22  ;;  %v1967_v22 = vmax.f32 %v1935_v24, %v1951_v49 }
 0x3e3   :  { %v7945_v28 = vadd.f32 %v4492_v16, %v1370_v27  ;;  %v812_v54 = vadd.f32 %v7734_v14, %v771_v40 }
 0x3e4   :  { %1411 = vmax.xlane.f32.xlu0 %v7881_v41  ;;  %v7955_v24 = vadd.f32 %v4492_v16, %v1967_v22 }
 0x3e5   :  { %v828_v44 = vmul.f32 0.2, %v812_v54 }
 0x3e7   :  { %v7888_v30 = vpop.permute.xlu1 %2474 }
 0x3e8   :  { %2008 = vmax.xlane.f32.xlu0 %v7886_v5 }
 0x3ec   :  { %v7895_v11 = vpop.permute.xlu1 %1304  ;;  %2589 = vmax.xlane.f32.xlu0 %v7893_v6 }
 0x3f0   :  { %1401 = vmax.xlane.f32.xlu1 %v7901_v61 }
 0x3f1   :  { %v7908_v15 = vpop.permute.xlu1 %2482 }
 0x3f4   :  { %1998 = vmax.xlane.f32.xlu1 %v7911_v19 }
 0x3f6   :  { %v761_v3 = vpop.permute.xlu1 %760 }
 0x3f7   :  { %v810_v53 = vadd.f32 %v7734_v14, %v761_v3 }
 0x3f8   :  { %2579 = vmax.xlane.f32.xlu1 %v7919_v4 }
 0x3f9   :  { %v826_v59 = vmul.f32 0.2, %v810_v53 }
 0x3fb   :  { %v842_v12 = vmax.f32 %v810_v53, %v826_v59  ;;  %v1301_v3 = vpop.permute.xlu1 %1300  ;;  %v807_v59 = vadd.f32 %v7734_v14, %v7833_v60  ;;  %v1309_v53 = vpop.permute.xlu0 %1308 }
 0x3fc   :  { %v1343_v2 = vadd.f32 %v7747_v26, %v1301_v3  ;;  %866 = vmax.xlane.f32.xlu1 %v7930_v13  ;;  %v2532_v3 = vmul.f32 0.2, %v2516_v31  ;;  %v1345_v40 = vadd.f32 %v7747_v26, %v1309_v53 }
 0x3fd   :  { %v7934_v0 = vadd.f32 %v4503_v21, %v842_v12 }
 0x3fe   :  { %v1359_v38 = vmul.f32 0.2, %v1343_v2  ;;  %v2548_v60 = vmax.f32 %v2516_v31, %v2532_v3  ;;  %v4496_v31 = vunpack.c.h.bf16 %v7839_v37 }
 0x3ff   :  { %9460 = vst [vmem:[#allocation35_spill] sm:$0xff] %v7934_v0  ;;  %882 = vmax.xlane.f32.xlu0 %v7934_v0  ;;  %v1906_v27 = vpop.permute.xlu0 %1905  ;;  %v1361_v0 = vmul.f32 0.2, %v1345_v40 }
 0x400   :  { %v1375_v35 = vmax.f32 %v1343_v2, %v1359_v38  ;;  %v1898_v8 = vpop.permute.xlu1 %1897  ;;  %872 = vmax.xlane.f32.xlu1 %v7936_v39  ;;  %v823_v2 = vmul.f32 0.2, %v807_v59  ;;  %v1942_v5 = vadd.f32 %v7758_v34, %v1906_v27 }
 0x401   :  { %v1940_v12 = vadd.f32 %v7758_v34, %v1898_v8  ;;  %v1340_v8 = vadd.f32 %v7747_v26, %v7821_v56 }
 0x402   :  { %v7947_v47 = vadd.f32 %v4503_v21, %v1375_v35 }
 0x403   :  { %v1956_v50 = vmul.f32 0.2, %v1940_v12  ;;  %v1356_v56 = vmul.f32 0.2, %v1340_v8 }
 0x404   :  { %9461 = vst [vmem:[#allocation36_spill] sm:$0xff] %v7947_v47  ;;  %1405 = vmax.xlane.f32.xlu1 %v7945_v28  ;;  %1415 = vmax.xlane.f32.xlu0 %v7947_v47  ;;  %v7961_v47 = vld [vmem:[#allocation2 + $0x28] sm:$0xff]  }
 0x405   :  { %v1972_v38 = vmax.f32 %v1940_v12, %v1956_v50  ;;  %v2479_v43 = vpop.permute.xlu1 %2478  ;;  %v839_v12 = vmax.f32 %v807_v59, %v823_v2  ;;  %v7969_v50 = vadd.f32 %v4492_v16, %v2548_v60  ;;  %v4507_v53 = vunpack.c.l.bf16 %v7961_v47  ;;  %v2487_v59 = vpop.permute.xlu0 %2486 }
 0x406   :  { %v2521_v49 = vadd.f32 %v7769_v45, %v2479_v43  ;;  %v1937_v43 = vadd.f32 %v7758_v34, %v7841_v17  ;;  %v2523_v60 = vadd.f32 %v7769_v45, %v2487_v59 }
 0x407   :  { %v7957_v35 = vadd.f32 %v4503_v21, %v1972_v38  ;;  %v844_v38 = vmax.f32 %v812_v54, %v828_v44  ;;  %v7979_v17 = vadd.f32 %v4496_v31, %v839_v12  ;;  %v1377_v44 = vmax.f32 %v1345_v40, %v1361_v0 }
 0x408   :  { %v2537_v32 = vmul.f32 0.2, %v2521_v49  ;;  %2002 = vmax.xlane.f32.xlu1 %v7955_v24  ;;  %v1953_v2 = vmul.f32 0.2, %v1937_v43  ;;  %v1958_v54 = vmul.f32 0.2, %v1942_v5 }
 0x409   :  { %9462 = vst [vmem:[#allocation37_spill] sm:$0xff] %v7957_v35  ;;  %2012 = vmax.xlane.f32.xlu0 %v7957_v35  ;;  %v1372_v35 = vmax.f32 %v1340_v8, %v1356_v56  ;;  %v809_v8 = vadd.f32 %v7734_v14, %v7864_v9  ;;  %v2539_v56 = vmul.f32 0.2, %v2523_v60  ;;  %v7995_v0 = vadd.f32 %v4507_v53, %v1377_v44 }
 0x40a   :  { %v2553_v22 = vmax.f32 %v2521_v49, %v2537_v32  ;;  %v7967_v3 = vpop.permute.xlu1 %775  ;;  %v2518_v32 = vadd.f32 %v7769_v45, %v7830_v10  ;;  %v1969_v49 = vmax.f32 %v1937_v43, %v1953_v2  ;;  %v1974_v12 = vmax.f32 %v1942_v5, %v1958_v54 }
 0x40b   :  { %v7990_v10 = vadd.f32 %v4496_v31, %v1372_v35  ;;  %9465 = vst [vmem:[#allocation40_spill] sm:$0xff] %v7995_v0  ;;  %v1342_v43 = vadd.f32 %v7747_v26, %v7873_v7  ;;  %v2555_v59 = vmax.f32 %v2523_v60, %v2539_v56  ;;  %v4500_v2 = vunpack.c.h.bf16 %v7860_v18 }
 0x40c   :  { %2583 = vmax.xlane.f32.xlu1 %v7969_v50  ;;  %v7974_v37 = vadd.f32 %v4503_v21, %v2553_v22  ;;  %v7985_v21 = vadd.f32 %v4507_v53, %v844_v38  ;;  %v2534_v27 = vmul.f32 0.2, %v2518_v32  ;;  %v825_v38 = vmul.f32 0.2, %v809_v8 }
 0x40d   :  { %v8000_v9 = vadd.f32 %v4496_v31, %v1969_v49  ;;  %v8003_v5 = vadd.f32 %v4507_v53, %v1974_v12  ;;  %v1358_v54 = vmul.f32 0.2, %v1342_v43  ;;  %v8013_v49 = vpop.permute.xlu0 %785  ;;  %v8016_v60 = vadd.f32 %v4507_v53, %v2555_v59 }
 0x40e   :  { %9463 = vst [vmem:[#allocation38_spill] sm:$0xff] %v7974_v37  ;;  %2593 = vmax.xlane.f32.xlu0 %v7974_v37  ;;  %9464 = vst [vmem:[#allocation39_spill] sm:$0xff] %v7985_v21  ;;  %v2550_v40 = vmax.f32 %v2518_v32, %v2534_v27  ;;  %v841_v44 = vmax.f32 %v809_v8, %v825_v38  ;;  %v1939_v32 = vadd.f32 %v7758_v34, %v7879_v1 }
 0x40f   :  { %v7981_v16 = vpop.permute.xlu1 %1312  ;;  %9466 = vst [vmem:[#allocation41_spill] sm:$0xff] %v8003_v5  ;;  %9467 = vst [vmem:[#allocation42_spill] sm:$0xff] %v8016_v60  ;;  %v1374_v27 = vmax.f32 %v1342_v43, %v1358_v54  ;;  %v2520_v18 = vadd.f32 %v7769_v45, %v7888_v30  ;;  %v813_v6 = vadd.f32 %v7734_v14, %v7967_v3 }
 0x410   :  { %876 = vmax.xlane.f32.xlu1 %v7979_v17  ;;  %v8011_v7 = vadd.f32 %v4496_v31, %v2550_v40  ;;  %v1955_v12 = vmul.f32 0.2, %v1939_v32  ;;  %v8023_v1 = vadd.f32 %v4500_v2, %v841_v44  ;;  %v811_v31 = vadd.f32 %v7734_v14, %v7903_v51 }
 0x411   :  { %v2536_v40 = vmul.f32 0.2, %v2520_v18  ;;  %v8028_v53 = vpop.permute.xlu0 %1917  ;;  %v8030_v38 = vadd.f32 %v4500_v2, %v1374_v27  ;;  %v1344_v44 = vadd.f32 %v7747_v26, %v7895_v11  ;;  %v4504_v27 = vunpack.c.h.bf16 %v7923_v20 }
 0x412   :  { %886 = vmax.xlane.f32.xlu0 %v7985_v21  ;;  %v1971_v56 = vmax.f32 %v1939_v32, %v1955_v12  ;;  %v827_v30 = vmul.f32 0.2, %v811_v31  ;;  %v1941_v12 = vadd.f32 %v7758_v34, %v7914_v62  ;;  %v2522_v20 = vadd.f32 %v7769_v45, %v7908_v15 }
 0x413   :  { %v2552_v59 = vmax.f32 %v2520_v18, %v2536_v40  ;;  %v1360_v21 = vmul.f32 0.2, %v1344_v44  ;;  %v8046_v18 = vld [vmem:[#allocation2 + $0x30] sm:$0xff]  }
 0x414   :  { %v7992_v22 = vpop.permute.xlu1 %1909  ;;  %1409 = vmax.xlane.f32.xlu1 %v7990_v10  ;;  %v8037_v54 = vadd.f32 %v4500_v2, %v1971_v56  ;;  %v843_v51 = vmax.f32 %v811_v31, %v827_v30  ;;  %v4511_v56 = vunpack.c.l.bf16 %v8046_v18 }
 0x415   :  { %v8044_v37 = vadd.f32 %v4500_v2, %v2552_v59  ;;  %v1376_v30 = vmax.f32 %v1344_v44, %v1360_v21 }
 0x416   :  { %1419 = vmax.xlane.f32.xlu0 %v7995_v0  ;;  %v8050_v31 = vadd.f32 %v4504_v27, %v843_v51 }
 0x417   :  { %9468 = vst [vmem:[#allocation43_spill] sm:$0xff] %v8044_v37  ;;  %v8061_v44 = vadd.f32 %v4504_v27, %v1376_v30 }
 0x418   :  { %2006 = vmax.xlane.f32.xlu1 %v8000_v9  ;;  %9469 = vst [vmem:[#allocation44_spill] sm:$0xff] %v8050_v31 }
 0x419   :  { %v8005_v35 = vpop.permute.xlu1 %2490  ;;  %9471 = vst [vmem:[#allocation46_spill] sm:$0xff] %v8061_v44 }
 0x41a   :  { %2016 = vmax.xlane.f32.xlu0 %v8003_v5 }
 0x41c   :  { %2587 = vmax.xlane.f32.xlu1 %v8011_v7 }
 0x41e   :  { %v8020_v8 = vpop.permute.xlu1 %1320  ;;  %2597 = vmax.xlane.f32.xlu0 %v8016_v60  ;;  %v791_v60 = vpop.permute.xlu0 %790 }
 0x420   :  { %880 = vmax.xlane.f32.xlu1 %v8023_v1 }
 0x422   :  { %v1325_v62 = vpop.permute.xlu0 %1324 }
 0x423   :  { %v8032_v43 = vpop.permute.xlu1 %2498 }
 0x424   :  { %1413 = vmax.xlane.f32.xlu1 %v8030_v38 }
 0x426   :  { %v1922_v48 = vpop.permute.xlu0 %1921 }
 0x428   :  { %v781_v5 = vpop.permute.xlu1 %780  ;;  %2010 = vmax.xlane.f32.xlu1 %v8037_v54 }
 0x429   :  { %v814_v32 = vadd.f32 %v7734_v14, %v781_v5  ;;  %v1957_v5 = vmul.f32 0.2, %v1941_v12 }
 0x42b   :  { %v830_v11 = vmul.f32 0.2, %v814_v32  ;;  %v1973_v51 = vmax.f32 %v1941_v12, %v1957_v5  ;;  %v1346_v12 = vadd.f32 %v7747_v26, %v7981_v16  ;;  %v2503_v16 = vpop.permute.xlu0 %2502 }
 0x42c   :  { %2591 = vmax.xlane.f32.xlu1 %v8044_v37 }
 0x42d   :  { %v846_v40 = vmax.f32 %v814_v32, %v830_v11  ;;  %v1317_v0 = vpop.permute.xlu1 %1316  ;;  %v2538_v32 = vmul.f32 0.2, %v2522_v20 }
 0x42e   :  { %v1347_v2 = vadd.f32 %v7747_v26, %v1317_v0 }
 0x42f   :  { %v8055_v59 = vadd.f32 %v4511_v56, %v846_v40  ;;  %v816_v40 = vadd.f32 %v7734_v14, %v791_v60  ;;  %v2554_v3 = vmax.f32 %v2522_v20, %v2538_v32  ;;  %v1349_v60 = vadd.f32 %v7747_v26, %v1325_v62  ;;  %v8079_v32 = vld [vmem:[#allocation2 + $0x38] sm:$0xff]  }
 0x430   :  { %v1363_v41 = vmul.f32 0.2, %v1347_v2  ;;  %884 = vmax.xlane.f32.xlu1 %v8050_v31  ;;  %v829_v31 = vmul.f32 0.2, %v813_v6  ;;  %v1946_v62 = vadd.f32 %v7758_v34, %v1922_v48 }
 0x431   :  { %9470 = vst [vmem:[#allocation45_spill] sm:$0xff] %v8055_v59  ;;  %890 = vmax.xlane.f32.xlu0 %v8055_v59 }
 0x432   :  { %v1379_v11 = vmax.f32 %v1347_v2, %v1363_v41  ;;  %v1914_v21 = vpop.permute.xlu1 %1913  ;;  %v8071_v41 = vadd.f32 %v4504_v27, %v1973_v51  ;;  %v845_v59 = vmax.f32 %v813_v6, %v829_v31  ;;  %v1365_v31 = vmul.f32 0.2, %v1349_v60 }
 0x433   :  { %v1944_v15 = vadd.f32 %v7758_v34, %v1914_v21  ;;  %v832_v21 = vmul.f32 0.2, %v816_v40 }
 0x434   :  { %1417 = vmax.xlane.f32.xlu1 %v8061_v44  ;;  %v8065_v0 = vadd.f32 %v4511_v56, %v1379_v11  ;;  %9473 = vst [vmem:[#allocation48_spill] sm:$0xff] %v8071_v41  ;;  %v4508_v11 = vunpack.c.h.bf16 %v7961_v47  ;;  %v4515_v47 = vunpack.c.l.bf16 %v8079_v32 }
 0x435   :  { %v1960_v37 = vmul.f32 0.2, %v1944_v15  ;;  %v848_v6 = vmax.f32 %v816_v40, %v832_v21  ;;  %v1381_v40 = vmax.f32 %v1349_v60, %v1365_v31  ;;  %v1962_v21 = vmul.f32 0.2, %v1946_v62 }
 0x436   :  { %9472 = vst [vmem:[#allocation47_spill] sm:$0xff] %v8065_v0  ;;  %1423 = vmax.xlane.f32.xlu0 %v8065_v0  ;;  %v1362_v0 = vmul.f32 0.2, %v1346_v12 }
 0x437   :  { %v1976_v5 = vmax.f32 %v1944_v15, %v1960_v37  ;;  %v2495_v30 = vpop.permute.xlu1 %2494  ;;  %v1943_v37 = vadd.f32 %v7758_v34, %v7992_v22  ;;  %v8083_v15 = vadd.f32 %v4504_v27, %v2554_v3  ;;  %v2524_v22 = vadd.f32 %v7769_v45, %v8005_v35  ;;  %v869_v27 = vpop.xlane.xlu0 %868 }
 0x438   :  { %v2525_v2 = vadd.f32 %v7769_v45, %v2495_v30  ;;  %2014 = vmax.xlane.f32.xlu1 %v8071_v41  ;;  %v1378_v44 = vmax.f32 %v1346_v12, %v1362_v0  ;;  %v899_v48 = vsub.f32 %v7775_v33, %v869_v27  ;;  %v2527_v0 = vadd.f32 %v7769_v45, %v2503_v16 }
 0x439   :  { %v8077_v20 = vadd.f32 %v4511_v56, %v1976_v5  ;;  %v8089_v5 = vadd.f32 %v4508_v11, %v845_v59  ;;  %v1959_v41 = vmul.f32 0.2, %v1943_v37  ;;  %v8100_v59 = vadd.f32 %v4515_v47, %v848_v6 }
 0x43a   :  { %v2541_v51 = vmul.f32 0.2, %v2525_v2  ;;  %v2540_v35 = vmul.f32 0.2, %v2524_v22  ;;  %v2543_v60 = vmul.f32 0.2, %v2527_v0  ;;  %v1348_v33 = vadd.f32 %v7747_v26, %v8020_v8 }
 0x43b   :  { %2020 = vmax.xlane.f32.xlu0 %v8077_v20  ;;  %v1975_v12 = vmax.f32 %v1943_v37, %v1959_v41  ;;  %v1945_v41 = vadd.f32 %v7758_v34, %v8028_v53  ;;  %v4512_v37 = vunpack.c.h.bf16 %v8046_v18  ;;  %v2526_v53 = vadd.f32 %v7769_v45, %v8032_v43 }
 0x43c   :  { %v2557_v30 = vmax.f32 %v2525_v2, %v2541_v51  ;;  %2595 = vmax.xlane.f32.xlu1 %v8083_v15  ;;  %v815_v2 = vadd.f32 %v7734_v14, %v8013_v49  ;;  %v8103_v51 = vadd.f32 %v4508_v11, %v1378_v44  ;;  %v2556_v31 = vmax.f32 %v2524_v22, %v2540_v35  ;;  %v796_v16 = vpop.permute.xlu1 %795 }
 0x43d   :  { %v8111_v6 = vadd.f32 %v4508_v11, %v1975_v12  ;;  %v1364_v27 = vmul.f32 0.2, %v1348_v33  ;;  %v2542_v12 = vmul.f32 0.2, %v2526_v53  ;;  %v817_v35 = vadd.f32 %v7734_v14, %v796_v16 }
 0x43e   :  { %v8093_v3 = vadd.f32 %v4511_v56, %v2557_v30  ;;  %v831_v49 = vmul.f32 0.2, %v815_v2  ;;  %v1978_v56 = vmax.f32 %v1946_v62, %v1962_v21  ;;  %v916_v30 = vmul.f32 1.442695, %v899_v48 }
 0x43f   :  { %v2559_v62 = vmax.f32 %v2527_v0, %v2543_v60  ;;  %v8118_v22 = vadd.f32 %v4508_v11, %v2556_v31  ;;  %v1380_v21 = vmax.f32 %v1348_v33, %v1364_v27  ;;  %v1400_v11 = vpop.xlane.xlu0 %1399  ;;  %v4516_v14 = vunpack.c.h.bf16 %v8079_v32 }
 0x440   :  { %9474 = vst [vmem:[#allocation49_spill] sm:$0xff] %v8093_v3  ;;  %888 = vmax.xlane.f32.xlu1 %v8089_v5  ;;  %2601 = vmax.xlane.f32.xlu0 %v8093_v3  ;;  %v8107_v3 = vadd.f32 %v4515_v47, %v1381_v40  ;;  %v847_v44 = vmax.f32 %v815_v2, %v831_v49  ;;  %6697 = vpow2.f32 %v916_v30  ;;  %v1961_v2 = vmul.f32 0.2, %v1945_v41 }
 0x441   :  { %v8120_v40 = vadd.f32 %v4515_v47, %v1978_v56  ;;  %v8128_v48 = vadd.f32 %v4515_v47, %v2559_v62  ;;  %v1329_v18 = vpop.permute.xlu1 %1328  ;;  %v8133_v49 = vadd.f32 %v4512_v37, %v1380_v21  ;;  %v2558_v47 = vmax.f32 %v2526_v53, %v2542_v12 }
 0x442   :  { %v8124_v8 = vadd.f32 %v4512_v37, %v847_v44  ;;  %v1977_v0 = vmax.f32 %v1945_v41, %v1961_v2  ;;  %v833_v30 = vmul.f32 0.2, %v817_v35  ;;  %v1350_v60 = vadd.f32 %v7747_v26, %v1329_v18 }
 0x443   :  { %v1997_v33 = vpop.xlane.xlu0 %1996  ;;  %v8145_v62 = vadd.f32 %v4512_v37, %v2558_v47 }
 0x444   :  { %1421 = vmax.xlane.f32.xlu1 %v8103_v51  ;;  %894 = vmax.xlane.f32.xlu0 %v8100_v59  ;;  %v8140_v31 = vadd.f32 %v4512_v37, %v1977_v0  ;;  %v849_v44 = vmax.f32 %v817_v35, %v833_v30  ;;  %v1366_v41 = vmul.f32 0.2, %v1350_v60 }
 0x446   :  { %v1926_v43 = vpop.permute.xlu1 %1925  ;;  %9476 = vst [vmem:[#allocation51_spill] sm:$0xff] %v8140_v31  ;;  %v1382_v21 = vmax.f32 %v1350_v60, %v1366_v41  ;;  %v8149_v18 = vadd.f32 %v4516_v14, %v849_v44 }
 0x447   :  { %v1947_v16 = vadd.f32 %v7758_v34, %v1926_v43  ;;  %v2578_v2 = vpop.xlane.xlu0 %2577 }
 0x448   :  { %2018 = vmax.xlane.f32.xlu1 %v8111_v6  ;;  %1427 = vmax.xlane.f32.xlu0 %v8107_v3  ;;  %v8152_v12 = vadd.f32 %v4516_v14, %v1382_v21  ;;  %v1431_v21 = vsub.f32 %v7784_v55, %v1400_v11 }
 0x449   :  { %v1963_v53 = vmul.f32 0.2, %v1947_v16 }
 0x44a   :  { %v8135_v56 = vpop.eup %6697 }
 0x44b   :  { %9475 = vst [vmem:[#allocation50_spill] sm:$0xff] %v8135_v56  ;;  %v2507_v27 = vpop.permute.xlu1 %2506  ;;  %v1979_v0 = vmax.f32 %v1947_v16, %v1963_v53  ;;  %v8154_v35 = vpop.xlane.xlu0 %870 }
 0x44c   :  { %2599 = vmax.xlane.f32.xlu1 %v8118_v22  ;;  %2024 = vmax.xlane.f32.xlu0 %v8120_v40  ;;  %v2528_v26 = vadd.f32 %v7769_v45, %v2507_v27 }
 0x44d   :  { %v8157_v37 = vadd.f32 %v4516_v14, %v1979_v0  ;;  %v1447_v0 = vmul.f32 1.442695, %v1431_v21 }
 0x44e   :  { %v2544_v32 = vmul.f32 0.2, %v2528_v26 }
 0x44f   :  { %v8160_v43 = vpop.xlane.xlu0 %1403 }
 0x450   :  { %892 = vmax.xlane.f32.xlu1 %v8124_v8  ;;  %2605 = vmax.xlane.f32.xlu0 %v8128_v48  ;;  %v2560_v34 = vmax.f32 %v2528_v26, %v2544_v32 }
 0x452   :  { %v8162_v45 = vadd.f32 %v4516_v14, %v2560_v34 }
 0x453   :  { %v2001_v47 = vpop.xlane.xlu0 %2000 }
 0x454   :  { %1425 = vmax.xlane.f32.xlu1 %v8133_v49  ;;  %948 = vadd.xlane.f32.xlu0 %v8135_v56 }
 0x457   :  { %v8165_v30 = vpop.xlane.xlu0 %2581 }
 0x458   :  { %2022 = vmax.xlane.f32.xlu1 %v8140_v31 }
 0x45b   :  { %v8167_v60 = vpop.xlane.xlu0 %874 }
 0x45c   :  { %2603 = vmax.xlane.f32.xlu1 %v8145_v62 }
 0x45f   :  { %v8170_v16 = vpop.xlane.xlu0 %1407 }
 0x460   :  { %896 = vmax.xlane.f32.xlu1 %v8149_v18 }
 0x464   :  { %1429 = vmax.xlane.f32.xlu1 %v8152_v12  ;;  %v8174_v32 = vpop.xlane.xlu0 %2004 }
 0x468   :  { %2026 = vmax.xlane.f32.xlu1 %v8157_v37 }
 0x469   :  { %v8179_v11 = vpop.xlane.xlu0 %2585 }
 0x46c   :  { %2607 = vmax.xlane.f32.xlu1 %v8162_v45 }
 0x47d   :  { %v1402_v44 = vpop.xlane.xlu1 %1401 }
 0x47e   :  { %v1432_v41 = vsub.f32 %v7901_v61, %v1402_v44  ;;  %v2028_v44 = vsub.f32 %v7791_v63, %v1997_v33 }
 0x480   :  { %v1449_v27 = vmul.f32 1.442695, %v1432_v41  ;;  %v2044_v21 = vmul.f32 1.442695, %v2028_v44 }
 0x481   :  { %v1999_v53 = vpop.xlane.xlu1 %1998 }
 0x482   :  { %6699 = vpow2.f32 %v1449_v27  ;;  %v2029_v14 = vsub.f32 %v7911_v19, %v1999_v53  ;;  %v2609_v53 = vsub.f32 %v7803_v36, %v2578_v2 }
 0x484   :  { %v2046_v26 = vmul.f32 1.442695, %v2029_v14 }
 0x485   :  { %v2580_v34 = vpop.xlane.xlu1 %2579 }
 0x486   :  { %6701 = vpow2.f32 %v2046_v26  ;;  %v2610_v56 = vsub.f32 %v7919_v4, %v2580_v34 }
 0x487   :  { %6703 = vpow2.f32 %v1447_v0 }
 0x488   :  { %v2627_v31 = vmul.f32 1.442695, %v2610_v56  ;;  %v8187_v56 = vpop.xlane.xlu0 %878 }
 0x489   :  { %v867_v61 = vpop.xlane.xlu1 %866 }
 0x48a   :  { %6705 = vpow2.f32 %v2627_v31  ;;  %v898_v55 = vsub.f32 %v7930_v13, %v867_v61  ;;  %v2625_v13 = vmul.f32 1.442695, %v2609_v53  ;;  %v2030_v61 = vsub.f32 %v7823_v57, %v2001_v47 }
 0x48c   :  { %v8181_v41 = vpop.eup %6699  ;;  %v914_v19 = vmul.f32 1.442695, %v898_v55  ;;  %v8198_v0 = vpop.xlane.xlu0 %1411  ;;  %v2048_v53 = vmul.f32 1.442695, %v2030_v61 }
 0x48d   :  { %1481 = vadd.xlane.f32.xlu1 %v8181_v41  ;;  %v873_v27 = vpop.xlane.xlu1 %872 }
 0x48e   :  { %6707 = vpow2.f32 %v914_v19  ;;  %v901_v31 = vsub.f32 %v7936_v39, %v873_v27 }
 0x48f   :  { %6709 = vpow2.f32 %v2044_v21  ;;  %v900_v21 = vsub.f32 %v7810_v46, %v8154_v35 }
 0x490   :  { %v8185_v4 = vpop.eup %6701  ;;  %6711 = vpow2.f32 %v2625_v13  ;;  %v920_v2 = vmul.f32 1.442695, %v901_v31  ;;  %v1433_v31 = vsub.f32 %v7816_v25, %v8160_v43 }
 0x491   :  { %v1406_v63 = vpop.xlane.xlu1 %1405  ;;  %2078 = vadd.xlane.f32.xlu0 %v8185_v4  ;;  %v8191_v33 = vpop.eup %6703 }
 0x492   :  { %v1434_v26 = vsub.f32 %v7945_v28, %v1406_v63  ;;  %6713 = vpow2.f32 %v920_v2  ;;  %v8210_v63 = vpop.xlane.xlu0 %2008  ;;  %v2611_v2 = vsub.f32 %v7828_v58, %v8165_v30 }
 0x494   :  { %v8193_v14 = vpop.eup %6705  ;;  %v1453_v39 = vmul.f32 1.442695, %v1434_v26 }
 0x495   :  { %2659 = vadd.xlane.f32.xlu1 %v8193_v14  ;;  %v2003_v36 = vpop.xlane.xlu1 %2002  ;;  %1479 = vadd.xlane.f32.xlu0 %v8191_v33 }
 0x496   :  { %v2031_v28 = vsub.f32 %v7955_v24, %v2003_v36  ;;  %6715 = vpow2.f32 %v1453_v39  ;;  %v918_v24 = vmul.f32 1.442695, %v900_v21  ;;  %v8219_v35 = vpop.xlane.xlu0 %2589  ;;  %v1451_v39 = vmul.f32 1.442695, %v1433_v31 }
 0x498   :  { %v8200_v34 = vpop.eup %6707  ;;  %v2050_v47 = vmul.f32 1.442695, %v2031_v28  ;;  %v902_v28 = vsub.f32 %v7847_v52, %v8167_v60  ;;  %v1435_v52 = vsub.f32 %v7853_v23, %v8170_v16  ;;  %v2032_v23 = vsub.f32 %v7858_v29, %v8174_v32 }
 0x499   :  { %946 = vadd.xlane.f32.xlu1 %v8200_v34  ;;  %v2584_v44 = vpop.xlane.xlu1 %2583  ;;  %v8206_v19 = vpop.eup %6709 }
 0x49a   :  { %v2612_v55 = vsub.f32 %v7969_v50, %v2584_v44  ;;  %v8213_v13 = vpop.eup %6711  ;;  %v8228_v25 = vpop.xlane.xlu0 %882  ;;  %v1455_v31 = vmul.f32 1.442695, %v1435_v52 }
 0x49c   :  { %v2631_v27 = vmul.f32 1.442695, %v2612_v55  ;;  %v8221_v26 = vpop.eup %6713 }
 0x49d   :  { %v877_v57 = vpop.xlane.xlu1 %876  ;;  %2076 = vadd.xlane.f32.xlu1 %v8206_v19 }
 0x49e   :  { %6717 = vpow2.f32 %v2631_v27  ;;  %v903_v58 = vsub.f32 %v7979_v17, %v877_v57  ;;  %v8244_v60 = vpop.xlane.xlu0 %1415 }
 0x49f   :  { %6719 = vpow2.f32 %v2048_v53 }
 0x4a0   :  { %6721 = vpow2.f32 %v2050_v47  ;;  %v8226_v44 = vpop.eup %6715  ;;  %v922_v47 = vmul.f32 1.442695, %v902_v28  ;;  %v924_v17 = vmul.f32 1.442695, %v903_v58 }
 0x4a1   :  { %v1410_v50 = vpop.xlane.xlu1 %1409  ;;  %2657 = vadd.xlane.f32.xlu1 %v8213_v13  ;;  %6723 = vpow2.f32 %v918_v24 }
 0x4a2   :  { %v1436_v46 = vsub.f32 %v7990_v10, %v1410_v50  ;;  %v2629_v10 = vmul.f32 1.442695, %v2611_v2 }
 0x4a4   :  { %v1457_v36 = vmul.f32 1.442695, %v1436_v46 }
 0x4a5   :  { %v2007_v61 = vpop.xlane.xlu1 %2006  ;;  %952 = vadd.xlane.f32.xlu1 %v8221_v26 }
 0x4a6   :  { %6725 = vpow2.f32 %v1457_v36 }
 0x4a7   :  { %6727 = vpow2.f32 %v1451_v39  ;;  %v2613_v39 = vsub.f32 %v7868_v42, %v8179_v11  ;;  %v9480_v11 = vld [vmem:[#allocation43_spill] sm:$0xff] }
 0x4a8   :  { %v8230_v43 = vpop.eup %6717  ;;  %6729 = vpow2.f32 %v2629_v10 }
 0x4a9   :  { %9477 = vst [vmem:[#allocation52_spill] sm:$0xff] %v8230_v43  ;;  %v2588_v55 = vpop.xlane.xlu1 %2587  ;;  %2663 = vadd.xlane.f32.xlu0 %v8230_v43  ;;  %1485 = vadd.xlane.f32.xlu1 %v8226_v44  ;;  %v8238_v27 = vpop.eup %6719 }
 0x4aa   :  { %v2614_v30 = vsub.f32 %v8011_v7, %v2588_v55  ;;  %v8240_v21 = vpop.eup %6721  ;;  %v2033_v7 = vsub.f32 %v8000_v9, %v2007_v61  ;;  %v8258_v9 = vpop.xlane.xlu0 %2012  ;;  %v2052_v61 = vmul.f32 1.442695, %v2032_v23 }
 0x4ab   :  { %v8249_v57 = vpop.eup %6723 }
 0x4ac   :  { %v2635_v53 = vmul.f32 1.442695, %v2614_v30  ;;  %v2054_v46 = vmul.f32 1.442695, %v2033_v7 }
 0x4ad   :  { %v881_v24 = vpop.xlane.xlu1 %880  ;;  %2082 = vadd.xlane.f32.xlu1 %v8240_v21  ;;  %2080 = vadd.xlane.f32.xlu0 %v8238_v27 }
 0x4ae   :  { %6731 = vpow2.f32 %v2635_v53  ;;  %v905_v36 = vsub.f32 %v8023_v1, %v881_v24  ;;  %v2633_v1 = vmul.f32 1.442695, %v2613_v39  ;;  %v8270_v58 = vpop.xlane.xlu0 %2593  ;;  %v9481_v24 = vld [vmem:[#allocation31_spill] sm:$0xff] }
 0x4af   :  { %6733 = vpow2.f32 %v922_v47 }
 0x4b0   :  { %v8251_v50 = vpop.eup %6725  ;;  %6735 = vpow2.f32 %v924_v17  ;;  %v928_v29 = vmul.f32 1.442695, %v905_v36  ;;  %v904_v17 = vsub.f32 %v9481_v24, %v8187_v56  ;;  %v9484_v56 = vld [vmem:[#allocation32_spill] sm:$0xff] }
 0x4b1   :  { %v1414_v16 = vpop.xlane.xlu1 %1413  ;;  %950 = vadd.xlane.f32.xlu1 %v8249_v57  ;;  %1489 = vadd.xlane.f32.xlu0 %v8251_v50  ;;  %v8260_v2 = vpop.eup %6727  ;;  %6737 = vpow2.f32 %v1455_v31 }
 0x4b2   :  { %6739 = vpow2.f32 %v2054_v46  ;;  %v1438_v32 = vsub.f32 %v8030_v38, %v1414_v16  ;;  %v8266_v28 = vpop.eup %6729  ;;  %v8288_v36 = vpop.xlane.xlu0 %886  ;;  %v926_v39 = vmul.f32 1.442695, %v904_v17 }
 0x4b3   :  { %9478 = vst [vmem:[#allocation53_spill] sm:$0xff] %v8266_v28  ;;  %6741 = vpow2.f32 %v2052_v61 }
 0x4b4   :  { %6743 = vpow2.f32 %v928_v29  ;;  %v1461_v42 = vmul.f32 1.442695, %v1438_v32 }
 0x4b5   :  { %v2011_v10 = vpop.xlane.xlu1 %2010  ;;  %1483 = vadd.xlane.f32.xlu1 %v8260_v2  ;;  %6745 = vpow2.f32 %v2633_v1 }
 0x4b6   :  { %v2035_v30 = vsub.f32 %v8037_v54, %v2011_v10  ;;  %v9482_v54 = vld [vmem:[#allocation34_spill] sm:$0xff]  ;;  %6747 = vpow2.f32 %v1461_v42  ;;  %v1437_v10 = vsub.f32 %v9484_v56, %v8198_v0  ;;  %v1420_v0 = vpop.xlane.xlu0 %1419 }
 0x4b7   :  { %v2615_v23 = vsub.f32 %v9482_v54, %v8219_v35  ;;  %v9485_v35 = vld [vmem:[#allocation44_spill] sm:$0xff] }
 0x4b8   :  { %v8268_v55 = vpop.eup %6731  ;;  %v2058_v7 = vmul.f32 1.442695, %v2035_v30  ;;  %v1459_v42 = vmul.f32 1.442695, %v1437_v10 }
 0x4b9   :  { %9479 = vst [vmem:[#allocation54_spill] sm:$0xff] %v8268_v55  ;;  %v2592_v53 = vpop.xlane.xlu1 %2591  ;;  %2667 = vadd.xlane.f32.xlu0 %v8268_v55  ;;  %2661 = vadd.xlane.f32.xlu1 %v8266_v28  ;;  %v8276_v38 = vpop.eup %6733  ;;  %v2637_v32 = vmul.f32 1.442695, %v2615_v23 }
 0x4ba   :  { %v2616_v47 = vsub.f32 %v9480_v11, %v2592_v53  ;;  %v8278_v52 = vpop.eup %6735  ;;  %6749 = vpow2.f32 %v2058_v7  ;;  %v9487_v11 = vld [vmem:[#allocation33_spill] sm:$0xff]  ;;  %v9488_v7 = vld [vmem:[#allocation48_spill] sm:$0xff] }
 0x4bb   :  { %v8286_v46 = vpop.eup %6737 }
 0x4bc   :  { %v2639_v16 = vmul.f32 1.442695, %v2616_v47  ;;  %v8290_v61 = vpop.eup %6739  ;;  %v2034_v47 = vsub.f32 %v9487_v11, %v8210_v63 }
 0x4bd   :  { %v885_v31 = vpop.xlane.xlu1 %884  ;;  %956 = vadd.xlane.f32.xlu1 %v8278_v52  ;;  %954 = vadd.xlane.f32.xlu0 %v8276_v38  ;;  %9483 = vst [vmem:[#allocation43_spill] sm:$0xff] %v8290_v61  ;;  %v8297_v30 = vpop.eup %6741 }
 0x4be   :  { %6751 = vpow2.f32 %v2639_v16  ;;  %v907_v1 = vsub.f32 %v9485_v35, %v885_v31  ;;  %9486 = vst [vmem:[#allocation31_spill] sm:$0xff] %v8297_v30  ;;  %v8299_v53 = vpop.eup %6743  ;;  %v2056_v16 = vmul.f32 1.442695, %v2034_v47 }
 0x4bf   :  { %6753 = vpow2.f32 %v926_v39  ;;  %v8306_v31 = vpop.eup %6745  ;;  %v9490_v39 = vld [vmem:[#allocation46_spill] sm:$0xff] }
 0x4c0   :  { %6755 = vpow2.f32 %v2637_v32  ;;  %v932_v17 = vmul.f32 1.442695, %v907_v1  ;;  %9489 = vst [vmem:[#allocation34_spill] sm:$0xff] %v8306_v31  ;;  %v8308_v23 = vpop.eup %6747  ;;  %v8315_v32 = vpop.xlane.xlu0 %2016 }
 0x4c1   :  { %v1418_v29 = vpop.xlane.xlu1 %1417  ;;  %2086 = vadd.xlane.f32.xlu1 %v8290_v61  ;;  %1487 = vadd.xlane.f32.xlu0 %v8286_v46  ;;  %6757 = vpow2.f32 %v1459_v42 }
 0x4c2   :  { %v1440_v56 = vsub.f32 %v9490_v39, %v1418_v29  ;;  %6759 = vpow2.f32 %v932_v17 }
 0x4c3   :  { %6761 = vpow2.f32 %v2056_v16 }
 0x4c4   :  { %v8313_v35 = vpop.eup %6749  ;;  %v1465_v11 = vmul.f32 1.442695, %v1440_v56  ;;  %v8329_v16 = vpop.xlane.xlu0 %2597 }
 0x4c5   :  { %v2015_v24 = vpop.xlane.xlu1 %2014  ;;  %960 = vadd.xlane.f32.xlu1 %v8299_v53  ;;  %2084 = vadd.xlane.f32.xlu0 %v8297_v30  ;;  %9491 = vst [vmem:[#allocation32_spill] sm:$0xff] %v8313_v35 }
 0x4c6   :  { %v2037_v54 = vsub.f32 %v9488_v7, %v2015_v24 }
 0x4c8   :  { %v2062_v63 = vmul.f32 1.442695, %v2037_v54  ;;  %v8317_v1 = vpop.eup %6751  ;;  %v9494_v54 = vld [vmem:[#allocation35_spill] sm:$0xff] }
 0x4c9   :  { %v2596_v10 = vpop.xlane.xlu1 %2595  ;;  %1493 = vadd.xlane.f32.xlu1 %v8308_v23  ;;  %2665 = vadd.xlane.f32.xlu0 %v8306_v31  ;;  %9492 = vst [vmem:[#allocation44_spill] sm:$0xff] %v8317_v1  ;;  %v8323_v24 = vpop.eup %6753  ;;  %v906_v39 = vsub.f32 %v9494_v54, %v8228_v25 }
 0x4ca   :  { %v2618_v42 = vsub.f32 %v8083_v15, %v2596_v10  ;;  %6763 = vpow2.f32 %v2062_v63  ;;  %v8325_v17 = vpop.eup %6755  ;;  %v9495_v10 = vld [vmem:[#allocation40_spill] sm:$0xff]  ;;  %v891_v54 = vpop.xlane.xlu0 %890 }
 0x4cb   :  { %9493 = vst [vmem:[#allocation33_spill] sm:$0xff] %v8325_v17  ;;  %6765 = vpow2.f32 %v1465_v11  ;;  %v1441_v63 = vsub.f32 %v9495_v10, %v1420_v0  ;;  %v930_v25 = vmul.f32 1.442695, %v906_v39  ;;  %v9499_v39 = vld [vmem:[#allocation37_spill] sm:$0xff] }
 0x4cc   :  { %v2643_v15 = vmul.f32 1.442695, %v2618_v42  ;;  %v9496_v42 = vld [vmem:[#allocation36_spill] sm:$0xff]  ;;  %v2036_v10 = vsub.f32 %v9499_v39, %v8258_v9  ;;  %v9500_v9 = vld [vmem:[#allocation38_spill] sm:$0xff] }
 0x4cd   :  { %v889_v47 = vpop.xlane.xlu1 %888  ;;  %2671 = vadd.xlane.f32.xlu1 %v8317_v1  ;;  %2090 = vadd.xlane.f32.xlu0 %v8313_v35  ;;  %v1439_v0 = vsub.f32 %v9496_v42, %v8244_v60 }
 0x4ce   :  { %v909_v29 = vsub.f32 %v8089_v5, %v889_v47  ;;  %v8335_v47 = vpop.eup %6757  ;;  %v1424_v60 = vpop.xlane.xlu0 %1423 }
 0x4d0   :  { %v936_v7 = vmul.f32 1.442695, %v909_v29  ;;  %v8337_v29 = vpop.eup %6759 }
 0x4d1   :  { %v1422_v56 = vpop.xlane.xlu1 %1421  ;;  %958 = vadd.xlane.f32.xlu1 %v8323_v24  ;;  %2669 = vadd.xlane.f32.xlu0 %v8325_v17 }
 0x4d2   :  { %6767 = vpow2.f32 %v936_v7  ;;  %v1442_v5 = vsub.f32 %v8103_v51, %v1422_v56  ;;  %v1467_v7 = vmul.f32 1.442695, %v1441_v63  ;;  %v8345_v51 = vpop.eup %6761  ;;  %v2060_v63 = vmul.f32 1.442695, %v2036_v10  ;;  %v8368_v55 = vpop.xlane.xlu0 %2020 }
 0x4d3   :  { %6769 = vpow2.f32 %v2643_v15  ;;  %9497 = vst [vmem:[#allocation48_spill] sm:$0xff] %v8345_v51 }
 0x4d4   :  { %v1469_v1 = vmul.f32 1.442695, %v1442_v5  ;;  %v8347_v56 = vpop.eup %6763  ;;  %v1463_v5 = vmul.f32 1.442695, %v1439_v0 }
 0x4d5   :  { %v8339_v11 = vpop.xlane.xlu1 %2018  ;;  %1491 = vadd.xlane.f32.xlu1 %v8335_v47  ;;  %964 = vadd.xlane.f32.xlu0 %v8337_v29  ;;  %9498 = vst [vmem:[#allocation46_spill] sm:$0xff] %v8347_v56  ;;  %v8355_v17 = vpop.eup %6765 }
 0x4d6   :  { %6771 = vpow2.f32 %v1469_v1 }
 0x4d7   :  { %6773 = vpow2.f32 %v930_v25  ;;  %v2617_v25 = vsub.f32 %v9500_v9, %v8270_v58 }
 0x4d8   :  { %6775 = vpow2.f32 %v1467_v7 }
 0x4d9   :  { %v8351_v15 = vpop.xlane.xlu1 %2599  ;;  %2088 = vadd.xlane.f32.xlu1 %v8345_v51  ;;  %2094 = vadd.xlane.f32.xlu0 %v8347_v56  ;;  %6777 = vpow2.f32 %v1463_v5  ;;  %v2641_v35 = vmul.f32 1.442695, %v2617_v25  ;;  %v9502_v5 = vld [vmem:[#allocation39_spill] sm:$0xff] }
 0x4da   :  { %6779 = vpow2.f32 %v2060_v63  ;;  %v908_v31 = vsub.f32 %v9502_v5, %v8288_v36 }
 0x4dc   :  { %v8357_v1 = vpop.eup %6767  ;;  %v934_v63 = vmul.f32 1.442695, %v908_v31 }
 0x4dd   :  { %v893_v42 = vpop.xlane.xlu1 %892  ;;  %1497 = vadd.xlane.f32.xlu1 %v8355_v17  ;;  %968 = vadd.xlane.f32.xlu0 %v8357_v1  ;;  %v8364_v56 = vpop.eup %6769 }
 0x4de   :  { %v911_v39 = vsub.f32 %v8124_v8, %v893_v42  ;;  %9501 = vst [vmem:[#allocation35_spill] sm:$0xff] %v8364_v56 }
 0x4e0   :  { %v8366_v0 = vpop.eup %6771  ;;  %v940_v7 = vmul.f32 1.442695, %v911_v39  ;;  %v8383_v39 = vpop.xlane.xlu0 %2601 }
 0x4e1   :  { %v1426_v10 = vpop.xlane.xlu1 %1425  ;;  %2675 = vadd.xlane.f32.xlu1 %v8364_v56  ;;  %1501 = vadd.xlane.f32.xlu0 %v8366_v0  ;;  %v8374_v58 = vpop.eup %6773 }
 0x4e2   :  { %6781 = vpow2.f32 %v940_v7  ;;  %v8376_v8 = vpop.eup %6775  ;;  %v1444_v9 = vsub.f32 %v8133_v49, %v1426_v10  ;;  %v9503_v7 = vld [vmem:[#allocation45_spill] sm:$0xff] }
 0x4e3   :  { %6783 = vpow2.f32 %v2641_v35  ;;  %v8385_v25 = vpop.eup %6777  ;;  %v910_v5 = vsub.f32 %v9503_v7, %v891_v54  ;;  %v9505_v35 = vld [vmem:[#allocation47_spill] sm:$0xff] }
 0x4e4   :  { %6785 = vpow2.f32 %v934_v63  ;;  %v1473_v56 = vmul.f32 1.442695, %v1444_v9  ;;  %v8391_v51 = vpop.eup %6779  ;;  %v1443_v31 = vsub.f32 %v9505_v35, %v1424_v60  ;;  %v895_v61 = vpop.xlane.xlu0 %894 }
 0x4e5   :  { %v8378_v42 = vpop.xlane.xlu1 %2022  ;;  %962 = vadd.xlane.f32.xlu1 %v8374_v58  ;;  %1499 = vadd.xlane.f32.xlu0 %v8376_v8  ;;  %9504 = vst [vmem:[#allocation40_spill] sm:$0xff] %v8391_v51  ;;  %v938_v10 = vmul.f32 1.442695, %v910_v5  ;;  %v912_v54 = vsub.f32 %v8100_v59, %v895_v61 }
 0x4e6   :  { %6787 = vpow2.f32 %v1473_v56  ;;  %v1471_v63 = vmul.f32 1.442695, %v1443_v31  ;;  %v2039_v56 = vsub.f32 %v8111_v6, %v8339_v11 }
 0x4e7   :  { %6789 = vpow2.f32 %v938_v10  ;;  %v942_v5 = vmul.f32 1.442695, %v912_v54  ;;  %v9508_v10 = vld [vmem:[#allocation42_spill] sm:$0xff] }
 0x4e8   :  { %v1428_v35 = vpop.xlane.xlu0 %1427  ;;  %6791 = vpow2.f32 %v1471_v63  ;;  %v2619_v63 = vsub.f32 %v9508_v10, %v8329_v16  ;;  %v2040_v16 = vsub.f32 %v8077_v20, %v8368_v55 }
 0x4e9   :  { %v8387_v36 = vpop.xlane.xlu1 %2603  ;;  %1495 = vadd.xlane.f32.xlu1 %v8385_v25  ;;  %v1445_v59 = vsub.f32 %v8107_v3, %v1428_v35 }
 0x4ea   :  { %v2645_v3 = vmul.f32 1.442695, %v2619_v63  ;;  %v2622_v55 = vsub.f32 %v8145_v62, %v8387_v36 }
 0x4eb   :  { %v1475_v54 = vmul.f32 1.442695, %v1445_v59 }
 0x4ec   :  { %v8393_v43 = vpop.eup %6781 }
 0x4ed   :  { %v897_v49 = vpop.xlane.xlu1 %896  ;;  %2092 = vadd.xlane.f32.xlu1 %v8391_v51  ;;  %972 = vadd.xlane.f32.xlu0 %v8393_v43  ;;  %v8398_v28 = vpop.eup %6783 }
 0x4ee   :  { %9506 = vst [vmem:[#allocation36_spill] sm:$0xff] %v8398_v28  ;;  %v913_v7 = vsub.f32 %v8149_v18, %v897_v49  ;;  %v8404_v30 = vpop.eup %6785  ;;  %v9507_v18 = vld [vmem:[#allocation41_spill] sm:$0xff]  ;;  %v2066_v49 = vmul.f32 1.442695, %v2039_v56 }
 0x4f0   :  { %v944_v61 = vmul.f32 1.442695, %v913_v7  ;;  %v8410_v31 = vpop.eup %6787 }
 0x4f1   :  { %v1430_v9 = vpop.xlane.xlu1 %1429  ;;  %2673 = vadd.xlane.f32.xlu1 %v8398_v28  ;;  %v8417_v6 = vpop.eup %6789  ;;  %v9535_v28 = vld [vmem:[#allocation26_spill] sm:$0xff] }
 0x4f2   :  { %v1446_v60 = vsub.f32 %v8152_v12, %v1430_v9  ;;  %v2038_v12 = vsub.f32 %v9507_v18, %v8315_v32  ;;  %v2620_v32 = vsub.f32 %v8118_v22, %v8351_v15  ;;  %v2068_v22 = vmul.f32 1.442695, %v2040_v16  ;;  %v9509_v15 = vld [vmem:[#allocation49_spill] sm:$0xff] }
 0x4f4   :  { %v1477_v51 = vmul.f32 1.442695, %v1446_v60  ;;  %v2064_v11 = vmul.f32 1.442695, %v2038_v12  ;;  %v2647_v7 = vmul.f32 1.442695, %v2620_v32 }
 0x4f5   :  { %966 = vadd.xlane.f32.xlu1 %v8404_v30  ;;  %v2027_v18 = vpop.xlane.xlu1 %2026 }
 0x4f6   :  { %6793 = vpow2.f32 %v1477_v51  ;;  %v8422_v51 = vpop.eup %6791  ;;  %v2043_v10 = vsub.f32 %v8157_v37, %v2027_v18 }
 0x4f7   :  { %6795 = vpow2.f32 %v942_v5  ;;  %v2621_v5 = vsub.f32 %v9509_v15, %v8383_v39  ;;  %v2025_v39 = vpop.xlane.xlu0 %2024 }
 0x4f8   :  { %6797 = vpow2.f32 %v944_v61  ;;  %v2042_v62 = vsub.f32 %v8120_v40, %v2025_v39  ;;  %v2074_v36 = vmul.f32 1.442695, %v2043_v10 }
 0x4f9   :  { %1505 = vadd.xlane.f32.xlu1 %v8410_v31  ;;  %6799 = vpow2.f32 %v2066_v49  ;;  %v2649_v20 = vmul.f32 1.442695, %v2621_v5  ;;  %v2651_v49 = vmul.f32 1.442695, %v2622_v55  ;;  %v2608_v16 = vpop.xlane.xlu1 %2607 }
 0x4fa   :  { %6801 = vpow2.f32 %v1475_v54  ;;  %v2624_v40 = vsub.f32 %v8162_v45, %v2608_v16  ;;  %v9521_v16 = vld [vmem:[#allocation17_spill] sm:$0xff] }
 0x4fb   :  { %6803 = vpow2.f32 %v2064_v11  ;;  %v2606_v54 = vpop.xlane.xlu0 %2605 }
 0x4fc   :  { %6805 = vpow2.f32 %v2645_v3  ;;  %v2072_v3 = vmul.f32 1.442695, %v2042_v62  ;;  %v2623_v32 = vsub.f32 %v8128_v48, %v2606_v54  ;;  %v2655_v5 = vmul.f32 1.442695, %v2624_v40  ;;  %v9516_v48 = vld [vmem:[#allocation15_spill] sm:$0xff] }
 0x4fd   :  { %970 = vadd.xlane.f32.xlu1 %v8417_v6  ;;  %6807 = vpow2.f32 %v2647_v7  ;;  %v6297_v40 = vunpack.i.l.bf16 %v9521_v16 }
 0x4fe   :  { %6809 = vpow2.f32 %v2068_v22  ;;  %v2653_v37 = vmul.f32 1.442695, %v2623_v32 }
 0x4ff   :  { %6811 = vpow2.f32 %v2649_v20  ;;  %v949_v22 = vpop.xlane.xlu0 %948 }
 0x500   :  { %v8424_v9 = vpop.eup %6793  ;;  %6813 = vpow2.f32 %v2651_v49 }
 0x501   :  { %1509 = vadd.xlane.f32.xlu0 %v8424_v9  ;;  %1503 = vadd.xlane.f32.xlu1 %v8422_v51  ;;  %v8430_v60 = vpop.eup %6795  ;;  %6815 = vpow2.f32 %v2074_v36 }
 0x502   :  { %v8432_v35 = vpop.eup %6797  ;;  %6817 = vpow2.f32 %v2072_v3 }
 0x503   :  { %v8438_v56 = vpop.eup %6799  ;;  %6819 = vpow2.f32 %v2653_v37  ;;  %v6298_v37 = vunpack.i.h.bf16 %v9521_v16 }
 0x504   :  { %9510 = vst [vmem:[#allocation37_spill] sm:$0xff] %v8438_v56  ;;  %v8440_v59 = vpop.eup %6801  ;;  %6821 = vpow2.f32 %v2655_v5 }
 0x505   :  { %976 = vadd.xlane.f32.xlu1 %v8432_v35  ;;  %974 = vadd.xlane.f32.xlu0 %v8430_v60  ;;  %v8446_v61 = vpop.eup %6803  ;;  %v5991_v16 = vpack.c.bf16 %v6298_v37, %v6297_v40 }
 0x506   :  { %v8448_v12 = vpop.eup %6805 }
 0x507   :  { %9511 = vst [vmem:[#allocation38_spill] sm:$0xff] %v8448_v12  ;;  %v8453_v63 = vpop.eup %6807 }
 0x508   :  { %9512 = vst [vmem:[#allocation39_spill] sm:$0xff] %v8453_v63  ;;  %v8457_v11 = vpop.eup %6809 }
 0x509   :  { %2098 = vadd.xlane.f32.xlu1 %v8438_v56  ;;  %1507 = vadd.xlane.f32.xlu0 %v8440_v59  ;;  %9513 = vst [vmem:[#allocation45_spill] sm:$0xff] %v8457_v11  ;;  %v8461_v7 = vpop.eup %6811 }
 0x50a   :  { %9514 = vst [vmem:[#allocation47_spill] sm:$0xff] %v8461_v7  ;;  %v8465_v15 = vpop.eup %6813 }
 0x50b   :  { %9515 = vst [vmem:[#allocation41_spill] sm:$0xff] %v8465_v15  ;;  %v8472_v18 = vpop.eup %6815 }
 0x50c   :  { %9517 = vst [vmem:[#allocation42_spill] sm:$0xff] %v8472_v18  ;;  %v8479_v49 = vpop.eup %6817 }
 0x50d   :  { %2677 = vadd.xlane.f32.xlu1 %v8448_v12  ;;  %2096 = vadd.xlane.f32.xlu0 %v8446_v61  ;;  %9518 = vst [vmem:[#allocation49_spill] sm:$0xff] %v8479_v49  ;;  %v8482_v62 = vpop.eup %6819  ;;  %v9525_v12 = vld [vmem:[#allocation27_spill] sm:$0xff] }
 0x50e   :  { %9519 = vst [vmem:[#allocation15_spill] sm:$0xff] %v8482_v62  ;;  %v8487_v54 = vpop.eup %6821 }
 0x50f   :  { %9520 = vst [vmem:[#allocation55_spill] sm:$0xff] %v8487_v54 }
 0x511   :  { %2679 = vadd.xlane.f32.xlu0 %v8453_v63 }
 0x515   :  { %2100 = vadd.xlane.f32.xlu0 %v8457_v11 }
 0x519   :  { %2681 = vadd.xlane.f32.xlu0 %v8461_v7 }
 0x51a   :  { %v1482_v20 = vpop.xlane.xlu1 %1481 }
 0x51b   :  { %6823 = vrcp.f32 %v1482_v20 }
 0x51d   :  { %2683 = vadd.xlane.f32.xlu0 %v8465_v15 }
 0x51e   :  { %6443 = vrot.lane.b32.xlu1 %v9516_v48, %s7227_s20  ;;  %v8470_v55 = vpop.xlane.xlu0 %2078 }
 0x521   :  { %2106 = vadd.xlane.f32.xlu0 %v8472_v18 }
 0x522   :  { %v8475_v39 = vpop.xlane.xlu1 %2659  ;;  %6448 = vrot.lane.b32.xlu1 %v9516_v48, %s7237_s0  ;;  %v1480_v45 = vpop.xlane.xlu0 %1479 }
 0x523   :  { %6825 = vrcp.f32 %v1480_v45 }
 0x524   :  { %6827 = vrcp.f32 %v949_v22 }
 0x525   :  { %2104 = vadd.xlane.f32.xlu0 %v8479_v49  ;;  %v6824_v3 = vpop.eup %6823 }
 0x526   :  { %v947_v10 = vpop.xlane.xlu1 %946  ;;  %v1544_v48 = vmul.f32 %v6824_v3, %v8181_v41  ;;  %v9526_v41 = vld [vmem:[#allocation50_spill] sm:$0xff] }
 0x527   :  { %6829 = vrcp.f32 %v947_v10  ;;  %v9522_v10 = vld [vmem:[#allocation16_spill] sm:$0xff] }
 0x528   :  { %v6293_v18 = vunpack.i.h.bf16 %v9522_v10  ;;  %v6292_v49 = vunpack.i.l.bf16 %v9522_v10  ;;  %v9527_v10 = vld [vmem:[#allocation18_spill] sm:$0xff] }
 0x529   :  { %2685 = vadd.xlane.f32.xlu0 %v8482_v62  ;;  %v9523_v62 = vld [vmem:[#allocation19_spill] sm:$0xff]  ;;  %v6307_v11 = vunpack.i.l.bf16 %v9527_v10 }
 0x52a   :  { %v8485_v36 = vpop.xlane.xlu1 %2076  ;;  %v6312_v15 = vunpack.i.l.bf16 %v9523_v62 }
 0x52d   :  { %2687 = vadd.xlane.f32.xlu0 %v8487_v54  ;;  %v6826_v32 = vpop.eup %6825  ;;  %v6313_v54 = vunpack.i.h.bf16 %v9523_v62  ;;  %v5959_v62 = vpack.c.bf16 %v6293_v18, %v6292_v49  ;;  %v9531_v18 = vld [vmem:[#allocation23_spill] sm:$0xff] }
 0x52e   :  { %v8492_v5 = vpop.xlane.xlu1 %2657  ;;  %v1543_v22 = vmul.f32 %v6826_v32, %v8191_v33  ;;  %v6828_v20 = vpop.eup %6827  ;;  %v9524_v33 = vld [vmem:[#allocation51_spill] sm:$0xff]  ;;  %v6343_v49 = vunpack.i.h.bf16 %v9531_v18 }
 0x52f   :  { %v2041_v32 = vsub.f32 %v9524_v33, %v8378_v42  ;;  %v1011_v3 = vmul.f32 %v6828_v20, %v9526_v41  ;;  %v5995_v42 = vpack.c.bf16 %v6313_v54, %v6312_v15  ;;  %v9532_v54 = vld [vmem:[#allocation22_spill] sm:$0xff] }
 0x530   :  { %5278 = vmatprep.mubr.f32.mxu0 %v1543_v22  ;;  %v6308_v22 = vunpack.i.h.bf16 %v9527_v10 }
 0x531   :  { %v6830_v45 = vpop.eup %6829  ;;  %5279 = vmatmul.mubr.f32.vlgmr.msra.gmra.mrb[18].mxu0 %v1544_v48  ;;  %v9528_v48 = vld [vmem:[#allocation21_spill] sm:$0xff] }
 0x532   :  { %v953_v7 = vpop.xlane.xlu1 %952  ;;  %v1010_v63 = vmul.f32 %v6830_v45, %v8200_v34  ;;  %5990 = vmatpush3.bf16.msra.mxu0 %v9525_v12  ;;  %v6328_v56 = vunpack.i.h.bf16 %v9528_v48  ;;  %v6327_v37 = vunpack.i.l.bf16 %v9528_v48  ;;  %v9529_v34 = vld [vmem:[#allocation28_spill] sm:$0xff]  ;;  %v2070_v12 = vmul.f32 1.442695, %v2041_v32 }
 0x533   :  { %5992 = vmatprep.subr.bf16.mxu0 %v5991_v16  ;;  %v5963_v41 = vpack.c.bf16 %v6308_v22, %v6307_v11  ;;  %v6337_v32 = vunpack.i.l.bf16 %v9532_v54  ;;  %v9533_v11 = vld [vmem:[#allocation25_spill] sm:$0xff] }
 0x534   :  { %5222 = vmatprep.mubr.f32.mxu1 %v1010_v63  ;;  %v9530_v63 = vld [vmem:[#allocation20_spill] sm:$0xff]  ;;  %v5999_v48 = vpack.c.bf16 %v6328_v56, %v6327_v37  ;;  %6831 = vpow2.f32 %v2070_v12  ;;  %v6358_v22 = vunpack.i.h.bf16 %v9533_v11 }
 0x535   :  { %5223 = vmatmul.mubr.f32.vlgmr.msra.gmra.mrb[32].mxu1 %v1011_v3  ;;  %v6323_v20 = vunpack.i.h.bf16 %v9530_v63  ;;  %v6322_v33 = vunpack.i.l.bf16 %v9530_v63  ;;  %v6342_v3 = vunpack.i.l.bf16 %v9531_v18  ;;  %v6357_v63 = vunpack.i.l.bf16 %v9533_v11  ;;  %v9534_v56 = vld [vmem:[#allocation24_spill] sm:$0xff] }
 0x536   :  { %5958 = vmatpush3.bf16.msra.mxu1 %v9529_v34  ;;  %v1486_v40 = vpop.xlane.xlu1 %1485  ;;  %v8510_v45 = vpop.xlane.xlu0 %2663  ;;  %5994 = vmatpush3.bf16.msra.mxu0 %v5991_v16  ;;  %v6338_v16 = vunpack.i.h.bf16 %v9532_v54  ;;  %6833 = vrcp.f32 %v953_v7  ;;  %v6353_v37 = vunpack.i.h.bf16 %v9534_v56  ;;  %v6373_v54 = vunpack.i.h.bf16 %v9535_v28 }
 0x537   :  { %5960 = vmatprep.subr.bf16.mxu1 %v5959_v62  ;;  %5996 = vmatprep.subr.bf16.mxu0 %v5995_v42  ;;  %v5967_v34 = vpack.c.bf16 %v6323_v20, %v6322_v33  ;;  %v6003_v18 = vpack.c.bf16 %v6343_v49, %v6342_v3  ;;  %v6372_v20 = vunpack.i.l.bf16 %v9535_v28  ;;  %v9536_v3 = vld [vmem:[#allocation29_spill] sm:$0xff] }
 0x538   :  { %v5971_v12 = vpack.c.bf16 %v6338_v16, %v6337_v32  ;;  %v6367_v11 = vunpack.i.l.bf16 %v9536_v3 }
 0x539   :  { %v6011_v28 = vpack.c.bf16 %v6373_v54, %v6372_v20 }
 0x53a   :  { %5962 = vmatpush3.bf16.msra.mxu1 %v5959_v62  ;;  %v8516_v10 = vpop.xlane.xlu1 %2082  ;;  %5998 = vmatpush3.bf16.msra.mxu0 %v5995_v42  ;;  %v8518_v15 = vpop.xlane.xlu0 %2080  ;;  %v6352_v42 = vunpack.i.l.bf16 %v9534_v56 }
 0x53b   :  { %5964 = vmatprep.subr.bf16.mxu1 %v5963_v41  ;;  %6000 = vmatprep.subr.bf16.mxu0 %v5999_v48 }
 0x53c   :  { %v5975_v16 = vpack.c.bf16 %v6353_v37, %v6352_v42 }
 0x53e   :  { %5966 = vmatpush3.bf16.msra.mxu1 %v5963_v41  ;;  %v951_v62 = vpop.xlane.xlu1 %950  ;;  %6002 = vmatpush3.bf16.msra.mxu0 %v5999_v48  ;;  %v1490_v33 = vpop.xlane.xlu0 %1489  ;;  %v6007_v41 = vpack.c.bf16 %v6358_v22, %v6357_v63  ;;  %v6368_v48 = vunpack.i.h.bf16 %v9536_v3 }
 0x53f   :  { %6835 = vrcp.f32 %v951_v62  ;;  %5968 = vmatprep.subr.bf16.mxu1 %v5967_v34  ;;  %6004 = vmatprep.subr.bf16.mxu0 %v6003_v18  ;;  %v8528_v49 = vpop.eup %6831 }
 0x540   :  { %6837 = vrcp.f32 %v1486_v40  ;;  %v5979_v63 = vpack.c.bf16 %v6368_v48, %v6367_v11 }
 0x542   :  { %5970 = vmatpush3.bf16.msra.mxu1 %v5967_v34  ;;  %v1484_v7 = vpop.xlane.xlu1 %1483  ;;  %6006 = vmatpush3.bf16.msra.mxu0 %v6003_v18  ;;  %v6834_v34 = vpop.eup %6833 }
 0x543   :  { %6839 = vrcp.f32 %v1484_v7  ;;  %5972 = vmatprep.subr.bf16.mxu1 %v5971_v12  ;;  %6008 = vmatprep.subr.bf16.mxu0 %v6007_v41  ;;  %v1013_v37 = vmul.f32 %v6834_v34, %v8221_v26 }
 0x546   :  { %5974 = vmatpush3.bf16.msra.mxu1 %v5971_v12  ;;  %v8532_v32 = vpop.xlane.xlu1 %2661  ;;  %2102 = vadd.xlane.f32.xlu1 %v8528_v49  ;;  %v8535_v40 = vpop.xlane.xlu0 %2667 }
 0x547   :  { %6010 = vmatpush3.bf16.msra.mxu0 %v6007_v41  ;;  %5976 = vmatprep.subr.bf16.mxu1 %v5975_v16 }
 0x548   :  { %6012 = vmatprep.subr.bf16.mxu0 %v6011_v28 }
 0x549   :  { %v6836_v22 = vpop.eup %6835 }
 0x54a   :  { %5978 = vmatpush3.bf16.msra.mxu1 %v5975_v16  ;;  %v957_v62 = vpop.xlane.xlu1 %956  ;;  %v955_v18 = vpop.xlane.xlu0 %954  ;;  %v1012_v56 = vmul.f32 %v6836_v22, %v8249_v57 }
 0x54b   :  { %6014 = vmatpush3.bf16.msra.mxu0 %v6011_v28  ;;  %6841 = vrcp.f32 %v957_v62  ;;  %5980 = vmatprep.subr.bf16.mxu1 %v5979_v63  ;;  %v6838_v42 = vpop.eup %6837 }
 0x54c   :  { %6843 = vrcp.f32 %v955_v18  ;;  %5225 = vmatprep.mubr.f32.mxu1 %v1012_v56  ;;  %v1546_v41 = vmul.f32 %v6838_v42, %v8226_v44 }
 0x54d   :  { %v6840_v12 = vpop.eup %6839  ;;  %5226 = vmatmul.mubr.f32.gmra.mrb[34].mxu1 %v1013_v37  ;;  %6845 = vrcp.f32 %v1490_v33 }
 0x54e   :  { %5982 = vmatpush3.bf16.msra.mxu1 %v5979_v63  ;;  %v8539_v54 = vpop.xlane.xlu1 %2086  ;;  %v1488_v20 = vpop.xlane.xlu0 %1487  ;;  %v1545_v7 = vmul.f32 %v6840_v12, %v8260_v2 }
 0x54f   :  { %6847 = vrcp.f32 %v1488_v20 }
 0x550   :  { %5281 = vmatprep.mubr.f32.mxu0 %v1545_v7 }
 0x551   :  { %5282 = vmatmul.mubr.f32.gmra.mrb[20].mxu0 %v1546_v41 }
 0x552   :  { %v961_v57 = vpop.xlane.xlu1 %960  ;;  %v8543_v3 = vpop.xlane.xlu0 %2084 }
 0x553   :  { %6849 = vrcp.f32 %v961_v57 }
 0x555   :  { %v6842_v26 = vpop.eup %6841 }
 0x556   :  { %v6844_v48 = vpop.eup %6843  ;;  %v1494_v11 = vpop.xlane.xlu1 %1493  ;;  %v1015_v28 = vmul.f32 %v6842_v26, %v8278_v52 }
 0x557   :  { %v8545_v16 = vpop.xlane.xlu0 %2665  ;;  %v1014_v34 = vmul.f32 %v6844_v48, %v8276_v38  ;;  %v6846_v22 = vpop.eup %6845 }
 0x558   :  { %v1548_v62 = vmul.f32 %v6846_v22, %v8251_v50 }
 0x559   :  { %5228 = vmatprep.mubr.f32.mxu1 %v1014_v34  ;;  %v6848_v2 = vpop.eup %6847 }
 0x55a   :  { %5229 = vmatmul.mubr.f32.gmra.mrb[36].mxu1 %v1015_v28  ;;  %v8549_v44 = vpop.xlane.xlu1 %2671  ;;  %v1547_v63 = vmul.f32 %v6848_v2, %v8286_v46 }
 0x55b   :  { %v8551_v33 = vpop.xlane.xlu0 %2090 }
 0x55c   :  { %5284 = vmatprep.mubr.f32.mxu0 %v1547_v63 }
 0x55d   :  { %5285 = vmatmul.mubr.f32.gmra.mrb[22].mxu0 %v1548_v62  ;;  %v6850_v12 = vpop.eup %6849 }
 0x55e   :  { %v959_v18 = vpop.xlane.xlu1 %958  ;;  %v1017_v41 = vmul.f32 %v6850_v12, %v8299_v53 }
 0x55f   :  { %v8555_v56 = vpop.xlane.xlu0 %2669  ;;  %6851 = vrcp.f32 %v959_v18 }
 0x560   :  { %6853 = vrcp.f32 %v1494_v11 }
 0x562   :  { %v1492_v38 = vpop.xlane.xlu1 %1491 }
 0x563   :  { %v965_v52 = vpop.xlane.xlu0 %964  ;;  %6855 = vrcp.f32 %v1492_v38 }
 0x564   :  { %6857 = vrcp.f32 %v965_v52 }
 0x566   :  { %v8557_v37 = vpop.xlane.xlu1 %2088 }
 0x567   :  { %v8559_v42 = vpop.xlane.xlu0 %2094 }
 0x569   :  { %v6852_v20 = vpop.eup %6851 }
 0x56a   :  { %v1498_v46 = vpop.xlane.xlu1 %1497  ;;  %v1016_v50 = vmul.f32 %v6852_v20, %v8323_v24  ;;  %v6854_v57 = vpop.eup %6853 }
 0x56b   :  { %v969_v7 = vpop.xlane.xlu0 %968  ;;  %v1550_v34 = vmul.f32 %v6854_v57, %v8308_v23 }
 0x56c   :  { %5231 = vmatprep.mubr.f32.mxu1 %v1016_v50 }
 0x56d   :  { %v6856_v26 = vpop.eup %6855  ;;  %5232 = vmatmul.mubr.f32.gmra.mrb[38].mxu1 %v1017_v41 }
 0x56e   :  { %v8563_v48 = vpop.xlane.xlu1 %2675  ;;  %v1549_v28 = vmul.f32 %v6856_v26, %v8335_v47  ;;  %v6858_v63 = vpop.eup %6857 }
 0x56f   :  { %v1502_v11 = vpop.xlane.xlu0 %1501  ;;  %v1019_v38 = vmul.f32 %v6858_v63, %v8337_v29 }
 0x570   :  { %5287 = vmatprep.mubr.f32.mxu0 %v1549_v28 }
 0x571   :  { %5288 = vmatmul.mubr.f32.gmra.mrb[24].mxu0 %v1550_v34 }
 0x572   :  { %v963_v22 = vpop.xlane.xlu1 %962 }
 0x573   :  { %6859 = vrcp.f32 %v963_v22  ;;  %v1500_v2 = vpop.xlane.xlu0 %1499 }
 0x574   :  { %6861 = vrcp.f32 %v1498_v46 }
 0x575   :  { %6863 = vrcp.f32 %v1500_v2 }
 0x576   :  { %v1496_v53 = vpop.xlane.xlu1 %1495 }
 0x577   :  { %6865 = vrcp.f32 %v1496_v53 }
 0x578   :  { %6867 = vrcp.f32 %v1502_v11 }
 0x579   :  { %6869 = vrcp.f32 %v969_v7 }
 0x57a   :  { %v8567_v24 = vpop.xlane.xlu1 %2092  ;;  %v973_v26 = vpop.xlane.xlu0 %972 }
 0x57d   :  { %v6860_v62 = vpop.eup %6859 }
 0x57e   :  { %v8569_v18 = vpop.xlane.xlu1 %2673  ;;  %v1018_v47 = vmul.f32 %v6860_v62, %v8374_v58  ;;  %v6862_v23 = vpop.eup %6861 }
 0x57f   :  { %v6864_v52 = vpop.eup %6863  ;;  %v1552_v50 = vmul.f32 %v6862_v23, %v8355_v17 }
 0x580   :  { %5234 = vmatprep.mubr.f32.mxu1 %v1018_v47  ;;  %v1553_v57 = vmul.f32 %v6864_v52, %v8376_v8 }
 0x581   :  { %v6866_v12 = vpop.eup %6865  ;;  %5235 = vmatmul.mubr.f32.gmra.mrb[40].mxu1 %v1019_v38 }
 0x582   :  { %v967_v20 = vpop.xlane.xlu1 %966  ;;  %v1551_v46 = vmul.f32 %v6866_v12, %v8385_v25  ;;  %v6868_v41 = vpop.eup %6867 }
 0x583   :  { %6871 = vrcp.f32 %v967_v20  ;;  %v1554_v29 = vmul.f32 %v6868_v41, %v8366_v0  ;;  %v6870_v7 = vpop.eup %6869 }
 0x584   :  { %5290 = vmatprep.mubr.f32.mxu0 %v1551_v46  ;;  %6873 = vrcp.f32 %v973_v26  ;;  %v1021_v8 = vmul.f32 %v6870_v7, %v8357_v1  ;;  %v9537_v7 = vld [vmem:[#allocation31_spill] sm:$0xff] }
 0x585   :  { %5291 = vmatmul.mubr.f32.gmra.mrb[26].mxu0 %v1552_v50 }
 0x586   :  { %v1506_v58 = vpop.xlane.xlu1 %1505  ;;  %5293 = vmatprep.mubr.f32.mxu0 %v1553_v57 }
 0x589   :  { %5294 = vmatmul.mubr.f32.gmra.mrb[28].mxu0 %v1554_v29 }
 0x58a   :  { %v971_v11 = vpop.xlane.xlu1 %970 }
 0x58b   :  { %6875 = vrcp.f32 %v971_v11 }
 0x58c   :  { %6877 = vrcp.f32 %v1506_v58 }
 0x58d   :  { %v6872_v28 = vpop.eup %6871 }
 0x58e   :  { %v1504_v25 = vpop.xlane.xlu1 %1503  ;;  %v1510_v34 = vpop.xlane.xlu0 %1509  ;;  %v1020_v17 = vmul.f32 %v6872_v28, %v8404_v30 }
 0x58f   :  { %6879 = vrcp.f32 %v1504_v25  ;;  %v6874_v2 = vpop.eup %6873 }
 0x590   :  { %5237 = vmatprep.mubr.f32.mxu1 %v1020_v17  ;;  %6881 = vrcp.f32 %v8485_v36  ;;  %v1023_v1 = vmul.f32 %v6874_v2, %v8393_v43 }
 0x591   :  { %5238 = vmatmul.mubr.f32.gmra.mrb[42].mxu1 %v1021_v8 }
 0x592   :  { %v977_v22 = vpop.xlane.xlu1 %976  ;;  %v975_v0 = vpop.xlane.xlu0 %974 }
 0x593   :  { %6883 = vrcp.f32 %v977_v22  ;;  %v9540_v22 = vld [vmem:[#allocation52_spill] sm:$0xff] }
 0x594   :  { %6885 = vrcp.f32 %v975_v0  ;;  %v9541_v0 = vld [vmem:[#allocation48_spill] sm:$0xff] }
 0x595   :  { %v6876_v53 = vpop.eup %6875  ;;  %6887 = vrcp.f32 %v8470_v55 }
 0x596   :  { %6889 = vrcp.f32 %v8492_v5  ;;  %v8582_v63 = vpop.xlane.xlu1 %2098  ;;  %v1508_v30 = vpop.xlane.xlu0 %1507  ;;  %v1022_v62 = vmul.f32 %v6876_v53, %v8417_v6 }
 0x597   :  { %6891 = vrcp.f32 %v1510_v34  ;;  %v6878_v47 = vpop.eup %6877 }
 0x598   :  { %6893 = vrcp.f32 %v1508_v30  ;;  %5240 = vmatprep.mubr.f32.mxu1 %v1022_v62  ;;  %v1556_v38 = vmul.f32 %v6878_v47, %v8410_v31  ;;  %v9542_v30 = vld [vmem:[#allocation34_spill] sm:$0xff]  ;;  %v9543_v47 = vld [vmem:[#allocation32_spill] sm:$0xff] }
 0x599   :  { %v6880_v36 = vpop.eup %6879  ;;  %6895 = vrcp.f32 %v8518_v15  ;;  %5241 = vmatmul.mubr.f32.gmra.mrb[44].mxu1 %v1023_v1 }
 0x59a   :  { %v8587_v23 = vpop.xlane.xlu1 %2677  ;;  %v2097_v55 = vpop.xlane.xlu0 %2096  ;;  %v1555_v5 = vmul.f32 %v6880_v36, %v8422_v51  ;;  %6897 = vrcp.f32 %v8475_v39 }
 0x59b   :  { %v6882_v6 = vpop.eup %6881  ;;  %6899 = vrcp.f32 %v8516_v10 }
 0x59c   :  { %5296 = vmatprep.mubr.f32.mxu0 %v1555_v5  ;;  %6901 = vrcp.f32 %v8543_v3  ;;  %v9544_v5 = vld [vmem:[#allocation54_spill] sm:$0xff] }
 0x59d   :  { %v6884_v43 = vpop.eup %6883  ;;  %5297 = vmatmul.mubr.f32.gmra.mrb[30].mxu0 %v1556_v38  ;;  %6903 = vrcp.f32 %v8532_v32  ;;  %v2140_v32 = vmul.f32 %v6882_v6, %v8206_v19  ;;  %v9545_v6 = vld [vmem:[#allocation40_spill] sm:$0xff] }
 0x59e   :  { %v6886_v52 = vpop.eup %6885  ;;  %v6444_v15 = vpop.permute.xlu1 %6443  ;;  %v1025_v51 = vmul.f32 %v6884_v43, %v8432_v35  ;;  %6905 = vrcp.f32 %v8510_v45 }
 0x59f   :  { %v8595_v12 = vpop.xlane.xlu0 %2679  ;;  %v6888_v20 = vpop.eup %6887  ;;  %v6446_v31 = vunpack.i.h.bf16 %v6444_v15  ;;  %v6445_v39 = vunpack.i.l.bf16 %v6444_v15  ;;  %v1024_v10 = vmul.f32 %v6886_v52, %v8430_v60  ;;  %6907 = vrcp.f32 %v8539_v54  ;;  %v9546_v15 = vld [vmem:[#allocation33_spill] sm:$0xff] }
 0x5a0   :  { %v6890_v46 = vpop.eup %6889  ;;  %6909 = vrcp.f32 %v8557_v37 }
 0x5a1   :  { %v6892_v3 = vpop.eup %6891  ;;  %v5983_v50 = vpack.c.bf16 %v6446_v31, %v6445_v39  ;;  %5243 = vmatprep.mubr.f32.mxu1 %v1024_v10  ;;  %6911 = vrcp.f32 %v8545_v16  ;;  %v2721_v26 = vmul.f32 %v6890_v46, %v8213_v13 }
 0x5a2   :  { %v6894_v41 = vpop.eup %6893  ;;  %5244 = vmatmul.mubr.f32.gmra.mrb[46].mxu1 %v1025_v51  ;;  %v6449_v35 = vpop.permute.xlu1 %6448  ;;  %6913 = vrcp.f32 %v8535_v40  ;;  %v1558_v19 = vmul.f32 %v6892_v3, %v8424_v9  ;;  %v2141_v40 = vmul.f32 %v6888_v20, %v8185_v4  ;;  %v9548_v3 = vld [vmem:[#allocation44_spill] sm:$0xff] }
 0x5a3   :  { %v2101_v45 = vpop.xlane.xlu0 %2100  ;;  %v6896_v57 = vpop.eup %6895  ;;  %v6451_v60 = vunpack.i.h.bf16 %v6449_v35  ;;  %v6450_v58 = vunpack.i.l.bf16 %v6449_v35  ;;  %5334 = vmatprep.mubr.f32.mxu1 %v2140_v32  ;;  %5984 = vmatprep.subr.bf16.mxu1 %v5983_v50  ;;  %v1557_v54 = vmul.f32 %v6894_v41, %v8440_v59  ;;  %6915 = vrcp.f32 %v8551_v33  ;;  %v9549_v35 = vld [vmem:[#allocation36_spill] sm:$0xff] }
 0x5a4   :  { %5986 = vmatpush3.bf16.msra.mxu1 %v5983_v50  ;;  %v6898_v37 = vpop.eup %6897  ;;  %6917 = vrcp.f32 %v8567_v24  ;;  %v2142_v59 = vmul.f32 %v6896_v57, %v8238_v27 }
 0x5a5   :  { %v6015_v16 = vpack.c.bf16 %v6451_v60, %v6450_v58  ;;  %5299 = vmatprep.mubr.f32.mxu0 %v1557_v54  ;;  %v6900_v29 = vpop.eup %6899  ;;  %6919 = vrcp.f32 %v8555_v56  ;;  %v2722_v27 = vmul.f32 %v6898_v37, %v8193_v14  ;;  %v9550_v60 = vld [vmem:[#allocation37_spill] sm:$0xff] }
 0x5a6   :  { %5300 = vmatmul.mubr.f32.gmra.mrb[32].mxu0 %v1558_v19  ;;  %v6902_v33 = vpop.eup %6901  ;;  %6921 = vrcp.f32 %v8549_v44  ;;  %v2143_v4 = vmul.f32 %v6900_v29, %v8240_v21  ;;  %v9551_v19 = vld [vmem:[#allocation35_spill] sm:$0xff] }
 0x5a7   :  { %v2682_v11 = vpop.xlane.xlu0 %2681  ;;  %5390 = vmatprep.mubr.f32.mxu0 %v2721_v26  ;;  %5335 = vmatmul.mubr.f32.vlgmr.msra.gmra.mrb[48].mxu1 %v2141_v40  ;;  %v6904_v9 = vpop.eup %6903  ;;  %6923 = vrcp.f32 %v8559_v42  ;;  %v2144_v44 = vmul.f32 %v6902_v33, %v9537_v7  ;;  %v9538_v42 = vld [vmem:[#allocation53_spill] sm:$0xff]  ;;  %v9557_v7 = vld [vmem:[#allocation15_spill] sm:$0xff] }
 0x5a8   :  { %6016 = vmatprep.subr.bf16.mxu0 %v6015_v16  ;;  %5337 = vmatprep.mubr.f32.mxu1 %v2142_v59  ;;  %v6906_v13 = vpop.eup %6905  ;;  %6925 = vrcp.f32 %v2097_v55  ;;  %v2723_v25 = vmul.f32 %v6904_v9, %v9538_v42  ;;  %v9554_v59 = vld [vmem:[#allocation39_spill] sm:$0xff] }
 0x5a9   :  { %6018 = vmatpush3.bf16.msra.mxu0 %v6015_v16  ;;  %v6908_v56 = vpop.eup %6907  ;;  %6927 = vrcp.f32 %v8569_v18  ;;  %v9539_v18 = vld [vmem:[#allocation43_spill] sm:$0xff]  ;;  %v9552_v16 = vld [vmem:[#allocation45_spill] sm:$0xff] }
 0x5aa   :  { %v6910_v28 = vpop.eup %6909  ;;  %6929 = vrcp.f32 %v8563_v48  ;;  %v2145_v17 = vmul.f32 %v6908_v56, %v9539_v18  ;;  %v2724_v48 = vmul.f32 %v6906_v13, %v9540_v22  ;;  %v9555_v13 = vld [vmem:[#allocation47_spill] sm:$0xff]  ;;  %v9559_v22 = vld [vmem:[#allocation49_spill] sm:$0xff] }
 0x5ab   :  { %v2684_v24 = vpop.xlane.xlu0 %2683  ;;  %5338 = vmatmul.mubr.f32.gmra.mrb[50].mxu1 %v2143_v4  ;;  %v6912_v34 = vpop.eup %6911  ;;  %6931 = vrcp.f32 %v8582_v63  ;;  %v2146_v2 = vmul.f32 %v6910_v28, %v9541_v0  ;;  %v9558_v42 = vld [vmem:[#allocation55_spill] sm:$0xff]  ;;  %v9560_v0 = vld [vmem:[#allocation42_spill] sm:$0xff] }
 0x5ac   :  { %5391 = vmatmul.mubr.f32.vlgmr.msra.gmra.mrb[34].mxu0 %v2722_v27  ;;  %5340 = vmatprep.mubr.f32.mxu1 %v2144_v44  ;;  %v6914_v21 = vpop.eup %6913  ;;  %6933 = vrcp.f32 %v2101_v45  ;;  %v2725_v63 = vmul.f32 %v6912_v34, %v9542_v30 }
 0x5ad   :  { %5393 = vmatprep.mubr.f32.mxu0 %v2723_v25  ;;  %v6916_v8 = vpop.eup %6915  ;;  %6935 = vrcp.f32 %v8587_v23  ;;  %v2726_v38 = vmul.f32 %v6914_v21, %v9544_v5 }
 0x5ae   :  { %v6918_v53 = vpop.eup %6917  ;;  %6937 = vrcp.f32 %v8595_v12  ;;  %v2147_v36 = vmul.f32 %v6916_v8, %v9543_v47  ;;  %v9547_v12 = vld [vmem:[#allocation46_spill] sm:$0xff] }
 0x5af   :  { %v8624_v14 = vpop.xlane.xlu0 %2106  ;;  %5341 = vmatmul.mubr.f32.gmra.mrb[52].mxu1 %v2145_v17  ;;  %v6920_v62 = vpop.eup %6919  ;;  %6939 = vrcp.f32 %v2682_v11  ;;  %v2148_v43 = vmul.f32 %v6918_v53, %v9545_v6 }
 0x5b0   :  { %5394 = vmatmul.mubr.f32.gmra.mrb[36].mxu0 %v2724_v48  ;;  %5343 = vmatprep.mubr.f32.mxu1 %v2146_v2  ;;  %v6922_v1 = vpop.eup %6921  ;;  %v2727_v51 = vmul.f32 %v6920_v62, %v9546_v15  ;;  %6941 = vrcp.f32 %v2684_v24  ;;  %v9556_v24 = vld [vmem:[#allocation41_spill] sm:$0xff] }
 0x5b1   :  { %5396 = vmatprep.mubr.f32.mxu0 %v2725_v63  ;;  %v6924_v23 = vpop.eup %6923  ;;  %v2728_v50 = vmul.f32 %v6922_v1, %v9548_v3 }
 0x5b2   :  { %v6926_v52 = vpop.eup %6925  ;;  %v2149_v39 = vmul.f32 %v6924_v23, %v9547_v12 }
 0x5b3   :  { %v2105_v55 = vpop.xlane.xlu0 %2104  ;;  %5344 = vmatmul.mubr.f32.gmra.mrb[54].mxu1 %v2147_v36  ;;  %v6928_v20 = vpop.eup %6927  ;;  %v2150_v32 = vmul.f32 %v6926_v52, %v8446_v61  ;;  %v9553_v61 = vld [vmem:[#allocation38_spill] sm:$0xff] }
 0x5b4   :  { %5397 = vmatmul.mubr.f32.gmra.mrb[38].mxu0 %v2726_v38  ;;  %5346 = vmatprep.mubr.f32.mxu1 %v2148_v43  ;;  %v6930_v31 = vpop.eup %6929  ;;  %v2729_v45 = vmul.f32 %v6928_v20, %v9549_v35 }
 0x5b5   :  { %5399 = vmatprep.mubr.f32.mxu0 %v2727_v51  ;;  %v6932_v10 = vpop.eup %6931  ;;  %v2730_v37 = vmul.f32 %v6930_v31, %v9551_v19 }
 0x5b6   :  { %v6934_v41 = vpop.eup %6933  ;;  %v2151_v58 = vmul.f32 %v6932_v10, %v9550_v60 }
 0x5b7   :  { %v2686_v46 = vpop.xlane.xlu0 %2685  ;;  %5347 = vmatmul.mubr.f32.gmra.mrb[56].mxu1 %v2149_v39  ;;  %v6936_v57 = vpop.eup %6935  ;;  %v2152_v26 = vmul.f32 %v6934_v41, %v9552_v16 }
 0x5b8   :  { %6943 = vrcp.f32 %v2686_v46  ;;  %5400 = vmatmul.mubr.f32.gmra.mrb[40].mxu0 %v2728_v50  ;;  %5349 = vmatprep.mubr.f32.mxu1 %v2150_v32  ;;  %v6938_v40 = vpop.eup %6937  ;;  %v2731_v29 = vmul.f32 %v6936_v57, %v9553_v61 }
 0x5b9   :  { %5402 = vmatprep.mubr.f32.mxu0 %v2729_v45  ;;  %v6940_v11 = vpop.eup %6939  ;;  %v2732_v33 = vmul.f32 %v6938_v40, %v9554_v59 }
 0x5ba   :  { %v6942_v9 = vpop.eup %6941  ;;  %v2733_v4 = vmul.f32 %v6940_v11, %v9555_v13 }
 0x5bb   :  { %v2688_v54 = vpop.xlane.xlu0 %2687  ;;  %5350 = vmatmul.mubr.f32.gmra.mrb[58].mxu1 %v2151_v58  ;;  %v2734_v27 = vmul.f32 %v6942_v9, %v9556_v24 }
 0x5bc   :  { %6945 = vrcp.f32 %v2688_v54  ;;  %5403 = vmatmul.mubr.f32.gmra.mrb[42].mxu0 %v2730_v37  ;;  %5352 = vmatprep.mubr.f32.mxu1 %v2152_v26 }
 0x5bd   :  { %5405 = vmatprep.mubr.f32.mxu0 %v2731_v29  ;;  %6947 = vrcp.f32 %v2105_v55 }
 0x5c0   :  { %5406 = vmatmul.mubr.f32.gmra.mrb[44].mxu0 %v2732_v33 }
 0x5c1   :  { %5408 = vmatprep.mubr.f32.mxu0 %v2733_v4 }
 0x5c2   :  { %v6944_v56 = vpop.eup %6943 }
 0x5c3   :  { %v2735_v44 = vmul.f32 %v6944_v56, %v9557_v7 }
 0x5c4   :  { %5409 = vmatmul.mubr.f32.gmra.mrb[46].mxu0 %v2734_v27 }
 0x5c5   :  { %5411 = vmatprep.mubr.f32.mxu0 %v2735_v44 }
 0x5c6   :  { %v6946_v28 = vpop.eup %6945 }
 0x5c7   :  { %v2736_v25 = vmul.f32 %v6946_v28, %v9558_v42  ;;  %v6948_v21 = vpop.eup %6947 }
 0x5c8   :  { %v2154_v48 = vmul.f32 %v6948_v21, %v9559_v22 }
 0x5c9   :  { %5412 = vmatmul.mubr.f32.gmra.mrb[48].mxu0 %v2736_v25 }
 0x5d3   :  { %v2103_v34 = vpop.xlane.xlu1 %2102 }
 0x5d4   :  { %6949 = vrcp.f32 %v2103_v34 }
 0x5d5   :  { %6951 = vrcp.f32 %v8624_v14 }
 0x5de   :  { %v6950_v18 = vpop.eup %6949 }
 0x5df   :  { %v2153_v17 = vmul.f32 %v6950_v18, %v8528_v49  ;;  %v6952_v8 = vpop.eup %6951 }
 0x5e0   :  { %v2155_v2 = vmul.f32 %v6952_v8, %v9560_v0 }
 0x5e1   :  { %5353 = vmatmul.mubr.f32.gmra.mrb[60].mxu1 %v2153_v17 }
 0x5e2   :  { %5355 = vmatprep.mubr.f32.mxu1 %v2154_v48 }
 0x5e5   :  { %5356 = vmatmul.mubr.f32.gmra.mrb[62].mxu1 %v2155_v2 }
 0x604   :  { %v5280_v53 = vpop.f32.mrb[18].mxu0 }
 0x605   :  { %v1785_v30 = vmin.f32 %v5280_v53, 0.0  ;;  %v1689_v63 = vpop.f32.mrb[19].mxu0  ;;  %vm1769_vm1 = vcmp.gt.f32.partialorder %v5280_v53, 0.0 }
 0x606   :  { %v1784_v62 = vmin.f32 %v1689_v63, 0.0  ;;  %vm1768_vm2 = vcmp.gt.f32.partialorder %v1689_v63, 0.0 }
 0x607   :  { %v1802_v1 = vmul.f32 1.442695, %v1785_v30 }
 0x608   :  { %v8651_v47 = vpop.f32.mrb[32].mxu1  ;;  %v1800_v14 = vmul.f32 1.442695, %v1784_v62 }
 0x609   :  { %v8653_v36 = vpop.f32.mrb[33].mxu1  ;;  %6953 = vpow2.f32 %v1802_v1 }
 0x60a   :  { %6955 = vpow2.f32 %v1800_v14 }
 0x613   :  { %v6954_v49 = vpop.eup %6953 }
 0x614   :  { %v6956_v23 = vpop.eup %6955  ;;  %v4433_v55 = vadd.f32 -1.0, %v6954_v49 }
 0x615   :  { %v4432_v5 = vadd.f32 -1.0, %v6956_v23 }
 0x616   :  { %v1849_v38 = vsel %vm1769_vm1, %v5280_v53, %v4433_v55 }
 0x617   :  { %v1848_v6 = vsel %vm1768_vm2, %v1689_v63, %v4432_v5 }
 0x618   :  { %v6452_v43 = vpack.i.bf16 %v1849_v38, %v1848_v6 }
 0x61a   :  { %6453 = vrot.lane.b32.xlu0 %v6452_v43, %s7237_s0  ;;  %v3269_v43 = vld [vmem:[#allocation7] sm:$0xff] }
 0x620   :  { %v8656_v52 = vpop.f32.mrb[34].mxu1 }
 0x621   :  { %v8658_v15 = vpop.f32.mrb[35].mxu1 }
 0x624   :  { %v5283_v51 = vpop.f32.mrb[20].mxu0 }
 0x625   :  { %v1787_v20 = vmin.f32 %v5283_v51, 0.0  ;;  %v1699_v31 = vpop.f32.mrb[21].mxu0  ;;  %vm1771_vm3 = vcmp.gt.f32.partialorder %v5283_v51, 0.0 }
 0x626   :  { %v1786_v12 = vmin.f32 %v1699_v31, 0.0  ;;  %vm1770_vm4 = vcmp.gt.f32.partialorder %v1699_v31, 0.0 }
 0x627   :  { %v1806_v39 = vmul.f32 1.442695, %v1787_v20 }
 0x628   :  { %v1804_v10 = vmul.f32 1.442695, %v1786_v12  ;;  %v3272_v12 = vld [vmem:[#allocation7 + $0x18] sm:$0xff] }
 0x629   :  { %6957 = vpow2.f32 %v1806_v39 }
 0x62a   :  { %6959 = vpow2.f32 %v1804_v10 }
 0x62d   :  { %v8660_v46 = vpop.f32.mrb[36].mxu1 }
 0x62e   :  { %v8662_v3 = vpop.f32.mrb[37].mxu1 }
 0x630   :  { %v5286_v50 = vpop.f32.mrb[22].mxu0 }
 0x631   :  { %v1789_v32 = vmin.f32 %v5286_v50, 0.0  ;;  %v1709_v41 = vpop.f32.mrb[23].mxu0  ;;  %vm1773_vm5 = vcmp.gt.f32.partialorder %v5286_v50, 0.0 }
 0x632   :  { %v1788_v45 = vmin.f32 %v1709_v41, 0.0  ;;  %vm1772_vm6 = vcmp.gt.f32.partialorder %v1709_v41, 0.0 }
 0x633   :  { %v6958_v35 = vpop.eup %6957  ;;  %v1810_v58 = vmul.f32 1.442695, %v1789_v32  ;;  %v3274_v32 = vld [vmem:[#allocation7 + $0x28] sm:$0xff] }
 0x634   :  { %v6960_v57 = vpop.eup %6959  ;;  %v4435_v60 = vadd.f32 -1.0, %v6958_v35  ;;  %v1808_v19 = vmul.f32 1.442695, %v1788_v45 }
 0x635   :  { %v4434_v54 = vadd.f32 -1.0, %v6960_v57  ;;  %6961 = vpow2.f32 %v1810_v58 }
 0x636   :  { %v1851_v37 = vsel %vm1771_vm3, %v5283_v51, %v4435_v60  ;;  %6963 = vpow2.f32 %v1808_v19  ;;  %v3270_v51 = vld [vmem:[#allocation7 + $0x8] sm:$0xff]  ;;  %v3275_v19 = vld [vmem:[#allocation7 + $0x30] sm:$0xff] }
 0x637   :  { %v1850_v16 = vsel %vm1770_vm4, %v1699_v31, %v4434_v54  ;;  %v6019_v20 = vpack.c.bf16 %v3270_v51, %v3269_v43  ;;  %v3271_v31 = vld [vmem:[#allocation7 + $0x10] sm:$0xff] }
 0x638   :  { %v6457_v26 = vpack.i.bf16 %v1851_v37, %v1850_v16  ;;  %v6023_v10 = vpack.c.bf16 %v3272_v12, %v3271_v31  ;;  %v3276_v37 = vld [vmem:[#allocation7 + $0x38] sm:$0xff] }
 0x639   :  { %6020 = vmatprep.subr.bf16.mxu1 %v6019_v20 }
 0x63a   :  { %6458 = vrot.lane.b32.xlu0 %v6457_v26, %s7237_s0  ;;  %6022 = vmatpush3.bf16.msra.mxu1 %v6019_v20 }
 0x63b   :  { %6024 = vmatprep.subr.bf16.mxu1 %v6023_v10 }
 0x63e   :  { %6026 = vmatpush3.bf16.msra.mxu1 %v6023_v10 }
 0x63f   :  { %v6962_v40 = vpop.eup %6961 }
 0x640   :  { %v8665_v61 = vpop.f32.mrb[38].mxu1  ;;  %v6964_v29 = vpop.eup %6963  ;;  %v4437_v11 = vadd.f32 -1.0, %v6962_v40 }
 0x641   :  { %v8667_v59 = vpop.f32.mrb[39].mxu1  ;;  %v4436_v33 = vadd.f32 -1.0, %v6964_v29 }
 0x642   :  { %v1853_v9 = vsel %vm1773_vm5, %v5286_v50, %v4437_v11  ;;  %v3273_v50 = vld [vmem:[#allocation7 + $0x20] sm:$0xff] }
 0x643   :  { %v1852_v13 = vsel %vm1772_vm6, %v1709_v41, %v4436_v33  ;;  %v6027_v60 = vpack.c.bf16 %v3274_v32, %v3273_v50 }
 0x644   :  { %v5289_v4 = vpop.f32.mrb[24].mxu0  ;;  %v6462_v56 = vpack.i.bf16 %v1853_v9, %v1852_v13  ;;  %v6031_v13 = vpack.c.bf16 %v3276_v37, %v3275_v19 }
 0x645   :  { %v1791_v24 = vmin.f32 %v5289_v4, 0.0  ;;  %v1719_v27 = vpop.f32.mrb[25].mxu0  ;;  %vm1775_vm7 = vcmp.gt.f32.partialorder %v5289_v4, 0.0  ;;  %6028 = vmatprep.subr.bf16.mxu1 %v6027_v60 }
 0x646   :  { %v1790_v7 = vmin.f32 %v1719_v27, 0.0  ;;  %6463 = vrot.lane.b32.xlu1 %v6462_v56, %s7237_s0  ;;  %vm1774_vm8 = vcmp.gt.f32.partialorder %v1719_v27, 0.0  ;;  %6030 = vmatpush3.bf16.msra.mxu1 %v6027_v60 }
 0x647   :  { %v1814_v44 = vmul.f32 1.442695, %v1791_v24  ;;  %6032 = vmatprep.subr.bf16.mxu1 %v6031_v13 }
 0x648   :  { %v1812_v28 = vmul.f32 1.442695, %v1790_v7 }
 0x649   :  { %6965 = vpow2.f32 %v1814_v44 }
 0x64a   :  { %6967 = vpow2.f32 %v1812_v28  ;;  %6034 = vmatpush3.bf16.msra.mxu1 %v6031_v13 }
 0x653   :  { %v6966_v42 = vpop.eup %6965 }
 0x654   :  { %v6968_v25 = vpop.eup %6967  ;;  %v4439_v34 = vadd.f32 -1.0, %v6966_v42  ;;  %v8670_v21 = vpop.f32.mrb[40].mxu1 }
 0x655   :  { %v4438_v18 = vadd.f32 -1.0, %v6968_v25  ;;  %v8672_v17 = vpop.f32.mrb[41].mxu1 }
 0x656   :  { %v1855_v8 = vsel %vm1775_vm7, %v5289_v4, %v4439_v34 }
 0x657   :  { %v1854_v22 = vsel %vm1774_vm8, %v1719_v27, %v4438_v18 }
 0x658   :  { %v6467_v48 = vpack.i.bf16 %v1855_v8, %v1854_v22  ;;  %v5292_v0 = vpop.f32.mrb[26].mxu0  ;;  %v3277_v8 = vld [vmem:[#allocation7 + $0x40] sm:$0xff]  ;;  %v3278_v22 = vld [vmem:[#allocation7 + $0x48] sm:$0xff] }
 0x659   :  { %v1793_v2 = vmin.f32 %v5292_v0, 0.0  ;;  %v1729_v53 = vpop.f32.mrb[27].mxu0  ;;  %vm1777_vm9 = vcmp.gt.f32.partialorder %v5292_v0, 0.0 }
 0x65a   :  { %v1792_v30 = vmin.f32 %v1729_v53, 0.0  ;;  %6468 = vrot.lane.b32.xlu0 %v6467_v48, %s7237_s0  ;;  %vm1776_vm10 = vcmp.gt.f32.partialorder %v1729_v53, 0.0 }
 0x65b   :  { %v1818_v63 = vmul.f32 1.442695, %v1793_v2 }
 0x65c   :  { %v1816_v62 = vmul.f32 1.442695, %v1792_v30  ;;  %v5295_v1 = vpop.f32.mrb[28].mxu0  ;;  %v3279_v30 = vld [vmem:[#allocation7 + $0x50] sm:$0xff] }
 0x65d   :  { %6969 = vpow2.f32 %v1818_v63  ;;  %v1795_v14 = vmin.f32 %v5295_v1, 0.0  ;;  %v1739_v49 = vpop.f32.mrb[29].mxu0  ;;  %vm1779_vm11 = vcmp.gt.f32.partialorder %v5295_v1, 0.0  ;;  %v3280_v63 = vld [vmem:[#allocation7 + $0x58] sm:$0xff] }
 0x65e   :  { %6971 = vpow2.f32 %v1816_v62  ;;  %v1794_v23 = vmin.f32 %v1739_v49, 0.0  ;;  %vm1778_vm12 = vcmp.gt.f32.partialorder %v1739_v49, 0.0 }
 0x65f   :  { %v1822_v55 = vmul.f32 1.442695, %v1795_v14 }
 0x660   :  { %v1820_v5 = vmul.f32 1.442695, %v1794_v23 }
 0x661   :  { %6973 = vpow2.f32 %v1822_v55  ;;  %v6039_v55 = vpack.c.bf16 %v3280_v63, %v3279_v30 }
 0x662   :  { %6975 = vpow2.f32 %v1820_v5 }
 0x664   :  { %v8675_v38 = vpop.f32.mrb[42].mxu1 }
 0x665   :  { %v8677_v6 = vpop.f32.mrb[43].mxu1 }
 0x667   :  { %v6970_v39 = vpop.eup %6969 }
 0x668   :  { %v6972_v41 = vpop.eup %6971  ;;  %v4441_v35 = vadd.f32 -1.0, %v6970_v39 }
 0x669   :  { %v4440_v45 = vadd.f32 -1.0, %v6972_v41 }
 0x66a   :  { %v1857_v57 = vsel %vm1777_vm9, %v5292_v0, %v4441_v35 }
 0x66b   :  { %v6974_v58 = vpop.eup %6973  ;;  %v1856_v54 = vsel %vm1776_vm10, %v1729_v53, %v4440_v45  ;;  %v6035_v53 = vpack.c.bf16 %v3278_v22, %v3277_v8 }
 0x66c   :  { %v6976_v16 = vpop.eup %6975  ;;  %v6472_v26 = vpack.i.bf16 %v1857_v57, %v1856_v54  ;;  %v4443_v40 = vadd.f32 -1.0, %v6974_v58  ;;  %v8679_v29 = vpop.f32.mrb[44].mxu1 }
 0x66d   :  { %v4442_v11 = vadd.f32 -1.0, %v6976_v16  ;;  %v8681_v33 = vpop.f32.mrb[45].mxu1  ;;  %6036 = vmatprep.subr.bf16.mxu1 %v6035_v53 }
 0x66e   :  { %v1859_v9 = vsel %vm1779_vm11, %v5295_v1, %v4443_v40  ;;  %6473 = vrot.lane.b32.xlu1 %v6472_v26, %s7237_s0  ;;  %6038 = vmatpush3.bf16.msra.mxu1 %v6035_v53 }
 0x66f   :  { %v1858_v4 = vsel %vm1778_vm12, %v1739_v49, %v4442_v11  ;;  %6040 = vmatprep.subr.bf16.mxu1 %v6039_v55 }
 0x670   :  { %v6477_v56 = vpack.i.bf16 %v1859_v9, %v1858_v4  ;;  %v5298_v24 = vpop.f32.mrb[30].mxu0 }
 0x671   :  { %v1797_v27 = vmin.f32 %v5298_v24, 0.0  ;;  %v1749_v7 = vpop.f32.mrb[31].mxu0  ;;  %vm1781_vm13 = vcmp.gt.f32.partialorder %v5298_v24, 0.0 }
 0x672   :  { %v1796_v44 = vmin.f32 %v1749_v7, 0.0  ;;  %6478 = vrot.lane.b32.xlu0 %v6477_v56, %s7237_s0  ;;  %6042 = vmatpush3.bf16.msra.mxu1 %v6039_v55  ;;  %vm1780_vm14 = vcmp.gt.f32.partialorder %v1749_v7, 0.0 }
 0x673   :  { %v1826_v28 = vmul.f32 1.442695, %v1797_v27 }
 0x674   :  { %v1824_v42 = vmul.f32 1.442695, %v1796_v44 }
 0x675   :  { %6977 = vpow2.f32 %v1826_v28  ;;  %v8685_v25 = vpop.f32.mrb[46].mxu1 }
 0x676   :  { %6979 = vpow2.f32 %v1824_v42  ;;  %v8687_v34 = vpop.f32.mrb[47].mxu1 }
 0x679   :  { %v8689_v18 = vpop.f32.mrb[32].mxu0 }
 0x67a   :  { %v1799_v48 = vmin.f32 %v8689_v18, 0.0  ;;  %v8692_v0 = vpop.f32.mrb[33].mxu0  ;;  %v8694_v2 = vpop.f32.mrb[48].mxu1  ;;  %vm1783_vm15 = vcmp.gt.f32.partialorder %v8689_v18, 0.0 }
 0x67b   :  { %v1798_v62 = vmin.f32 %v8692_v0, 0.0  ;;  %v8697_v1 = vpop.f32.mrb[49].mxu1  ;;  %v2366_v49 = vmin.f32 %v8694_v2, 0.0  ;;  %vm1782_vm1 = vcmp.gt.f32.partialorder %v8692_v0, 0.0  ;;  %vm2350_vm2 = vcmp.gt.f32.partialorder %v8694_v2, 0.0 }
 0x67c   :  { %v1830_v14 = vmul.f32 1.442695, %v1799_v48  ;;  %v2365_v5 = vmin.f32 %v8697_v1, 0.0  ;;  %vm2349_vm3 = vcmp.gt.f32.partialorder %v8697_v1, 0.0 }
 0x67d   :  { %v1828_v23 = vmul.f32 1.442695, %v1798_v62  ;;  %v2383_v10 = vmul.f32 1.442695, %v2366_v49 }
 0x67e   :  { %6981 = vpow2.f32 %v1830_v14  ;;  %v8701_v43 = vpop.f32.mrb[50].mxu1  ;;  %v2381_v57 = vmul.f32 1.442695, %v2365_v5 }
 0x67f   :  { %v6978_v51 = vpop.eup %6977  ;;  %6983 = vpow2.f32 %v1828_v23  ;;  %v8703_v20 = vpop.f32.mrb[34].mxu0  ;;  %v2368_v50 = vmin.f32 %v8701_v43, 0.0  ;;  %vm2352_vm4 = vcmp.gt.f32.partialorder %v8701_v43, 0.0 }
 0x680   :  { %v8705_v31 = vpop.f32.mrb[51].mxu1  ;;  %v6980_v12 = vpop.eup %6979  ;;  %v4445_v39 = vadd.f32 -1.0, %v6978_v51  ;;  %v2947_v35 = vmin.f32 %v8703_v20, 0.0  ;;  %6985 = vpow2.f32 %v2383_v10  ;;  %vm2931_vm5 = vcmp.gt.f32.partialorder %v8703_v20, 0.0 }
 0x681   :  { %v8708_v32 = vpop.f32.mrb[35].mxu0  ;;  %v4444_v41 = vadd.f32 -1.0, %v6980_v12  ;;  %v2367_v60 = vmin.f32 %v8705_v31, 0.0  ;;  %v2387_v11 = vmul.f32 1.442695, %v2368_v50  ;;  %vm2351_vm6 = vcmp.gt.f32.partialorder %v8705_v31, 0.0 }
 0x682   :  { %v1861_v45 = vsel %vm1781_vm13, %v5298_v24, %v4445_v39  ;;  %v8712_v58 = vpop.f32.mrb[52].mxu1  ;;  %v2964_v19 = vmul.f32 1.442695, %v2947_v35  ;;  %v2946_v37 = vmin.f32 %v8708_v32, 0.0  ;;  %vm2930_vm7 = vcmp.gt.f32.partialorder %v8708_v32, 0.0 }
 0x683   :  { %v1860_v54 = vsel %vm1780_vm14, %v1749_v7, %v4444_v41  ;;  %v8715_v16 = vpop.f32.mrb[36].mxu0  ;;  %v8717_v26 = vpop.f32.mrb[53].mxu1  ;;  %v2385_v13 = vmul.f32 1.442695, %v2367_v60  ;;  %v2370_v56 = vmin.f32 %v8712_v58, 0.0  ;;  %vm2354_vm8 = vcmp.gt.f32.partialorder %v8712_v58, 0.0 }
 0x684   :  { %v6482_v40 = vpack.i.bf16 %v1861_v45, %v1860_v54  ;;  %v8719_v9 = vpop.f32.mrb[37].mxu0  ;;  %6987 = vpow2.f32 %v2964_v19  ;;  %v2962_v4 = vmul.f32 1.442695, %v2946_v37  ;;  %v2949_v24 = vmin.f32 %v8715_v16, 0.0 }
 0x685   :  { %6989 = vpow2.f32 %v2381_v57  ;;  %v2369_v7 = vmin.f32 %v8717_v26, 0.0  ;;  %v2948_v30 = vmin.f32 %v8719_v9, 0.0  ;;  %v2391_v62 = vmul.f32 1.442695, %v2370_v56 }
 0x686   :  { %6483 = vrot.lane.b32.xlu1 %v6482_v40, %s7237_s0  ;;  %v8724_v27 = vpop.f32.mrb[54].mxu1  ;;  %6991 = vpow2.f32 %v2962_v4  ;;  %v2968_v8 = vmul.f32 1.442695, %v2949_v24  ;;  %vm2933_vm9 = vcmp.gt.f32.partialorder %v8715_v16, 0.0  ;;  %vm2932_vm10 = vcmp.gt.f32.partialorder %v8719_v9, 0.0 }
 0x687   :  { %v8727_v44 = vpop.f32.mrb[38].mxu0  ;;  %v8729_v28 = vpop.f32.mrb[55].mxu1  ;;  %6993 = vpow2.f32 %v2387_v11  ;;  %v2372_v14 = vmin.f32 %v8724_v27, 0.0  ;;  %v2389_v55 = vmul.f32 1.442695, %v2369_v7  ;;  %vm2353_vm12 = vcmp.gt.f32.partialorder %v8717_v26, 0.0 }
 0x688   :  { %v6982_v42 = vpop.eup %6981  ;;  %v8732_v22 = vpop.f32.mrb[39].mxu0  ;;  %6995 = vpow2.f32 %v2385_v13  ;;  %v2966_v5 = vmul.f32 1.442695, %v2948_v30  ;;  %v2951_v10 = vmin.f32 %v8727_v44, 0.0  ;;  %v2371_v57 = vmin.f32 %v8729_v28, 0.0 }
 0x689   :  { %v6984_v48 = vpop.eup %6983  ;;  %v4447_v53 = vadd.f32 -1.0, %v6982_v42  ;;  %6997 = vpow2.f32 %v2968_v8  ;;  %v2395_v35 = vmul.f32 1.442695, %v2372_v14  ;;  %vm2935_vm11 = vcmp.gt.f32.partialorder %v8727_v44, 0.0 }
 0x68a   :  { %v4446_v63 = vadd.f32 -1.0, %v6984_v48  ;;  %v8737_v49 = vpop.f32.mrb[56].mxu1  ;;  %6999 = vpow2.f32 %v2966_v5  ;;  %v2972_v45 = vmul.f32 1.442695, %v2951_v10  ;;  %v2393_v13 = vmul.f32 1.442695, %v2371_v57 }
 0x68b   :  { %v8740_v23 = vsel %vm1783_vm15, %v8689_v18, %v4447_v53  ;;  %v8742_v51 = vpop.f32.mrb[40].mxu0  ;;  %v8744_v12 = vpop.f32.mrb[57].mxu1  ;;  %7001 = vpow2.f32 %v2391_v62  ;;  %v2374_v4 = vmin.f32 %v8737_v49, 0.0  ;;  %vm2934_vm13 = vcmp.gt.f32.partialorder %v8732_v22, 0.0 }
 0x68c   :  { %v8747_v39 = vsel %vm1782_vm1, %v8692_v0, %v4446_v63  ;;  %v8750_v50 = vpop.f32.mrb[41].mxu0  ;;  %v6986_v18 = vpop.eup %6985  ;;  %7003 = vpow2.f32 %v2389_v55  ;;  %v2950_v0 = vmin.f32 %v8732_v22, 0.0  ;;  %v2953_v63 = vmin.f32 %v8742_v51, 0.0 }
 0x68d   :  { %v6552_v41 = vpack.i.bf16 %v8740_v23, %v8747_v39  ;;  %7005 = vpow2.f32 %v2972_v45  ;;  %v2399_v53 = vmul.f32 1.442695, %v2374_v4  ;;  %v4449_v55 = vadd.f32 -1.0, %v6986_v18  ;;  %v3293_v23 = vld [vmem:[%s9359_s7 + $0x40] sm:$0xff]  ;;  %v3294_v39 = vld [vmem:[%s9359_s7 + $0x48] sm:$0xff] }
 0x68e   :  { %v8755_v60 = vpop.f32.mrb[58].mxu1  ;;  %v6988_v54 = vpop.eup %6987  ;;  %7007 = vpow2.f32 %v2395_v35  ;;  %v2970_v7 = vmul.f32 1.442695, %v2950_v0  ;;  %vm2356_vm14 = vcmp.gt.f32.partialorder %v8724_v27, 0.0  ;;  %vm2355_vm15 = vcmp.gt.f32.partialorder %v8729_v28, 0.0 }
 0x68f   :  { %v8758_v19 = vpop.f32.mrb[42].mxu0  ;;  %v8760_v37 = vpop.f32.mrb[59].mxu1  ;;  %v4465_v11 = vadd.f32 -1.0, %v6988_v54  ;;  %7009 = vpow2.f32 %v2393_v13  ;;  %v2976_v54 = vmul.f32 1.442695, %v2953_v63  ;;  %v2952_v13 = vmin.f32 %v8750_v50, 0.0 }
 0x690   :  { %v6990_v40 = vpop.eup %6989  ;;  %v8765_v56 = vpop.f32.mrb[43].mxu0  ;;  %7011 = vpow2.f32 %v2970_v7  ;;  %vm2358_vm1 = vcmp.gt.f32.partialorder %v8737_v49, 0.0 }
 0x691   :  { %v6992_v24 = vpop.eup %6991  ;;  %v3011_v8 = vsel %vm2931_vm5, %v8703_v20, %v4465_v11  ;;  %7013 = vpow2.f32 %v2399_v53  ;;  %v2373_v20 = vmin.f32 %v8744_v12, 0.0  ;;  %v4448_v35 = vadd.f32 -1.0, %v6990_v40 }
 0x692   :  { %v6994_v42 = vpop.eup %6993  ;;  %v4464_v48 = vadd.f32 -1.0, %v6992_v24  ;;  %7015 = vpow2.f32 %v2976_v54  ;;  %v2430_v53 = vsel %vm2350_vm2, %v8694_v2, %v4449_v55  ;;  %v2955_v2 = vmin.f32 %v8758_v19, 0.0 }
 0x693   :  { %v6996_v30 = vpop.eup %6995  ;;  %v8773_v62 = vpop.f32.mrb[44].mxu0  ;;  %v4451_v0 = vadd.f32 -1.0, %v6994_v42  ;;  %v2397_v11 = vmul.f32 1.442695, %v2373_v20  ;;  %v2974_v42 = vmul.f32 1.442695, %v2952_v13 }
 0x694   :  { %v6998_v14 = vpop.eup %6997  ;;  %v3010_v5 = vsel %vm2930_vm7, %v8708_v32, %v4464_v48  ;;  %v8777_v10 = vpop.f32.mrb[45].mxu0  ;;  %v4450_v4 = vadd.f32 -1.0, %v6996_v30  ;;  %v2429_v30 = vsel %vm2349_vm3, %v8697_v1, %v4448_v35  ;;  %vm2937_vm2 = vcmp.gt.f32.partialorder %v8742_v51, 0.0 }
 0x695   :  { %v6492_v45 = vpack.i.bf16 %v3011_v8, %v3010_v5  ;;  %v4467_v57 = vadd.f32 -1.0, %v6998_v14  ;;  %v7000_v18 = vpop.eup %6999  ;;  %7017 = vpow2.f32 %v2397_v11  ;;  %v2432_v14 = vsel %vm2352_vm4, %v8701_v43, %v4451_v0 }
 0x696   :  { %v7002_v40 = vpop.eup %7001  ;;  %v4466_v7 = vadd.f32 -1.0, %v7000_v18  ;;  %7019 = vpow2.f32 %v2974_v42  ;;  %v2980_v54 = vmul.f32 1.442695, %v2955_v2  ;;  %v2375_v0 = vmin.f32 %v8760_v37, 0.0 }
 0x697   :  { %6493 = vrot.lane.b32.xlu0 %v6492_v45, %s7236_s19  ;;  %v8785_v32 = vpop.f32.mrb[46].mxu0  ;;  %v3013_v24 = vsel %vm2933_vm9, %v8715_v16, %v4467_v57  ;;  %v7004_v48 = vpop.eup %7003  ;;  %v2376_v16 = vmin.f32 %v8755_v60, 0.0  ;;  %v4453_v55 = vadd.f32 -1.0, %v7002_v40  ;;  %vm2357_vm3 = vcmp.gt.f32.partialorder %v8744_v12, 0.0 }
 0x698   :  { %v8788_v8 = vpop.f32.mrb[47].mxu0  ;;  %v7006_v63 = vpop.eup %7005  ;;  %v3012_v5 = vsel %vm2932_vm10, %v8719_v9, %v4466_v7  ;;  %v2431_v9 = vsel %vm2351_vm6, %v8705_v31, %v4450_v4  ;;  %v4452_v18 = vadd.f32 -1.0, %v7004_v48  ;;  %v2401_v7 = vmul.f32 1.442695, %v2375_v0 }
 0x699   :  { %v7008_v1 = vpop.eup %7007  ;;  %v6502_v20 = vpack.i.bf16 %v3013_v24, %v3012_v5  ;;  %v4469_v35 = vadd.f32 -1.0, %v7006_v63  ;;  %v2403_v45 = vmul.f32 1.442695, %v2376_v16  ;;  %v2954_v24 = vmin.f32 %v8765_v56, 0.0 }
 0x69a   :  { %v7010_v43 = vpop.eup %7009  ;;  %v6487_v42 = vpack.i.bf16 %v2430_v53, %v2429_v30  ;;  %v2434_v48 = vsel %vm2354_vm8, %v8712_v58, %v4453_v55  ;;  %v4455_v16 = vadd.f32 -1.0, %v7008_v1  ;;  %vm2936_vm4 = vcmp.gt.f32.partialorder %v8750_v50, 0.0 }
 0x69b   :  { %v7012_v13 = vpop.eup %7011  ;;  %v3015_v40 = vsel %vm2935_vm11, %v8727_v44, %v4469_v35  ;;  %7021 = vpow2.f32 %v2403_v45  ;;  %6503 = vrot.lane.b32.xlu0 %v6502_v20, %s7236_s19  ;;  %v4454_v63 = vadd.f32 -1.0, %v7010_v43  ;;  %v2978_v5 = vmul.f32 1.442695, %v2954_v24 }
 0x69c   :  { %v8809_v57 = vpop.f32.mrb[48].mxu0  ;;  %v7014_v31 = vpop.eup %7013  ;;  %v4468_v4 = vadd.f32 -1.0, %v7012_v13  ;;  %7023 = vpow2.f32 %v2980_v54  ;;  %6488 = vrot.lane.b32.xlu1 %v6487_v42, %s7227_s20  ;;  %v2957_v20 = vmin.f32 %v8773_v62, 0.0  ;;  %v2956_v58 = vmin.f32 %v8777_v10, 0.0  ;;  %v3282_v42 = vld [vmem:[#allocation7 + $0x68] sm:$0xff] }
 0x69d   :  { %v8816_v11 = vpop.f32.mrb[49].mxu0  ;;  %v4457_v2 = vadd.f32 -1.0, %v7014_v31  ;;  %7025 = vpow2.f32 %v2401_v7  ;;  %v7016_v35 = vpop.eup %7015  ;;  %v2433_v30 = vsel %vm2353_vm12, %v8717_v26, %v4452_v18  ;;  %v6497_v55 = vpack.i.bf16 %v2432_v14, %v2431_v9  ;;  %v3281_v7 = vld [vmem:[#allocation7 + $0x60] sm:$0xff] }
 0x69e   :  { %v3014_v44 = vsel %vm2934_vm13, %v8732_v22, %v4468_v4  ;;  %7027 = vpow2.f32 %v2978_v5  ;;  %v4471_v1 = vadd.f32 -1.0, %v7016_v35  ;;  %v2984_v22 = vmul.f32 1.442695, %v2957_v20 }
 0x69f   :  { %v6512_v45 = vpack.i.bf16 %v3015_v40, %v3014_v44  ;;  %v7018_v53 = vpop.eup %7017  ;;  %v2436_v43 = vsel %vm2356_vm14, %v8724_v27, %v4455_v16  ;;  %v2982_v0 = vmul.f32 1.442695, %v2956_v58  ;;  %v2959_v13 = vmin.f32 %v8785_v32, 0.0  ;;  %v3283_v44 = vld [vmem:[#allocation7 + $0x70] sm:$0xff] }
 0x6a0   :  { %v4456_v54 = vadd.f32 -1.0, %v7018_v53  ;;  %v7020_v40 = vpop.eup %7019  ;;  %v2435_v24 = vsel %vm2355_vm15, %v8729_v28, %v4454_v63  ;;  %v2438_v26 = vsel %vm2358_vm1, %v8737_v49, %v4457_v2  ;;  %7029 = vpow2.f32 %v2984_v22  ;;  %6498 = vrot.lane.b32.xlu1 %v6497_v55, %s7227_s20  ;;  %v3284_v2 = vld [vmem:[#allocation7 + $0x78] sm:$0xff] }
 0x6a1   :  { %v2958_v14 = vmin.f32 %v8788_v8, 0.0  ;;  %v3017_v27 = vsel %vm2937_vm2, %v8742_v51, %v4471_v1  ;;  %v4470_v9 = vadd.f32 -1.0, %v7020_v40  ;;  %7031 = vpow2.f32 %v2982_v0 }
 0x6a2   :  { %v2988_v18 = vmul.f32 1.442695, %v2959_v13  ;;  %v2437_v28 = vsel %vm2357_vm3, %v8744_v12, %v4456_v54  ;;  %v2961_v4 = vmin.f32 %v8809_v57, 0.0  ;;  %v6507_v49 = vpack.i.bf16 %v2434_v48, %v2433_v30 }
 0x6a3   :  { %v2986_v31 = vmul.f32 1.442695, %v2958_v14  ;;  %v3016_v63 = vsel %vm2936_vm4, %v8750_v50, %v4470_v9  ;;  %v2960_v51 = vmin.f32 %v8816_v11, 0.0  ;;  %v6517_v5 = vpack.i.bf16 %v2436_v43, %v2435_v24 }
 0x6a4   :  { %7033 = vpow2.f32 %v2988_v18  ;;  %v6522_v35 = vpack.i.bf16 %v3017_v27, %v3016_v63  ;;  %v2992_v58 = vmul.f32 1.442695, %v2961_v4  ;;  %6508 = vrot.lane.b32.xlu0 %v6507_v49, %s7227_s20  ;;  %6513 = vrot.lane.b32.xlu1 %v6512_v45, %s7236_s19  ;;  %v6527_v30 = vpack.i.bf16 %v2438_v26, %v2437_v28 }
 0x6a5   :  { %v7022_v16 = vpop.eup %7021  ;;  %7035 = vpow2.f32 %v2986_v31  ;;  %v2990_v53 = vmul.f32 1.442695, %v2960_v51  ;;  %v6043_v1 = vpack.c.bf16 %v3282_v42, %v3281_v7  ;;  %vm2360_vm5 = vcmp.gt.f32.partialorder %v8755_v60, 0.0 }
 0x6a6   :  { %v7024_v20 = vpop.eup %7023  ;;  %v4459_v12 = vadd.f32 -1.0, %v7022_v16  ;;  %7037 = vpow2.f32 %v2992_v58  ;;  %v6047_v22 = vpack.c.bf16 %v3284_v2, %v3283_v44  ;;  %vm2939_vm6 = vcmp.gt.f32.partialorder %v8758_v19, 0.0 }
 0x6a7   :  { %v4473_v48 = vadd.f32 -1.0, %v7024_v20  ;;  %v7026_v50 = vpop.eup %7025  ;;  %7039 = vpow2.f32 %v2990_v53  ;;  %6044 = vmatprep.subr.bf16.mxu1 %v6043_v1  ;;  %vm2359_vm7 = vcmp.gt.f32.partialorder %v8760_v37, 0.0  ;;  %vm2938_vm8 = vcmp.gt.f32.partialorder %v8765_v56, 0.0 }
 0x6a8   :  { %v7028_v55 = vpop.eup %7027  ;;  %v2440_v43 = vsel %vm2360_vm5, %v8755_v60, %v4459_v12  ;;  %v4458_v54 = vadd.f32 -1.0, %v7026_v50  ;;  %6518 = vrot.lane.b32.xlu1 %v6517_v5, %s7227_s20  ;;  %6523 = vrot.lane.b32.xlu0 %v6522_v35, %s7236_s19  ;;  %vm2941_vm9 = vcmp.gt.f32.partialorder %v8773_v62, 0.0  ;;  %vm2940_vm10 = vcmp.gt.f32.partialorder %v8777_v10, 0.0 }
 0x6a9   :  { %v3019_v0 = vsel %vm2939_vm6, %v8758_v19, %v4473_v48  ;;  %v4472_v45 = vadd.f32 -1.0, %v7028_v55  ;;  %6046 = vmatpush3.bf16.msra.mxu1 %v6043_v1  ;;  %v9561_v31 = vmov 0.0|0.0   ;;  %vm2943_vm11 = vcmp.gt.f32.partialorder %v8785_v32, 0.0 }
 0x6aa   :  { %v2439_v13 = vsel %vm2359_vm7, %v8760_v37, %v4458_v54  ;;  %v7030_v60 = vpop.eup %7029  ;;  %6048 = vmatprep.subr.bf16.mxu1 %v6047_v22  ;;  %vm2942_vm12 = vcmp.gt.f32.partialorder %v8788_v8, 0.0  ;;  %vm2945_vm13 = vcmp.gt.f32.partialorder %v8809_v57, 0.0  ;;  %vm2944_vm14 = vcmp.gt.f32.partialorder %v8816_v11, 0.0 }
 0x6ab   :  { %v3018_v40 = vsel %vm2938_vm8, %v8765_v56, %v4472_v45  ;;  %v6537_v24 = vpack.i.bf16 %v2440_v43, %v2439_v13  ;;  %v7032_v26 = vpop.eup %7031  ;;  %v4475_v19 = vadd.f32 -1.0, %v7030_v60  ;;  %vm1172_vm4 = vcmp.gt.f32.partialorder %v8651_v47, 0.0 }
 0x6ac   :  { %v6532_v14 = vpack.i.bf16 %v3019_v0, %v3018_v40  ;;  %v4474_v27 = vadd.f32 -1.0, %v7032_v26  ;;  %6528 = vrot.lane.b32.xlu0 %v6527_v30, %s7227_s20  ;;  %v3286_v26 = vld [vmem:[%s9359_s7 + $0x8] sm:$0xff]  ;;  %vm1171_vm5 = vcmp.gt.f32.partialorder %v8653_v36, 0.0  ;;  %vm1174_vm6 = vcmp.gt.f32.partialorder %v8656_v52, 0.0 }
 0x6ad   :  { %v3021_v18 = vsel %vm2941_vm9, %v8773_v62, %v4475_v19  ;;  %6050 = vmatpush3.bf16.msra.mxu1 %v6047_v22  ;;  %vm3218_vm7 = vcmask 261120   ;;  %vm1173_vm8 = vcmp.gt.f32.partialorder %v8658_v15, 0.0  ;;  %vm1176_vm9 = vcmp.gt.f32.partialorder %v8660_v46, 0.0 }
 0x6ae   :  { %v7034_v9 = vpop.eup %7033  ;;  %6533 = vrot.lane.b32.xlu1 %v6532_v14, %s7236_s19  ;;  %v3020_v56 = vsel %vm2940_vm10, %v8777_v10, %v4474_v27  ;;  %6083 = vmatprep.subr.bf16.mxu1 %v9561_v31  ;;  %v3287_v14 = vld [vmem:[%s9359_s7 + $0x10] sm:$0xff]  ;;  %vm1175_vm10 = vcmp.gt.f32.partialorder %v8662_v3, 0.0 }
 0x6af   :  { %v7036_v37 = vpop.eup %7035  ;;  %v4477_v28 = vadd.f32 -1.0, %v7034_v9  ;;  %v6542_v4 = vpack.i.bf16 %v3021_v18, %v3020_v56  ;;  %v3288_v18 = vld [vmem:[%s9359_s7 + $0x18] sm:$0xff]  ;;  %v3289_v56 = vld [vmem:[%s9359_s7 + $0x20] sm:$0xff] }
 0x6b0   :  { %v4476_v49 = vadd.f32 -1.0, %v7036_v37  ;;  %v7038_v7 = vpop.eup %7037  ;;  %v6055_v37 = vpack.c.bf16 %v3288_v18, %v3287_v14  ;;  %v1195_v18 = vmin.f32 %v8672_v17, 0.0 }
 0x6b1   :  { %v3023_v42 = vsel %vm2943_vm11, %v8785_v32, %v4477_v28  ;;  %v7040_v16 = vpop.eup %7039  ;;  %v4479_v51 = vadd.f32 -1.0, %v7038_v7  ;;  %6543 = vrot.lane.b32.xlu0 %v6542_v4, %s7236_s19  ;;  %v3290_v28 = vld [vmem:[%s9359_s7 + $0x28] sm:$0xff]  ;;  %vm3235_vm11 = vcmask 523264  }
 0x6b2   :  { %v3022_v63 = vsel %vm2942_vm12, %v8788_v8, %v4476_v49  ;;  %6538 = vrot.lane.b32.xlu1 %v6537_v24, %s7227_s20  ;;  %v4478_v2 = vadd.f32 -1.0, %v7040_v16  ;;  %v3285_v24 = vld [vmem:[%s9359_s7] sm:$0xff]  ;;  %v6059_v7 = vpack.c.bf16 %v3290_v28, %v3289_v56  ;;  %vm3252_vm12 = vcmask 785408  }
 0x6b3   :  { %v6557_v44 = vpack.i.bf16 %v3023_v42, %v3022_v63  ;;  %v3025_v32 = vsel %vm2945_vm13, %v8809_v57, %v4479_v51  ;;  %v6051_v9 = vpack.c.bf16 %v3286_v26, %v3285_v24  ;;  %v3291_v42 = vld [vmem:[%s9359_s7 + $0x30] sm:$0xff]  ;;  %v3296_v51 = vld [vmem:[%s9359_s7 + $0x58] sm:$0xff]  ;;  %v1196_v24 = vmin.f32 %v8670_v21, 0.0 }
 0x6b4   :  { %v5354_v62 = vpop.f32.mrb[60].mxu1  ;;  %v3024_v12 = vsel %vm2944_vm14, %v8816_v11, %v4478_v2  ;;  %v3295_v63 = vld [vmem:[%s9359_s7 + $0x50] sm:$0xff]  ;;  %vm1178_vm13 = vcmp.gt.f32.partialorder %v8665_v61, 0.0  ;;  %vm1177_vm14 = vcmp.gt.f32.partialorder %v8667_v59, 0.0 }
 0x6b5   :  { %v2378_v10 = vmin.f32 %v5354_v62, 0.0  ;;  %v2330_v5 = vpop.f32.mrb[61].mxu1  ;;  %v6567_v48 = vpack.i.bf16 %v3025_v32, %v3024_v12  ;;  %vm2362_vm15 = vcmp.gt.f32.partialorder %v5354_v62, 0.0  ;;  %6052 = vmatprep.subr.bf16.mxu0 %v6051_v9  ;;  %v3300_v32 = vld [vmem:[%s9359_s7 + $0x78] sm:$0xff]  ;;  %v1188_v12 = vmin.f32 %v8651_v47, 0.0 }
 0x6b6   :  { %v2377_v20 = vmin.f32 %v2330_v5, 0.0  ;;  %6558 = vrot.lane.b32.xlu1 %v6557_v44, %s7236_s19  ;;  %vm2361_vm1 = vcmp.gt.f32.partialorder %v2330_v5, 0.0  ;;  %6054 = vmatpush3.bf16.msra.mxu0 %v6051_v9  ;;  %v3298_v44 = vld [vmem:[%s9359_s7 + $0x68] sm:$0xff]  ;;  %v1221_v56 = vmul.f32 1.442695, %v1196_v24 }
 0x6b7   :  { %v2407_v35 = vmul.f32 1.442695, %v2378_v10  ;;  %6056 = vmatprep.subr.bf16.mxu0 %v6055_v37  ;;  %v6071_v10 = vpack.c.bf16 %v3296_v51, %v3295_v63  ;;  %v1197_v51 = vmin.f32 %v8677_v6, 0.0 }
 0x6b8   :  { %v2405_v8 = vmul.f32 1.442695, %v2377_v20  ;;  %v5357_v58 = vpop.f32.mrb[62].mxu1  ;;  %v3299_v20 = vld [vmem:[%s9359_s7 + $0x70] sm:$0xff] }
 0x6b9   :  { %7041 = vpow2.f32 %v2407_v35  ;;  %v2380_v53 = vmin.f32 %v5357_v58, 0.0  ;;  %v2340_v30 = vpop.f32.mrb[63].mxu1  ;;  %vm2364_vm2 = vcmp.gt.f32.partialorder %v5357_v58, 0.0  ;;  %v6079_v35 = vpack.c.bf16 %v3300_v32, %v3299_v20 }
 0x6ba   :  { %7043 = vpow2.f32 %v2405_v8  ;;  %v2379_v50 = vmin.f32 %v2340_v30, 0.0  ;;  %vm2363_vm3 = vcmp.gt.f32.partialorder %v2340_v30, 0.0  ;;  %6058 = vmatpush3.bf16.msra.mxu0 %v6055_v37  ;;  %v1187_v8 = vmin.f32 %v8653_v36, 0.0 }
 0x6bb   :  { %v2411_v1 = vmul.f32 1.442695, %v2380_v53  ;;  %6060 = vmatprep.subr.bf16.mxu0 %v6059_v7  ;;  %v1205_v53 = vmul.f32 1.442695, %v1188_v12 }
 0x6bc   :  { %v2409_v22 = vmul.f32 1.442695, %v2379_v50  ;;  %v1191_v50 = vmin.f32 %v8662_v3, 0.0 }
 0x6bd   :  { %7045 = vpow2.f32 %v2411_v1  ;;  %v1203_v1 = vmul.f32 1.442695, %v1187_v8 }
 0x6be   :  { %7047 = vpow2.f32 %v2409_v22  ;;  %6062 = vmatpush3.bf16.msra.mxu0 %v6059_v7 }
 0x6bf   :  { %7049 = vpow2.f32 %v1205_v53 }
 0x6c0   :  { %7051 = vpow2.f32 %v1203_v1 }
 0x6c3   :  { %v7042_v57 = vpop.eup %7041 }
 0x6c4   :  { %v7044_v55 = vpop.eup %7043  ;;  %v4461_v43 = vadd.f32 -1.0, %v7042_v57 }
 0x6c5   :  { %v4460_v54 = vadd.f32 -1.0, %v7044_v55 }
 0x6c6   :  { %v2442_v11 = vsel %vm2362_vm15, %v5354_v62, %v4461_v43  ;;  %v3292_v62 = vld [vmem:[%s9359_s7 + $0x38] sm:$0xff]  ;;  %v1211_v43 = vmul.f32 1.442695, %v1191_v50  ;;  %vm1180_vm15 = vcmp.gt.f32.partialorder %v8670_v21, 0.0 }
 0x6c7   :  { %v7046_v0 = vpop.eup %7045  ;;  %v2441_v45 = vsel %vm2361_vm1, %v2330_v5, %v4460_v54  ;;  %v6063_v16 = vpack.c.bf16 %v3292_v62, %v3291_v42  ;;  %v3297_v5 = vld [vmem:[%s9359_s7 + $0x60] sm:$0xff]  ;;  %v1194_v54 = vmin.f32 %v8665_v61, 0.0  ;;  %v1198_v62 = vmin.f32 %v8675_v38, 0.0 }
 0x6c8   :  { %v4463_v13 = vadd.f32 -1.0, %v7046_v0  ;;  %v6547_v60 = vpack.i.bf16 %v2442_v11, %v2441_v45  ;;  %v7048_v40 = vpop.eup %7047  ;;  %v6075_v2 = vpack.c.bf16 %v3298_v44, %v3297_v5  ;;  %v8953_v11 = vpop.permute.xlu0 %6453  ;;  %v1193_v0 = vmin.f32 %v8667_v59, 0.0 }
 0x6c9   :  { %v4462_v27 = vadd.f32 -1.0, %v7048_v40  ;;  %6064 = vmatprep.subr.bf16.mxu0 %v6063_v16  ;;  %v1217_v45 = vmul.f32 1.442695, %v1194_v54  ;;  %v7050_v40 = vpop.eup %7049  ;;  %v1225_v32 = vmul.f32 1.442695, %v1198_v62  ;;  %vm1179_vm1 = vcmp.gt.f32.partialorder %v8672_v17, 0.0 }
 0x6ca   :  { %v2444_v19 = vsel %vm2364_vm2, %v5357_v58, %v4463_v13  ;;  %6548 = vrot.lane.b32.xlu0 %v6547_v60, %s7227_s20  ;;  %6066 = vmatpush3.bf16.msra.mxu0 %v6063_v16  ;;  %v1190_v58 = vmin.f32 %v8656_v52, 0.0  ;;  %v1215_v60 = vmul.f32 1.442695, %v1193_v0  ;;  %v7052_v14 = vpop.eup %7051  ;;  %vm1182_vm2 = vcmp.gt.f32.partialorder %v8675_v38, 0.0 }
 0x6cb   :  { %v2443_v4 = vsel %vm2363_vm3, %v2340_v30, %v4462_v27  ;;  %v1192_v30 = vmin.f32 %v8660_v46, 0.0  ;;  %v4416_v7 = vadd.f32 -1.0, %v7052_v14  ;;  %vm1181_vm3 = vcmp.gt.f32.partialorder %v8677_v6, 0.0 }
 0x6cc   :  { %v6562_v49 = vpack.i.bf16 %v2444_v19, %v2443_v4  ;;  %v1209_v22 = vmul.f32 1.442695, %v1190_v58  ;;  %v8956_v13 = vpop.permute.xlu0 %6458  ;;  %v8961_v19 = vpop.permute.xlu1 %6463 }
 0x6cd   :  { %v1213_v55 = vmul.f32 1.442695, %v1192_v30  ;;  %v1251_v44 = vsel %vm1171_vm5, %v8653_v36, %v4416_v7  ;;  %v6455_v36 = vunpack.i.l.bf16 %v8953_v11  ;;  %vm1183_vm5 = vcmp.gt.f32.partialorder %v8681_v33, 0.0 }
 0x6ce   :  { %6553 = vrot.lane.b32.xlu0 %v6552_v41, %s7237_s0  ;;  %6563 = vrot.lane.b32.xlu1 %v6562_v49, %s7227_s20  ;;  %v6067_v41 = vpack.c.bf16 %v3294_v39, %v3293_v23  ;;  %7053 = vpow2.f32 %v1209_v22  ;;  %v4417_v49 = vadd.f32 -1.0, %v7050_v40  ;;  %v1219_v39 = vmul.f32 1.442695, %v1195_v18 }
 0x6cf   :  { %v6466_v18 = vunpack.i.h.bf16 %v8961_v19 }
 0x6d0   :  { %6068 = vmatprep.subr.bf16.mxu0 %v6067_v41  ;;  %v8959_v26 = vpop.permute.xlu0 %6468  ;;  %v1252_v5 = vsel %vm1172_vm4, %v8651_v47, %v4417_v49  ;;  %v6456_v47 = vunpack.i.h.bf16 %v8953_v11  ;;  %vm1184_vm4 = vcmp.gt.f32.partialorder %v8679_v29, 0.0 }
 0x6d1   :  { %6070 = vmatpush3.bf16.msra.mxu0 %v6067_v41 }
 0x6d2   :  { %6568 = vrot.lane.b32.xlu0 %v6567_v48, %s7236_s19  ;;  %6072 = vmatprep.subr.bf16.mxu0 %v6071_v10  ;;  %v1189_v48 = vmin.f32 %v8658_v15, 0.0 }
 0x6d4   :  { %v1207_v57 = vmul.f32 1.442695, %v1189_v48  ;;  %v1223_v48 = vmul.f32 1.442695, %v1197_v51 }
 0x6d5   :  { %6074 = vmatpush3.bf16.msra.mxu0 %v6071_v10 }
 0x6d6   :  { %6076 = vmatprep.subr.bf16.mxu0 %v6075_v2  ;;  %7055 = vpow2.f32 %v1207_v57 }
 0x6d7   :  { %7057 = vpow2.f32 %v1213_v55 }
 0x6d8   :  { %7059 = vpow2.f32 %v1211_v43  ;;  %v7054_v27 = vpop.eup %7053  ;;  %v3220_v43 = vsel %vm3218_vm7, %v1252_v5, %v6456_v47 }
 0x6d9   :  { %6078 = vmatpush3.bf16.msra.mxu0 %v6075_v2  ;;  %7061 = vpow2.f32 %v1217_v45  ;;  %v4419_v16 = vadd.f32 -1.0, %v7054_v27 }
 0x6da   :  { %6080 = vmatprep.subr.bf16.mxu0 %v6079_v35  ;;  %7063 = vpow2.f32 %v1215_v60 }
 0x6db   :  { %7065 = vpow2.f32 %v1221_v56 }
 0x6dc   :  { %7067 = vpow2.f32 %v1219_v39 }
 0x6dd   :  { %6082 = vmatpush3.bf16.msra.mxu0 %v6079_v35  ;;  %v1254_v35 = vsel %vm1174_vm6, %v8656_v52, %v4419_v16  ;;  %7069 = vpow2.f32 %v1225_v32  ;;  %vm1186_vm6 = vcmp.gt.f32.partialorder %v8685_v25, 0.0 }
 0x6de   :  { %6107 = vmatprep.subr.bf16.mxu0 %v9561_v31  ;;  %7071 = vpow2.f32 %v1223_v48 }
 0x6e0   :  { %v7056_v9 = vpop.eup %7055  ;;  %v8966_v42 = vpop.permute.xlu1 %6473 }
 0x6e1   :  { %v7058_v37 = vpop.eup %7057  ;;  %v4418_v23 = vadd.f32 -1.0, %v7056_v9 }
 0x6e2   :  { %v7060_v4 = vpop.eup %7059  ;;  %v4421_v41 = vadd.f32 -1.0, %v7058_v37  ;;  %v6465_v37 = vunpack.i.l.bf16 %v8961_v19 }
 0x6e3   :  { %v4420_v63 = vadd.f32 -1.0, %v7060_v4  ;;  %v7062_v20 = vpop.eup %7061  ;;  %v1253_v12 = vsel %vm1173_vm8, %v8658_v15, %v4418_v23  ;;  %v6461_v15 = vunpack.i.h.bf16 %v8956_v13  ;;  %vm1185_vm8 = vcmp.gt.f32.partialorder %v8687_v34, 0.0 }
 0x6e4   :  { %v8964_v28 = vpop.permute.xlu0 %6478  ;;  %v1256_v8 = vsel %vm1176_vm9, %v8660_v46, %v4421_v41  ;;  %v7064_v53 = vpop.eup %7063  ;;  %v4423_v30 = vadd.f32 -1.0, %v7062_v20  ;;  %v6460_v46 = vunpack.i.l.bf16 %v8956_v13  ;;  %v6470_v20 = vunpack.i.l.bf16 %v8959_v26 }
 0x6e5   :  { %v1255_v58 = vsel %vm1175_vm10, %v8662_v3, %v4420_v63  ;;  %v3219_v3 = vsel %vm3218_vm7, %v1251_v44, %v6455_v36  ;;  %v4422_v54 = vadd.f32 -1.0, %v7064_v53  ;;  %v7066_v27 = vpop.eup %7065  ;;  %v3222_v4 = vsel %vm3218_vm7, %v1254_v35, %v6461_v15 }
 0x6e6   :  { %v3221_v56 = vsel %vm3218_vm7, %v1253_v12, %v6460_v46  ;;  %v1258_v49 = vsel %vm1178_vm13, %v8665_v61, %v4423_v30  ;;  %v7068_v23 = vpop.eup %7067  ;;  %v4425_v39 = vadd.f32 -1.0, %v7066_v27  ;;  %v3223_v32 = vsel %vm3218_vm7, %v1255_v58, %v6465_v37 }
 0x6e7   :  { %v1257_v7 = vsel %vm1177_vm14, %v8667_v59, %v4422_v54  ;;  %v6471_v59 = vunpack.i.h.bf16 %v8959_v26  ;;  %v3224_v35 = vsel %vm3218_vm7, %v1256_v8, %v6466_v18  ;;  %v7070_v47 = vpop.eup %7069  ;;  %v4424_v36 = vadd.f32 -1.0, %v7068_v23 }
 0x6e8   :  { %v1260_v53 = vsel %vm1180_vm15, %v8670_v21, %v4425_v39  ;;  %v3225_v21 = vsel %vm3218_vm7, %v1257_v7, %v6470_v20 }
 0x6e9   :  { %v3226_v15 = vsel %vm3218_vm7, %v1258_v49, %v6471_v59  ;;  %v1259_v46 = vsel %vm1179_vm1, %v8672_v17, %v4424_v36 }
 0x6f8   :  { %v8975_v2 = vpop.permute.xlu1 %6483 }
 0x709   :  { %v6494_v10 = vpop.permute.xlu0 %6493 }
 0x70a   :  { %v6496_v50 = vunpack.i.h.bf16 %v6494_v10  ;;  %v6495_v22 = vunpack.i.l.bf16 %v6494_v10 }
 0x70d   :  { %v6504_v55 = vpop.permute.xlu0 %6503 }
 0x70e   :  { %v6489_v1 = vpop.permute.xlu1 %6488  ;;  %v6506_v60 = vunpack.i.h.bf16 %v6504_v55  ;;  %v6505_v40 = vunpack.i.l.bf16 %v6504_v55  ;;  %v6476_v55 = vunpack.i.h.bf16 %v8966_v42 }
 0x70f   :  { %v6491_v52 = vunpack.i.h.bf16 %v6489_v1  ;;  %v6490_v57 = vunpack.i.l.bf16 %v6489_v1  ;;  %v7072_v1 = vpop.eup %7071 }
 0x710   :  { %v3228_v37 = vsel %vm3218_vm7, %v1260_v53, %v6476_v55 }
 0x711   :  { %v3237_v11 = vsel %vm3235_vm11, %v3220_v43, %v6491_v52  ;;  %v3236_v0 = vsel %vm3235_vm11, %v3219_v3, %v6490_v57  ;;  %v6475_v43 = vunpack.i.l.bf16 %v8966_v42 }
 0x712   :  { %v6499_v45 = vpop.permute.xlu1 %6498  ;;  %v3253_v24 = vsel %vm3252_vm12, %v3236_v0, %v6495_v22  ;;  %v3254_v14 = vsel %vm3252_vm12, %v3237_v11, %v6496_v50  ;;  %v1200_v11 = vmin.f32 %v8679_v29, 0.0  ;;  %v1199_v0 = vmin.f32 %v8681_v33, 0.0 }
 0x713   :  { %v6501_v13 = vunpack.i.h.bf16 %v6499_v45  ;;  %v6500_v9 = vunpack.i.l.bf16 %v6499_v45  ;;  %5446 = vmatprep.mubr.f32.mxu1 %v3253_v24  ;;  %v4426_v24 = vadd.f32 -1.0, %v7072_v1  ;;  %v3227_v18 = vsel %vm3218_vm7, %v1259_v46, %v6475_v43 }
 0x714   :  { %5447 = vmatmul.mubr.f32.vlgmr.msra.gmra.mrb[64].mxu1 %v3254_v14  ;;  %v6486_v1 = vunpack.i.h.bf16 %v8975_v2 }
 0x715   :  { %v3238_v62 = vsel %vm3235_vm11, %v3221_v56, %v6500_v9  ;;  %v3239_v16 = vsel %vm3235_vm11, %v3222_v4, %v6501_v13  ;;  %v6481_v56 = vunpack.i.h.bf16 %v8964_v28  ;;  %v6480_v4 = vunpack.i.l.bf16 %v8964_v28 }
 0x716   :  { %v6514_v41 = vpop.permute.xlu1 %6513  ;;  %v6509_v63 = vpop.permute.xlu0 %6508  ;;  %v3255_v19 = vsel %vm3252_vm12, %v3238_v62, %v6505_v40  ;;  %v3256_v51 = vsel %vm3252_vm12, %v3239_v16, %v6506_v60  ;;  %v4427_v40 = vadd.f32 -1.0, %v7070_v47  ;;  %v1229_v62 = vmul.f32 1.442695, %v1200_v11 }
 0x717   :  { %v6516_v10 = vunpack.i.h.bf16 %v6514_v41  ;;  %v6515_v5 = vunpack.i.l.bf16 %v6514_v41  ;;  %v6511_v44 = vunpack.i.h.bf16 %v6509_v63  ;;  %v6510_v61 = vunpack.i.l.bf16 %v6509_v63  ;;  %5449 = vmatprep.mubr.f32.mxu1 %v3255_v19 }
 0x718   :  { %5450 = vmatmul.mubr.f32.gmra.mrb[66].mxu1 %v3256_v51  ;;  %v1227_v16 = vmul.f32 1.442695, %v1199_v0  ;;  %v1262_v41 = vsel %vm1182_vm2, %v8675_v38, %v4427_v40  ;;  %v1261_v63 = vsel %vm1181_vm3, %v8677_v6, %v4426_v24  ;;  %v1202_v28 = vmin.f32 %v8685_v25, 0.0 }
 0x719   :  { %v3240_v12 = vsel %vm3235_vm11, %v3223_v32, %v6510_v61  ;;  %v3241_v48 = vsel %vm3235_vm11, %v3224_v35, %v6511_v44  ;;  %v1201_v19 = vmin.f32 %v8687_v34, 0.0  ;;  %v3229_v20 = vsel %vm3218_vm7, %v1261_v63, %v6480_v4 }
 0x71a   :  { %v6519_v26 = vpop.permute.xlu1 %6518  ;;  %v6524_v30 = vpop.permute.xlu0 %6523  ;;  %v3257_v58 = vsel %vm3252_vm12, %v3240_v12, %v6515_v5  ;;  %v3258_v8 = vsel %vm3252_vm12, %v3241_v48, %v6516_v10  ;;  %v3230_v38 = vsel %vm3218_vm7, %v1262_v41, %v6481_v56  ;;  %7073 = vpow2.f32 %v1229_v62 }
 0x71b   :  { %v6521_v50 = vunpack.i.h.bf16 %v6519_v26  ;;  %v6520_v22 = vunpack.i.l.bf16 %v6519_v26  ;;  %v6526_v52 = vunpack.i.h.bf16 %v6524_v30  ;;  %v6525_v57 = vunpack.i.l.bf16 %v6524_v30  ;;  %5452 = vmatprep.mubr.f32.mxu1 %v3257_v58 }
 0x71c   :  { %5453 = vmatmul.mubr.f32.gmra.mrb[68].mxu1 %v3258_v8  ;;  %7075 = vpow2.f32 %v1227_v16  ;;  %v1233_v35 = vmul.f32 1.442695, %v1202_v28  ;;  %v1231_v12 = vmul.f32 1.442695, %v1201_v19 }
 0x71d   :  { %v3242_v3 = vsel %vm3235_vm11, %v3225_v21, %v6520_v22  ;;  %v3243_v54 = vsel %vm3235_vm11, %v3226_v15, %v6521_v50  ;;  %v6485_v50 = vunpack.i.l.bf16 %v8975_v2 }
 0x71e   :  { %v6529_v42 = vpop.permute.xlu0 %6528  ;;  %v3259_v45 = vsel %vm3252_vm12, %v3242_v3, %v6525_v57  ;;  %v3260_v60 = vsel %vm3252_vm12, %v3243_v54, %v6526_v52  ;;  %7077 = vpow2.f32 %v1233_v35 }
 0x71f   :  { %v6531_v27 = vunpack.i.h.bf16 %v6529_v42  ;;  %v6530_v17 = vunpack.i.l.bf16 %v6529_v42  ;;  %5455 = vmatprep.mubr.f32.mxu1 %v3259_v45  ;;  %7079 = vpow2.f32 %v1231_v12 }
 0x720   :  { %v6534_v14 = vpop.permute.xlu1 %6533  ;;  %5456 = vmatmul.mubr.f32.gmra.mrb[70].mxu1 %v3260_v60 }
 0x721   :  { %v6536_v13 = vunpack.i.h.bf16 %v6534_v14  ;;  %v6535_v9 = vunpack.i.l.bf16 %v6534_v14  ;;  %v3244_v49 = vsel %vm3235_vm11, %v3227_v18, %v6530_v17  ;;  %v3245_v7 = vsel %vm3235_vm11, %v3228_v37, %v6531_v27 }
 0x723   :  { %v3261_v23 = vsel %vm3252_vm12, %v3244_v49, %v6535_v9  ;;  %v3262_v39 = vsel %vm3252_vm12, %v3245_v7, %v6536_v13  ;;  %v6544_v10 = vpop.permute.xlu0 %6543 }
 0x724   :  { %v6539_v51 = vpop.permute.xlu1 %6538  ;;  %5458 = vmatprep.mubr.f32.mxu1 %v3261_v23  ;;  %v6546_v61 = vunpack.i.h.bf16 %v6544_v10  ;;  %v6545_v59 = vunpack.i.l.bf16 %v6544_v10  ;;  %v7074_v48 = vpop.eup %7073 }
 0x725   :  { %v6541_v5 = vunpack.i.h.bf16 %v6539_v51  ;;  %v6540_v44 = vunpack.i.l.bf16 %v6539_v51  ;;  %5459 = vmatmul.mubr.f32.gmra.mrb[72].mxu1 %v3262_v39  ;;  %v4429_v26 = vadd.f32 -1.0, %v7074_v48 }
 0x726   :  { %v7076_v53 = vpop.eup %7075 }
 0x727   :  { %v3246_v32 = vsel %vm3235_vm11, %v3229_v20, %v6540_v44  ;;  %v3247_v6 = vsel %vm3235_vm11, %v3230_v38, %v6541_v5  ;;  %v4428_v30 = vadd.f32 -1.0, %v7076_v53  ;;  %v1264_v52 = vsel %vm1184_vm4, %v8679_v29, %v4429_v26 }
 0x728   :  { %v3263_v47 = vsel %vm3252_vm12, %v3246_v32, %v6545_v59  ;;  %v3264_v36 = vsel %vm3252_vm12, %v3247_v6, %v6546_v61  ;;  %v7078_v58 = vpop.eup %7077  ;;  %v6559_v22 = vpop.permute.xlu1 %6558  ;;  %v3232_v2 = vsel %vm3218_vm7, %v1264_v52, %v6486_v1 }
 0x729   :  { %5461 = vmatprep.mubr.f32.mxu1 %v3263_v47  ;;  %v7080_v8 = vpop.eup %7079  ;;  %v1263_v57 = vsel %vm1183_vm5, %v8681_v33, %v4428_v30  ;;  %v4431_v43 = vadd.f32 -1.0, %v7078_v58  ;;  %v6561_v3 = vunpack.i.h.bf16 %v6559_v22  ;;  %v6560_v54 = vunpack.i.l.bf16 %v6559_v22 }
 0x72a   :  { %5462 = vmatmul.mubr.f32.gmra.mrb[74].mxu1 %v3264_v36  ;;  %v4430_v21 = vadd.f32 -1.0, %v7080_v8  ;;  %v3231_v11 = vsel %vm3218_vm7, %v1263_v57, %v6485_v50 }
 0x72b   :  { %v1266_v14 = vsel %vm1186_vm6, %v8685_v25, %v4431_v43 }
 0x72c   :  { %v1265_v27 = vsel %vm1185_vm8, %v8687_v34, %v4430_v21  ;;  %v9562_v34 = vmov 0.0  }
 0x73c   :  { %v6549_v55 = vpop.permute.xlu0 %6548 }
 0x73d   :  { %v6551_v15 = vunpack.i.h.bf16 %v6549_v55  ;;  %v6550_v46 = vunpack.i.l.bf16 %v6549_v55  ;;  %v3301_v55 = vld [vmem:[%s9360_s8] sm:$0xf] }
 0x73f   :  { %v3248_v0 = vsel %vm3235_vm11, %v3231_v11, %v6550_v46  ;;  %v3249_v42 = vsel %vm3235_vm11, %v3232_v2, %v6551_v15 }
 0x740   :  { %v6554_v45 = vpop.permute.xlu0 %6553  ;;  %v3265_v29 = vsel %vm3252_vm12, %v3248_v0, %v6560_v54  ;;  %v3266_v33 = vsel %vm3252_vm12, %v3249_v42, %v6561_v3  ;;  %v6564_v60 = vpop.permute.xlu1 %6563 }
 0x741   :  { %v6556_v40 = vunpack.i.h.bf16 %v6554_v45  ;;  %v6555_v24 = vunpack.i.l.bf16 %v6554_v45  ;;  %5464 = vmatprep.mubr.f32.mxu1 %v3265_v29  ;;  %v6566_v17 = vunpack.i.h.bf16 %v6564_v60  ;;  %v6565_v13 = vunpack.i.l.bf16 %v6564_v60 }
 0x742   :  { %5465 = vmatmul.mubr.f32.gmra.mrb[76].mxu1 %v3266_v33 }
 0x743   :  { %v3233_v9 = vsel %vm3218_vm7, %v1265_v27, %v6555_v24  ;;  %v3234_v18 = vsel %vm3218_vm7, %v1266_v14, %v6556_v40 }
 0x744   :  { %v6569_v37 = vpop.permute.xlu0 %6568  ;;  %v3250_v49 = vsel %vm3235_vm11, %v3233_v9, %v6565_v13  ;;  %v3251_v7 = vsel %vm3235_vm11, %v3234_v18, %v6566_v17 }
 0x745   :  { %v6571_v56 = vunpack.i.h.bf16 %v6569_v37  ;;  %v6570_v4 = vunpack.i.l.bf16 %v6569_v37  ;;  %v3304_v37 = vld [vmem:[%s9362_s10] sm:$0xf] }
 0x747   :  { %v3267_v62 = vsel %vm3252_vm12, %v3250_v49, %v6570_v4  ;;  %v3268_v25 = vsel %vm3252_vm12, %v3251_v7, %v6571_v56  ;;  %v3305_v49 = vunpack.c.l.bf16 %v3304_v37 }
 0x748   :  { %5467 = vmatprep.mubr.f32.mxu1 %v3267_v62 }
 0x749   :  { %5468 = vmatmul.mubr.f32.gmra.mrb[78].mxu1 %v3268_v25 }
 0x74a   :  { %5558 = vmatprep.mubr.msk.f32.mxu1 %vm7234_vm0, %v9562_v34 }
 0x7e7   :  { %v5448_v16 = vpop.f32.mrb[64].mxu1 }
 0x7e8   :  { %v3372_v23 = vpop.f32.mrb[65].mxu1 }
 0x7e9   :  { %5502 = vmatprep.mubr.f32.mxu0 %v3372_v23  ;;  %v9080_v39 = vpack.c.bf16 %v5448_v16, %v3372_v23  ;;  %v9082_v41 = vpack.i.bf16 %v5448_v16, %v3372_v23  ;;  %v9563_v23 = vmov 2  }
 0x7ea   :  { %5503 = vmatmul.mubr.f32.vlgmr.msra.gmra.mrb[50].mxu0 %v5448_v16 }
 0x7eb   :  { %v5451_v63 = vpop.f32.mrb[66].mxu1  ;;  %6085 = vmatpush3.bf16.xpose.msra.mxu1 %v9080_v39 }
 0x7ec   :  { %v3382_v28 = vpop.f32.mrb[67].mxu1  ;;  %6086 = vmatprep.subr.bf16.mxu1 %v9561_v31 }
 0x7ed   :  { %5505 = vmatprep.mubr.f32.mxu0 %v3382_v28  ;;  %v9086_v19 = vpack.c.bf16 %v5451_v63, %v3382_v28  ;;  %v9088_v51 = vpack.i.bf16 %v5451_v63, %v3382_v28 }
 0x7ee   :  { %5506 = vmatmul.mubr.f32.gmra.mrb[52].mxu0 %v5451_v63  ;;  %v9565_v63 = vld [vmem:[#allocation30_spill] sm:$0xff] }
 0x7ef   :  { %v5454_v10 = vpop.f32.mrb[68].mxu1  ;;  %v9566_v28 = vsub.s32 1, %v9565_v63 }
 0x7f0   :  { %v3392_v5 = vpop.f32.mrb[69].mxu1 }
 0x7f1   :  { %5508 = vmatprep.mubr.f32.mxu0 %v3392_v5  ;;  %v9090_v44 = vpack.c.bf16 %v5454_v10, %v3392_v5  ;;  %v9092_v61 = vpack.i.bf16 %v5454_v10, %v3392_v5 }
 0x7f2   :  { %5509 = vmatmul.mubr.f32.gmra.mrb[54].mxu0 %v5454_v10  ;;  %v9567_v10 = vsub.s32 0, %v9565_v63 }
 0x7f3   :  { %6088 = vmatpush3.bf16.xpose.msra.mxu1 %v9086_v19  ;;  %v5457_v59 = vpop.f32.mrb[70].mxu1 }
 0x7f4   :  { %v3402_v20 = vpop.f32.mrb[71].mxu1  ;;  %6089 = vmatprep.subr.bf16.mxu1 %v9561_v31 }
 0x7f5   :  { %5511 = vmatprep.mubr.f32.mxu0 %v3402_v20  ;;  %v9096_v38 = vpack.c.bf16 %v5457_v59, %v3402_v20  ;;  %v9098_v32 = vpack.i.bf16 %v5457_v59, %v3402_v20 }
 0x7f6   :  { %5512 = vmatmul.mubr.f32.gmra.mrb[56].mxu0 %v5457_v59 }
 0x7f8   :  { %v5460_v6 = vpop.f32.mrb[72].mxu1 }
 0x7f9   :  { %v3412_v35 = vpop.f32.mrb[73].mxu1 }
 0x7fa   :  { %5514 = vmatprep.mubr.f32.mxu0 %v3412_v35  ;;  %v9100_v47 = vpack.c.bf16 %v5460_v6, %v3412_v35  ;;  %v9102_v36 = vpack.i.bf16 %v5460_v6, %v3412_v35 }
 0x7fb   :  { %5515 = vmatmul.mubr.f32.gmra.mrb[58].mxu0 %v5460_v6  ;;  %6091 = vmatpush3.bf16.xpose.msra.mxu1 %v9090_v44 }
 0x7fc   :  { %6092 = vmatprep.subr.bf16.mxu1 %v9561_v31 }
 0x7fd   :  { %v5463_v12 = vpop.f32.mrb[74].mxu1 }
 0x7fe   :  { %v3422_v48 = vpop.f32.mrb[75].mxu1 }
 0x7ff   :  { %5517 = vmatprep.mubr.f32.mxu0 %v3422_v48  ;;  %v9106_v53 = vpack.c.bf16 %v5463_v12, %v3422_v48  ;;  %v9108_v26 = vpack.i.bf16 %v5463_v12, %v3422_v48 }
 0x800   :  { %5518 = vmatmul.mubr.f32.gmra.mrb[60].mxu0 %v5463_v12 }
 0x803   :  { %6094 = vmatpush3.bf16.xpose.msra.mxu1 %v9096_v38 }
 0x804   :  { %6095 = vmatprep.subr.bf16.mxu1 %v9561_v31 }
 0x80b   :  { %6097 = vmatpush3.bf16.xpose.msra.mxu1 %v9100_v47 }
 0x80c   :  { %6098 = vmatprep.subr.bf16.mxu1 %v9561_v31 }
 0x813   :  { %6100 = vmatpush3.bf16.xpose.msra.mxu1 %v9106_v53 }
 0x814   :  { %6101 = vmatprep.subr.bf16.mxu1 %v9561_v31 }
 0x815   :  { %v5466_v30 = vpop.f32.mrb[76].mxu1 }
 0x816   :  { %v3432_v58 = vpop.f32.mrb[77].mxu1 }
 0x817   :  { %5520 = vmatprep.mubr.f32.mxu0 %v3432_v58  ;;  %v9115_v8 = vpack.c.bf16 %v5466_v30, %v3432_v58  ;;  %v9117_v1 = vpack.i.bf16 %v5466_v30, %v3432_v58 }
 0x818   :  { %5521 = vmatmul.mubr.f32.gmra.mrb[62].mxu0 %v5466_v30 }
 0x81b   :  { %6103 = vmatpush3.bf16.xpose.msra.mxu1 %v9115_v8 }
 0x81c   :  { %v5469_v50 = vpop.f32.mrb[78].mxu1  ;;  %6104 = vmatprep.subr.bf16.mxu1 %v9561_v31 }
 0x81d   :  { %v3442_v22 = vpop.f32.mrb[79].mxu1 }
 0x81e   :  { %5523 = vmatprep.mubr.f32.mxu0 %v3442_v22  ;;  %v9120_v52 = vpack.c.bf16 %v5469_v50, %v3442_v22  ;;  %v9122_v57 = vpack.i.bf16 %v5469_v50, %v3442_v22 }
 0x81f   :  { %5524 = vmatmul.mubr.f32.gmra.mrb[64].mxu0 %v5469_v50 }
 0x820   :  { %5593 = vmatprep.mubr.msk.f32.mxu0 %vm7234_vm0, %v9562_v34 }
 0x823   :  { %6106 = vmatpush3.bf16.xpose.msra.mxu1 %v9120_v52 }
 0x824   :  { %6155 = vmatprep.subr.bf16.mxu1 %v9561_v31 }
 0x82a   :  { %5559 = vmatmul.mubr.f32.vlgmr.msra.gmra.mrb[80].mxu1 %v3301_v55 }
 0x82b   :  { %5663 = vmatprep.mubr.msk.f32.mxu1 %vm7234_vm0, %v9562_v34 }
 0x8bd   :  { %v5504_v43 = vpop.f32.mrb[50].mxu0 }
 0x8be   :  { %v3517_v21 = vpop.f32.mrb[51].mxu0 }
 0x8bf   :  { %v6108_v15 = vpack.c.bf16 %v5504_v43, %v3517_v21 }
 0x8c1   :  { %v5507_v46 = vpop.f32.mrb[52].mxu0  ;;  %6109 = vmatpush3.bf16.msra.mxu0 %v6108_v15 }
 0x8c2   :  { %v3527_v3 = vpop.f32.mrb[53].mxu0  ;;  %6110 = vmatprep.subr.bf16.mxu0 %v9561_v31 }
 0x8c3   :  { %v6111_v54 = vpack.c.bf16 %v5507_v46, %v3527_v3 }
 0x8c5   :  { %6112 = vmatpush3.bf16.msra.mxu0 %v6111_v54  ;;  %v5510_v11 = vpop.f32.mrb[54].mxu0 }
 0x8c6   :  { %v3537_v2 = vpop.f32.mrb[55].mxu0  ;;  %6113 = vmatprep.subr.bf16.mxu0 %v9561_v31 }
 0x8c7   :  { %v6114_v0 = vpack.c.bf16 %v5510_v11, %v3537_v2  ;;  %v9568_v2 = vsub.s32 2, %v9565_v63 }
 0x8c9   :  { %v5513_v42 = vpop.f32.mrb[56].mxu0  ;;  %6115 = vmatpush3.bf16.msra.mxu0 %v6114_v0 }
 0x8ca   :  { %v3547_v45 = vpop.f32.mrb[57].mxu0  ;;  %6116 = vmatprep.subr.bf16.mxu0 %v9561_v31 }
 0x8cb   :  { %v6117_v29 = vpack.c.bf16 %v5513_v42, %v3547_v45 }
 0x8cd   :  { %6118 = vmatpush3.bf16.msra.mxu0 %v6117_v29 }
 0x8ce   :  { %v5516_v33 = vpop.f32.mrb[58].mxu0  ;;  %6119 = vmatprep.subr.bf16.mxu0 %v9561_v31 }
 0x8cf   :  { %v3557_v60 = vpop.f32.mrb[59].mxu0 }
 0x8d0   :  { %v6120_v40 = vpack.c.bf16 %v5516_v33, %v3557_v60 }
 0x8d2   :  { %6121 = vmatpush3.bf16.msra.mxu0 %v6120_v40 }
 0x8d3   :  { %v5519_v24 = vpop.f32.mrb[60].mxu0  ;;  %6122 = vmatprep.subr.bf16.mxu0 %v9561_v31 }
 0x8d4   :  { %v3567_v14 = vpop.f32.mrb[61].mxu0 }
 0x8d5   :  { %v6123_v27 = vpack.c.bf16 %v5519_v24, %v3567_v14 }
 0x8d7   :  { %6124 = vmatpush3.bf16.msra.mxu0 %v6123_v27 }
 0x8d8   :  { %6125 = vmatprep.subr.bf16.mxu0 %v9561_v31 }
 0x8eb   :  { %v5522_v17 = vpop.f32.mrb[62].mxu0 }
 0x8ec   :  { %v3577_v13 = vpop.f32.mrb[63].mxu0 }
 0x8ed   :  { %v6126_v9 = vpack.c.bf16 %v5522_v17, %v3577_v13  ;;  %v9569_v17 = vsub.s32 3, %v9565_v63 }
 0x8ef   :  { %6127 = vmatpush3.bf16.msra.mxu0 %v6126_v9 }
 0x8f0   :  { %6128 = vmatprep.subr.bf16.mxu0 %v9561_v31 }
 0x8f2   :  { %v5525_v18 = vpop.f32.mrb[64].mxu0 }
 0x8f3   :  { %v3587_v56 = vpop.f32.mrb[65].mxu0 }
 0x8f4   :  { %v6129_v4 = vpack.c.bf16 %v5525_v18, %v3587_v56 }
 0x8f6   :  { %6130 = vmatpush3.bf16.msra.mxu0 %v6129_v4 }
 0x8f7   :  { %6131 = vmatprep.subr.bf16.mxu0 %v9561_v31 }
 0x8f9   :  { %5594 = vmatmul.mubr.f32.vlgmr.msra.gmra.mrb[66].mxu0 %v3305_v49 }
 0x8fa   :  { %6133 = vmatpush3.bf16.msra.mxu0 %v9080_v39  ;;  %5628 = vmatprep.mubr.msk.f32.mxu0 %vm7234_vm0, %v9562_v34  ;;  %v9564_v39 = vmov 3  }
 0x8fb   :  { %6134 = vmatprep.subr.bf16.mxu0 %v9561_v31 }
 0x8fd   :  { %v9164_v7 = vpop.f32.mrb[80].mxu1 }
 0x8fe   :  { %6136 = vmatpush3.bf16.msra.mxu0 %v9086_v19  ;;  %v5560_v62 = vpop.f32.mrb[81].mxu1  ;;  %v3842_v19 = vrot.slane %v9164_v7, %v9566_v28  ;;  %v4004_v0 = vrot.slane %v9164_v7, %v9568_v2  ;;  %v4150_v13 = vrot.slane %v9164_v7, %v9569_v17 }
 0x8ff   :  { %6137 = vmatprep.subr.bf16.mxu0 %v9561_v31 }
 0x902   :  { %6139 = vmatpush3.bf16.msra.mxu0 %v9090_v44 }
 0x903   :  { %6140 = vmatprep.subr.bf16.mxu0 %v9561_v31 }
 0x906   :  { %6142 = vmatpush3.bf16.msra.mxu0 %v9096_v38 }
 0x907   :  { %6143 = vmatprep.subr.bf16.mxu0 %v9561_v31 }
 0x90a   :  { %6145 = vmatpush3.bf16.msra.mxu0 %v9100_v47 }
 0x90b   :  { %6146 = vmatprep.subr.bf16.mxu0 %v9561_v31 }
 0x90e   :  { %6148 = vmatpush3.bf16.msra.mxu0 %v9106_v53 }
 0x90f   :  { %6149 = vmatprep.subr.bf16.mxu0 %v9561_v31 }
 0x912   :  { %6151 = vmatpush3.bf16.msra.mxu0 %v9115_v8 }
 0x913   :  { %6152 = vmatprep.subr.bf16.mxu0 %v9561_v31 }
 0x916   :  { %6154 = vmatpush3.bf16.msra.mxu0 %v9120_v52 }
 0x917   :  { %6179 = vmatprep.subr.bf16.mxu0 %v9561_v31 }
 0x9cc   :  { %v3732_v25 = vpop.f32.mrb[66].mxu0 }
 0x9cd   :  { %3836 = vperm.xlu0 %6573, %v3732_v25   ;;  %3738 = vperm.xlu1 %6572, %v3732_v25   ;;  %v5595_v16 = vpop.f32.mrb[67].mxu0 }
 0x9d1   :  { %6580 = vrot.lane.b32.xlu0 %v9088_v51, %s7236_s19  ;;  %6575 = vrot.lane.b32.xlu1 %v9082_v41, %s7236_s19 }
 0x9d2   :  { %6609 = vset.pattern.permute.xlu1 %v9563_v23  ;;  %6696 = vset.pattern.permute.xlu0 %v9564_v39 }
 0x9d5   :  { %6590 = vrot.lane.b32.xlu0 %v9098_v32, %s7236_s19  ;;  %6585 = vrot.lane.b32.xlu1 %v9092_v61, %s7236_s19 }
 0x9d9   :  { %6605 = vrot.lane.b32.xlu0 %v9117_v1, %s7236_s19  ;;  %6595 = vrot.lane.b32.xlu1 %v9102_v36, %s7236_s19 }
 0x9dd   :  { %6617 = vrot.lane.b32.xlu0 %v9082_v41, %s7227_s20  ;;  %6600 = vrot.lane.b32.xlu1 %v9108_v26, %s7236_s19 }
 0x9e1   :  { %6627 = vrot.lane.b32.xlu0 %v9088_v51, %s7227_s20  ;;  %3998 = vperm.xlu1 %6609, %v3732_v25  }
 0x9e5   :  { %6637 = vrot.lane.b32.xlu0 %v9092_v61, %s7227_s20  ;;  %6610 = vset.pattern.permute.xlu1 %v9564_v39 }
 0x9e6   :  { %4144 = vperm.xlu1 %6610, %v3732_v25  }
 0x9e9   :  { %6647 = vrot.lane.b32.xlu0 %v9098_v32, %s7227_s20 }
 0x9ea   :  { %6612 = vrot.lane.b32.xlu1 %v9122_v57, %s7236_s19 }
 0x9ed   :  { %6657 = vrot.lane.b32.xlu0 %v9102_v36, %s7227_s20 }
 0x9ee   :  { %6622 = vrot.lane.b32.xlu1 %v9082_v41, %s7237_s0  ;;  %v3744_v41 = vrot.slane %v9164_v7, %v9567_v10 }
 0x9f2   :  { %6632 = vrot.lane.b32.xlu1 %v9088_v51, %s7237_s0  ;;  %v3302_v51 = vld [vmem:[%s9361_s9] sm:$0xf] }
 0x9f6   :  { %6642 = vrot.lane.b32.xlu1 %v9092_v61, %s7237_s0 }
 0x9fa   :  { %6652 = vrot.lane.b32.xlu1 %v9098_v32, %s7237_s0  ;;  %v9214_v32 = vunpack.c.l.bf16 %v3302_v51 }
 0x9fe   :  { %6662 = vrot.lane.b32.xlu1 %v9102_v36, %s7237_s0 }
 0xa4c   :  { %v3837_v5 = vpop.permute.xlu0 %3836  ;;  %v3739_v44 = vpop.permute.xlu1 %3738 }
 0xa4d   :  { %v3843_v61 = vadd.f32 %v3842_v19, %v3837_v5  ;;  %v3745_v59 = vadd.f32 %v3744_v41, %v3739_v44 }
 0xa4f   :  { %v3844_v20 = vmul.f32 0.2, %v3843_v61  ;;  %v3746_v38 = vmul.f32 0.2, %v3745_v59 }
 0xa50   :  { %v6576_v6 = vpop.permute.xlu1 %6575  ;;  %v6581_v36 = vpop.permute.xlu0 %6580 }
 0xa51   :  { %v3845_v35 = vmax.f32 %v3843_v61, %v3844_v20  ;;  %v3747_v47 = vmax.f32 %v3745_v59, %v3746_v38  ;;  %v6578_v12 = vunpack.i.h.bf16 %v6576_v6  ;;  %v6577_v48 = vunpack.i.l.bf16 %v6576_v6 }
 0xa52   :  { %v6583_v58 = vunpack.i.h.bf16 %v6581_v36  ;;  %v6582_v8 = vunpack.i.l.bf16 %v6581_v36 }
 0xa53   :  { %v9217_v53 = vadd.f32 %v3845_v35, %v9214_v32  ;;  %v9220_v30 = vadd.f32 %v3747_v47, %v9214_v32  ;;  %v6156_v50 = vpack.c.bf16 %v6578_v12, %v6577_v48 }
 0xa54   :  { %v6586_v22 = vpop.permute.xlu1 %6585  ;;  %v6159_v52 = vpack.c.bf16 %v6583_v58, %v6582_v8  ;;  %v6591_v15 = vpop.permute.xlu0 %6590 }
 0xa55   :  { %3847 = vmax.xlane.f32.xlu1 %v9217_v53  ;;  %3749 = vmax.xlane.f32.xlu0 %v9220_v30  ;;  %v6588_v55 = vunpack.i.h.bf16 %v6586_v22  ;;  %v6587_v43 = vunpack.i.l.bf16 %v6586_v22  ;;  %v6593_v46 = vunpack.i.h.bf16 %v6591_v15  ;;  %v6592_v3 = vunpack.i.l.bf16 %v6591_v15 }
 0xa56   :  { %6157 = vmatpush3.bf16.msra.mxu1 %v6156_v50 }
 0xa57   :  { %6158 = vmatprep.subr.bf16.mxu1 %v9561_v31  ;;  %v6162_v54 = vpack.c.bf16 %v6588_v55, %v6587_v43  ;;  %v6165_v42 = vpack.c.bf16 %v6593_v46, %v6592_v3 }
 0xa58   :  { %v6596_v21 = vpop.permute.xlu1 %6595  ;;  %v6606_v9 = vpop.permute.xlu0 %6605 }
 0xa59   :  { %v6598_v45 = vunpack.i.h.bf16 %v6596_v21  ;;  %v6597_v29 = vunpack.i.l.bf16 %v6596_v21  ;;  %v6608_v49 = vunpack.i.h.bf16 %v6606_v9  ;;  %v6607_v62 = vunpack.i.l.bf16 %v6606_v9 }
 0xa5a   :  { %6160 = vmatpush3.bf16.msra.mxu1 %v6159_v52 }
 0xa5b   :  { %6161 = vmatprep.subr.bf16.mxu1 %v9561_v31  ;;  %v6168_v24 = vpack.c.bf16 %v6598_v45, %v6597_v29  ;;  %v6174_v7 = vpack.c.bf16 %v6608_v49, %v6607_v62 }
 0xa5c   :  { %v6601_v11 = vpop.permute.xlu1 %6600  ;;  %v6618_v41 = vpop.permute.xlu0 %6617 }
 0xa5d   :  { %v6603_v14 = vunpack.i.h.bf16 %v6601_v11  ;;  %v6602_v27 = vunpack.i.l.bf16 %v6601_v11  ;;  %v6619_v11 = vunpack.i.l.bf16 %v6618_v41 }
 0xa5e   :  { %6163 = vmatpush3.bf16.msra.mxu1 %v6162_v54  ;;  %v6620_v54 = vunpack.i.h.bf16 %v6618_v41 }
 0xa5f   :  { %6164 = vmatprep.subr.bf16.mxu1 %v9561_v31  ;;  %v6171_v25 = vpack.c.bf16 %v6603_v14, %v6602_v27 }
 0xa60   :  { %v3999_v33 = vpop.permute.xlu1 %3998  ;;  %v6628_v44 = vpop.permute.xlu0 %6627 }
 0xa61   :  { %v4005_v60 = vadd.f32 %v4004_v0, %v3999_v33  ;;  %v6180_v33 = vpack.c.bf16 %v6620_v54, %v6619_v11 }
 0xa62   :  { %6166 = vmatpush3.bf16.msra.mxu1 %v6165_v42 }
 0xa63   :  { %v4006_v40 = vmul.f32 0.2, %v4005_v60  ;;  %6167 = vmatprep.subr.bf16.mxu1 %v9561_v31 }
 0xa64   :  { %v9246_v61 = vpop.permute.xlu0 %6637 }
 0xa65   :  { %v4007_v18 = vmax.f32 %v4005_v60, %v4006_v40  ;;  %v4145_v37 = vpop.permute.xlu1 %4144  ;;  %v6630_v60 = vunpack.i.h.bf16 %v6628_v44  ;;  %v6629_v40 = vunpack.i.l.bf16 %v6628_v44  ;;  %v6639_v9 = vunpack.i.l.bf16 %v9246_v61 }
 0xa66   :  { %v4151_v56 = vadd.f32 %v4150_v13, %v4145_v37  ;;  %6169 = vmatpush3.bf16.msra.mxu1 %v6168_v24  ;;  %6672 = vrot.lane.b32.xlu1 %v9108_v26, %s7237_s0  ;;  %v6640_v13 = vunpack.i.h.bf16 %v9246_v61 }
 0xa67   :  { %6170 = vmatprep.subr.bf16.mxu1 %v9561_v31  ;;  %v4008_v4 = vadd.f32 %v4007_v18, %v9214_v32  ;;  %v6183_v17 = vpack.c.bf16 %v6630_v60, %v6629_v40  ;;  %v4304_v60 = vld [vmem:[#allocation8] sm:$0xff]  ;;  %v4305_v40 = vld [vmem:[#allocation8 + $0x8] sm:$0xff] }
 0xa68   :  { %v4152_v16 = vmul.f32 0.2, %v4151_v56  ;;  %v9250_v20 = vpop.permute.xlu0 %6647 }
 0xa69   :  { %4009 = vmax.xlane.f32.xlu0 %v4008_v4  ;;  %v6613_v23 = vpop.permute.xlu1 %6612  ;;  %v6650_v49 = vunpack.i.h.bf16 %v9250_v20  ;;  %v6649_v62 = vunpack.i.l.bf16 %v9250_v20 }
 0xa6a   :  { %v4153_v39 = vmax.f32 %v4151_v56, %v4152_v16  ;;  %6172 = vmatpush3.bf16.msra.mxu1 %v6171_v25  ;;  %v6615_v63 = vunpack.i.h.bf16 %v6613_v23  ;;  %v6614_v28 = vunpack.i.l.bf16 %v6613_v23 }
 0xa6b   :  { %6173 = vmatprep.subr.bf16.mxu1 %v9561_v31 }
 0xa6c   :  { %v4154_v19 = vadd.f32 %v4153_v39, %v9214_v32  ;;  %v6177_v10 = vpack.c.bf16 %v6615_v63, %v6614_v28  ;;  %v9254_v32 = vpop.permute.xlu0 %6657  ;;  %v6189_v39 = vpack.c.bf16 %v6650_v49, %v6649_v62  ;;  %v4313_v49 = vld [vmem:[#allocation8 + $0x48] sm:$0xff] }
 0xa6d   :  { %v6623_v5 = vpop.permute.xlu1 %6622  ;;  %v6659_v63 = vunpack.i.l.bf16 %v9254_v32 }
 0xa6e   :  { %6175 = vmatpush3.bf16.msra.mxu1 %v6174_v7  ;;  %4155 = vmax.xlane.f32.xlu0 %v4154_v19  ;;  %v6625_v2 = vunpack.i.h.bf16 %v6623_v5  ;;  %v6624_v0 = vunpack.i.l.bf16 %v6623_v5  ;;  %v6660_v7 = vunpack.i.h.bf16 %v9254_v32 }
 0xa6f   :  { %6176 = vmatprep.subr.bf16.mxu1 %v9561_v31 }
 0xa70   :  { %v6192_v41 = vpack.c.bf16 %v6660_v7, %v6659_v63  ;;  %v4317_v7 = vld [vmem:[#allocation8 + $0x68] sm:$0xff] }
 0xa71   :  { %v9244_v51 = vpop.permute.xlu1 %6632 }
 0xa72   :  { %6178 = vmatpush3.bf16.msra.mxu1 %v6177_v10  ;;  %v6635_v14 = vunpack.i.h.bf16 %v9244_v51  ;;  %v6634_v27 = vunpack.i.l.bf16 %v9244_v51 }
 0xa73   :  { %6203 = vmatprep.subr.bf16.mxu1 %v9561_v31 }
 0xa74   :  { %v6207_v18 = vpack.c.bf16 %v6635_v14, %v6634_v27  ;;  %v4308_v14 = vld [vmem:[#allocation8 + $0x20] sm:$0xff]  ;;  %v4309_v27 = vld [vmem:[#allocation8 + $0x28] sm:$0xff] }
 0xa75   :  { %v9248_v59 = vpop.permute.xlu1 %6642 }
 0xa76   :  { %v6645_v37 = vunpack.i.h.bf16 %v9248_v59  ;;  %v6644_v56 = vunpack.i.l.bf16 %v9248_v59 }
 0xa78   :  { %v6210_v25 = vpack.c.bf16 %v6645_v37, %v6644_v56 }
 0xa79   :  { %v9252_v38 = vpop.permute.xlu1 %6652 }
 0xa7a   :  { %v6655_v16 = vunpack.i.h.bf16 %v9252_v38  ;;  %v6654_v23 = vunpack.i.l.bf16 %v9252_v38 }
 0xa7c   :  { %v6213_v28 = vpack.c.bf16 %v6655_v16, %v6654_v23  ;;  %v4315_v16 = vld [vmem:[#allocation8 + $0x58] sm:$0xff] }
 0xa7d   :  { %v9256_v6 = vpop.permute.xlu1 %6662 }
 0xa7e   :  { %v6664_v10 = vunpack.i.l.bf16 %v9256_v6 }
 0xa84   :  { %6667 = vrot.lane.b32.xlu0 %v9108_v26, %s7227_s20 }
 0xae2   :  { %v3750_v35 = vpop.xlane.xlu0 %3749  ;;  %v3848_v47 = vpop.xlane.xlu1 %3847 }
 0xae3   :  { %v3751_v26 = vsub.f32 %v9220_v30, %v3750_v35  ;;  %v3849_v36 = vsub.f32 %v9217_v53, %v3848_v47 }
 0xae5   :  { %v3752_v12 = vmul.f32 1.442695, %v3751_v26  ;;  %v3850_v48 = vmul.f32 1.442695, %v3849_v36 }
 0xae7   :  { %7081 = vpow2.f32 %v3752_v12 }
 0xae8   :  { %7083 = vpow2.f32 %v3850_v48 }
 0xaf1   :  { %v7082_v58 = vpop.eup %7081 }
 0xaf2   :  { %v7084_v8 = vpop.eup %7083  ;;  %3754 = vadd.xlane.f32.xlu1 %v7082_v58 }
 0xaf3   :  { %3852 = vadd.xlane.f32.xlu0 %v7084_v8 }
 0xaf6   :  { %v4010_v50 = vpop.xlane.xlu0 %4009 }
 0xaf7   :  { %v4011_v30 = vsub.f32 %v4008_v4, %v4010_v50  ;;  %v6186_v4 = vpack.c.bf16 %v6640_v13, %v6639_v9  ;;  %v4311_v13 = vld [vmem:[#allocation8 + $0x38] sm:$0xff] }
 0xaf9   :  { %v4012_v53 = vmul.f32 1.442695, %v4011_v30 }
 0xafb   :  { %v4156_v22 = vpop.xlane.xlu0 %4155 }
 0xafc   :  { %v4157_v52 = vsub.f32 %v4154_v19, %v4156_v22  ;;  %v6665_v19 = vunpack.i.h.bf16 %v9256_v6 }
 0xafe   :  { %v4158_v55 = vmul.f32 1.442695, %v4157_v52  ;;  %v6216_v51 = vpack.c.bf16 %v6665_v19, %v6664_v10  ;;  %v4319_v19 = vld [vmem:[#allocation8 + $0x78] sm:$0xff] }
 0xaff   :  { %v9276_v15 = vpop.permute.xlu0 %6667 }
 0xb00   :  { %7085 = vpow2.f32 %v4158_v55  ;;  %v6670_v5 = vunpack.i.h.bf16 %v9276_v15  ;;  %v6669_v44 = vunpack.i.l.bf16 %v9276_v15 }
 0xb01   :  { %7087 = vpow2.f32 %v4012_v53 }
 0xb02   :  { %v6195_v32 = vpack.c.bf16 %v6670_v5, %v6669_v44 }
 0xb03   :  { %6682 = vrot.lane.b32.xlu1 %v9117_v1, %s7237_s0 }
 0xb09   :  { %6677 = vrot.lane.b32.xlu0 %v9117_v1, %s7227_s20  ;;  %v9274_v1 = vpop.permute.xlu1 %6672 }
 0xb0a   :  { %v9264_v43 = vpop.eup %7085  ;;  %v6675_v61 = vunpack.i.h.bf16 %v9274_v1  ;;  %v6674_v59 = vunpack.i.l.bf16 %v9274_v1 }
 0xb0b   :  { %v9266_v21 = vpop.eup %7087 }
 0xb0c   :  { %v6219_v47 = vpack.c.bf16 %v6675_v61, %v6674_v59 }
 0xb27   :  { %4160 = vadd.xlane.f32.xlu1 %v9264_v43 }
 0xb28   :  { %4014 = vadd.xlane.f32.xlu0 %v9266_v21 }
 0xb38   :  { %6692 = vrot.lane.b32.xlu1 %v9122_v57, %s7237_s0 }
 0xb3e   :  { %6687 = vrot.lane.b32.xlu0 %v9122_v57, %s7227_s20  ;;  %v6204_v57 = vpack.c.bf16 %v6625_v2, %v6624_v0 }
 0xb7f   :  { %v3755_v46 = vpop.xlane.xlu1 %3754 }
 0xb80   :  { %v3853_v3 = vpop.xlane.xlu0 %3852  ;;  %7089 = vrcp.f32 %v3755_v46 }
 0xb81   :  { %7091 = vrcp.f32 %v3853_v3 }
 0xb83   :  { %v6683_v38 = vpop.permute.xlu1 %6682 }
 0xb84   :  { %v6678_v20 = vpop.permute.xlu0 %6677  ;;  %v6685_v26 = vunpack.i.h.bf16 %v6683_v38  ;;  %v6684_v36 = vunpack.i.l.bf16 %v6683_v38 }
 0xb85   :  { %v6680_v6 = vunpack.i.h.bf16 %v6678_v20  ;;  %v6679_v35 = vunpack.i.l.bf16 %v6678_v20 }
 0xb86   :  { %v6222_v48 = vpack.c.bf16 %v6685_v26, %v6684_v36 }
 0xb87   :  { %v6198_v12 = vpack.c.bf16 %v6680_v6, %v6679_v35 }
 0xb8a   :  { %v7090_v42 = vpop.eup %7089 }
 0xb8b   :  { %v7092_v45 = vpop.eup %7091  ;;  %v3758_v29 = vmul.f32 %v7090_v42, %v7082_v58 }
 0xb8c   :  { %v3856_v24 = vmul.f32 %v7092_v45, %v7084_v8 }
 0xb8d   :  { %5629 = vmatmul.mubr.f32.vlgmr.msra.gmra.mrb[68].mxu0 %v3758_v29 }
 0xb8e   :  { %5664 = vmatmul.mubr.f32.vlgmr.msra.gmra.mrb[82].mxu1 %v3856_v24  ;;  %6181 = vmatpush3.bf16.msra.mxu0 %v6180_v33  ;;  %v4306_v24 = vld [vmem:[#allocation8 + $0x10] sm:$0xff] }
 0xb8f   :  { %6205 = vmatpush3.bf16.msra.mxu1 %v6204_v57  ;;  %6182 = vmatprep.subr.bf16.mxu0 %v9561_v31  ;;  %v6228_v57 = vpack.c.bf16 %v4305_v40, %v4304_v60 }
 0xb90   :  { %6206 = vmatprep.subr.bf16.mxu1 %v9561_v31  ;;  %5698 = vmatprep.mubr.msk.f32.mxu0 %vm7234_vm0, %v9562_v34 }
 0xb91   :  { %5733 = vmatprep.mubr.msk.f32.mxu1 %vm7234_vm0, %v9562_v34 }
 0xb92   :  { %6184 = vmatpush3.bf16.msra.mxu0 %v6183_v17  ;;  %v4310_v17 = vld [vmem:[#allocation8 + $0x30] sm:$0xff] }
 0xb93   :  { %6208 = vmatpush3.bf16.msra.mxu1 %v6207_v18  ;;  %6185 = vmatprep.subr.bf16.mxu0 %v9561_v31  ;;  %v6237_v37 = vpack.c.bf16 %v4311_v13, %v4310_v17 }
 0xb94   :  { %6209 = vmatprep.subr.bf16.mxu1 %v9561_v31 }
 0xb96   :  { %6187 = vmatpush3.bf16.msra.mxu0 %v6186_v4  ;;  %v4312_v4 = vld [vmem:[#allocation8 + $0x40] sm:$0xff] }
 0xb97   :  { %6211 = vmatpush3.bf16.msra.mxu1 %v6210_v25  ;;  %6188 = vmatprep.subr.bf16.mxu0 %v9561_v31  ;;  %v6240_v62 = vpack.c.bf16 %v4313_v49, %v4312_v4  ;;  %v4314_v25 = vld [vmem:[#allocation8 + $0x50] sm:$0xff] }
 0xb98   :  { %6212 = vmatprep.subr.bf16.mxu1 %v9561_v31  ;;  %v6243_v23 = vpack.c.bf16 %v4315_v16, %v4314_v25 }
 0xb9a   :  { %6190 = vmatpush3.bf16.msra.mxu0 %v6189_v39  ;;  %v4316_v39 = vld [vmem:[#allocation8 + $0x60] sm:$0xff] }
 0xb9b   :  { %6214 = vmatpush3.bf16.msra.mxu1 %v6213_v28  ;;  %6191 = vmatprep.subr.bf16.mxu0 %v9561_v31  ;;  %v6246_v63 = vpack.c.bf16 %v4317_v7, %v4316_v39  ;;  %v4318_v28 = vld [vmem:[#allocation8 + $0x70] sm:$0xff] }
 0xb9c   :  { %6215 = vmatprep.subr.bf16.mxu1 %v9561_v31  ;;  %v6249_v10 = vpack.c.bf16 %v4319_v19, %v4318_v28 }
 0xb9e   :  { %6193 = vmatpush3.bf16.msra.mxu0 %v6192_v41 }
 0xb9f   :  { %6217 = vmatpush3.bf16.msra.mxu1 %v6216_v51  ;;  %6194 = vmatprep.subr.bf16.mxu0 %v9561_v31 }
 0xba0   :  { %6218 = vmatprep.subr.bf16.mxu1 %v9561_v31 }
 0xba2   :  { %6196 = vmatpush3.bf16.msra.mxu0 %v6195_v32 }
 0xba3   :  { %6220 = vmatpush3.bf16.msra.mxu1 %v6219_v47  ;;  %6197 = vmatprep.subr.bf16.mxu0 %v9561_v31 }
 0xba4   :  { %6221 = vmatprep.subr.bf16.mxu1 %v9561_v31 }
 0xba6   :  { %6199 = vmatpush3.bf16.msra.mxu0 %v6198_v12 }
 0xba7   :  { %6223 = vmatpush3.bf16.msra.mxu1 %v6222_v48  ;;  %6200 = vmatprep.subr.bf16.mxu0 %v9561_v31 }
 0xba8   :  { %6224 = vmatprep.subr.bf16.mxu1 %v9561_v31 }
 0xbb4   :  { %v4161_v58 = vpop.xlane.xlu1 %4160 }
 0xbb5   :  { %v4015_v8 = vpop.xlane.xlu0 %4014  ;;  %7093 = vrcp.f32 %v4161_v58 }
 0xbb6   :  { %7095 = vrcp.f32 %v4015_v8 }
 0xbb8   :  { %v6693_v50 = vpop.permute.xlu1 %6692 }
 0xbb9   :  { %v6688_v22 = vpop.permute.xlu0 %6687  ;;  %v6695_v52 = vunpack.i.h.bf16 %v6693_v50  ;;  %v6694_v30 = vunpack.i.l.bf16 %v6693_v50 }
 0xbba   :  { %v6690_v55 = vunpack.i.h.bf16 %v6688_v22  ;;  %v6689_v53 = vunpack.i.l.bf16 %v6688_v22 }
 0xbbb   :  { %v6225_v1 = vpack.c.bf16 %v6695_v52, %v6694_v30 }
 0xbbc   :  { %v6201_v15 = vpack.c.bf16 %v6690_v55, %v6689_v53 }
 0xbbd   :  { %6226 = vmatpush3.bf16.msra.mxu1 %v6225_v1  ;;  %v4484_v1 = vld [vmem:[%s9364_s12] ss:$0 sm:$0xff] }
 0xbbe   :  { %6202 = vmatpush3.bf16.msra.mxu0 %v6201_v15 }
 0xbbf   :  { %v7094_v46 = vpop.eup %7093  ;;  %6227 = vmatprep.subr.bf16.mxu0 %v9561_v31 }
 0xbc0   :  { %v7096_v3 = vpop.eup %7095  ;;  %v4164_v54 = vmul.f32 %v7094_v46, %v9264_v43  ;;  %v4307_v43 = vld [vmem:[#allocation8 + $0x18] sm:$0xff] }
 0xbc1   :  { %v4018_v11 = vmul.f32 %v7096_v3, %v9266_v21  ;;  %v6231_v21 = vpack.c.bf16 %v4307_v43, %v4306_v24 }
 0xbc2   :  { %5734 = vmatmul.mubr.f32.vlgmr.msra.gmra.mrb[84].mxu1 %v4164_v54 }
 0xbc3   :  { %5699 = vmatmul.mubr.f32.vlgmr.msra.gmra.mrb[70].mxu0 %v4018_v11 }
 0xbc4   :  { %5768 = vmatprep.mubr.msk.f32.mxu0 %vm7234_vm0, %v9562_v34  ;;  %6229 = vmatpush3.bf16.msra.mxu0 %v6228_v57  ;;  %v6234_v34 = vpack.c.bf16 %v4309_v27, %v4308_v14 }
 0xbc5   :  { %6230 = vmatprep.subr.bf16.mxu0 %v9561_v31 }
 0xbc8   :  { %6232 = vmatpush3.bf16.msra.mxu0 %v6231_v21 }
 0xbc9   :  { %6233 = vmatprep.subr.bf16.mxu0 %v9561_v31 }
 0xbcc   :  { %6235 = vmatpush3.bf16.msra.mxu0 %v6234_v34 }
 0xbcd   :  { %6236 = vmatprep.subr.bf16.mxu0 %v9561_v31 }
 0xbd0   :  { %6238 = vmatpush3.bf16.msra.mxu0 %v6237_v37 }
 0xbd1   :  { %6239 = vmatprep.subr.bf16.mxu0 %v9561_v31 }
 0xbd4   :  { %6241 = vmatpush3.bf16.msra.mxu0 %v6240_v62 }
 0xbd5   :  { %6242 = vmatprep.subr.bf16.mxu0 %v9561_v31 }
 0xbd8   :  { %6244 = vmatpush3.bf16.msra.mxu0 %v6243_v23 }
 0xbd9   :  { %6245 = vmatprep.subr.bf16.mxu0 %v9561_v31 }
 0xbdc   :  { %6247 = vmatpush3.bf16.msra.mxu0 %v6246_v63 }
 0xbdd   :  { %6248 = vmatprep.subr.bf16.mxu0 %v9561_v31 }
 0xbe0   :  { %6250 = vmatpush3.bf16.msra.mxu0 %v6249_v10 }
 0xc60   :  { %v9319_v2 = vpop.f32.mrb[68].mxu0 }
 0xc61   :  { %v3987_v0 = vpop.f32.mrb[82].mxu1  ;;  %v5630_v42 = vpop.f32.mrb[69].mxu0  ;;  %v3830_v36 = vmin.f32 %v9319_v2, 0.0  ;;  %vm3829_vm13 = vcmp.gt.f32.partialorder %v9319_v2, 0.0 }
 0xc62   :  { %v3992_v45 = vmin.f32 %v3987_v0, 0.0  ;;  %v5665_v29 = vpop.f32.mrb[83].mxu1  ;;  %vm3991_vm0 = vcmp.gt.f32.partialorder %v3987_v0, 0.0 }
 0xc63   :  { %v3831_v12 = vmul.f32 1.442695, %v3830_v36 }
 0xc64   :  { %v3993_v33 = vmul.f32 1.442695, %v3992_v45 }
 0xc66   :  { %7097 = vpow2.f32 %v3993_v33 }
 0xc70   :  { %v7098_v9 = vpop.eup %7097 }
 0xc71   :  { %v4481_v18 = vadd.f32 -1.0, %v7098_v9 }
 0xc73   :  { %v3996_v56 = vsel %vm3991_vm0, %v3987_v0, %v4481_v18 }
 0xc74   :  { %4290 = vrot.lane.b32.xlu0 %v3996_v56, %s7237_s0 }
 0xc95   :  { %v4279_v41 = vpop.f32.mrb[84].mxu1 }
 0xc96   :  { %v4133_v5 = vpop.f32.mrb[70].mxu0  ;;  %v4284_v44 = vmin.f32 %v4279_v41, 0.0  ;;  %v5735_v51 = vpop.f32.mrb[85].mxu1  ;;  %vm4283_vm9 = vcmp.gt.f32.partialorder %v4279_v41, 0.0 }
 0xc97   :  { %v4138_v61 = vmin.f32 %v4133_v5, 0.0  ;;  %v5700_v59 = vpop.f32.mrb[71].mxu0  ;;  %vm4137_vm10 = vcmp.gt.f32.partialorder %v4133_v5, 0.0 }
 0xc98   :  { %v4285_v20 = vmul.f32 1.442695, %v4284_v44 }
 0xc99   :  { %v4139_v38 = vmul.f32 1.442695, %v4138_v61 }
 0xc9a   :  { %7099 = vpow2.f32 %v4285_v20 }
 0xc9b   :  { %7101 = vpow2.f32 %v4139_v38 }
 0xc9c   :  { %7103 = vpow2.f32 %v3831_v12 }
 0xca4   :  { %v7100_v32 = vpop.eup %7099 }
 0xca5   :  { %v7102_v6 = vpop.eup %7101  ;;  %v4483_v35 = vadd.f32 -1.0, %v7100_v32 }
 0xca6   :  { %v4482_v47 = vadd.f32 -1.0, %v7102_v6  ;;  %v7104_v48 = vpop.eup %7103 }
 0xca7   :  { %v4288_v26 = vsel %vm4283_vm9, %v4279_v41, %v4483_v35  ;;  %v4480_v58 = vadd.f32 -1.0, %v7104_v48 }
 0xca8   :  { %4298 = vrot.lane.b32.xlu0 %v4288_v26, %s7236_s19  ;;  %v4142_v31 = vsel %vm4137_vm10, %v4133_v5, %v4482_v47  ;;  %s7242_s19 = smov [#allocation10]  }
 0xca9   :  { %4294 = vrot.lane.b32.xlu1 %v4142_v31, %s7227_s20  ;;  %v3834_v50 = vsel %vm3829_vm13, %v9319_v2, %v4480_v58  ;;  %s4405_s0 = sshll.u32 %s7242_s19, 4  ;;  %s4406_s0 = int_to_ptr.vmem [resolvable:$true] %s4405_s0 }
 0xcaa   :  { %s7195_s11 = scalar_lea.vmem %s4406_s0, 128  ;;  %p7200_p5 = scmp.lt.s32.totalorder %s4406_s0, %s4406_s0 }
 0xcab   :  { %p7196_p4 = scmp.ne.s32.totalorder %s4406_s0, %s7195_s11  ;;  %p7201_p6 = scmp.lt.s32.totalorder %s7195_s11, %s7195_s11 }
 0xcad   :  { %p7202_p7 = por %p7201_p6, %p7200_p5 }
 0xcaf   :  { %p7203_p8 = pnand %p7202_p7, %p7196_p4 }
 0xce6   :  { %v4291_v8 = vpop.permute.xlu0 %4290 }
 0xce7   :  { %v4301_v52 = vsel %vm3218_vm7, %v3834_v50, %v4291_v8 }
 0xd1a   :  { %v4299_v22 = vpop.permute.xlu0 %4298 }
 0xd1b   :  { %v4295_v30 = vpop.permute.xlu1 %4294 }
 0xd1c   :  { %v4302_v55 = vsel %vm3235_vm11, %v4301_v52, %v4295_v30 }
 0xd1d   :  { %v4303_v53 = vsel %vm3252_vm12, %v4302_v55, %v4299_v22 }
 0xd1e   :  { %5769 = vmatmul.mubr.f32.vlgmr.msra.gmra.mrb[72].mxu0 %v4303_v53 }
 0xdf1   :  { %v4393_v15 = vpop.f32.mrb[72].mxu0 }
 0xdf2   :  { %v4394_v46 = vadd.f32 %v4484_v1, %v4393_v15  ;;  %v5770_v3 = vpop.f32.mrb[73].mxu0 }
 0xdf4   :  { %7105 = vtanh.f32 %v4394_v46 }
 0xdfe   :  { %v7106_v54 = vpop.eup %7105 }
 0xdff   :  { %4398 = vst [vmem:[#allocation10] sm:$0xff] %v7106_v54 }
 0xe00   :  { %7206 = shalt.err (!%p7203_p8)
}
 0xe01   :  { %s7207_s12 = scalar_lea.hbm %s9365_s13, 128 }
 0xe02   :  { %p7208_p9 = scmp.ne.s32.totalorder %s9365_s13, %s7207_s12  ;;  %p7211_p10 = scmp.lt.u32.totalorder %s7207_s12, %s9365_s13 }
 0xe04   :  { %p7213_p11 = pnand %p7211_p10, %p7208_p9 }
 0xe06   :  { %7216 = shalt.err (!%p7213_p11)
}
 0xe07   :  { %4408 = dma.vmem_to_hbm [thread:$0]  %s4406_s0, 128, %s9365_s13, [#allocation4]  }
 0xe08   :  { %7223 = dma.done.wait [#allocation4], 128  }
 0xe09   :  { %7224 = vsyncadd [#allocation4], 4294967168 }
 0xe0a   :  { %4412 = vsyncpa [#allocation3], 1 }
 0xe0b   :  { %4413 = vsyncpa [#allocation6], 1 }
 0xe0c   :  { %4414 = vsyncpa [#allocation9], 1 }
 0xe0d   :  { %4415 = vsyncpa [#allocation4], 1 }

</bundles_post_ra>
